<compile_context>
chip_gen: v7x
topology: tpu7x:2x2x1
jax: 0.10.0
libtpu: 0.0.40
codegen_flags: <defaults>
</compile_context>

<pallas_src>
import jax
import jax.numpy as jnp
from jax import lax
from jax.experimental import pallas as pl
from jax.experimental.pallas import tpu as pltpu

_LANE = 128


def _basic_block_kernel(x_ref, w1_ref, s1_ref, b1_ref, w2_ref, s2_ref,
                        b2_ref, o_ref, pad_sc):
    # x_ref  : (1, H, W, Cp)   bf16, one batch element (NOT spatially padded)
    # w1_ref : (9*Cp, Cp)      bf16, im2col-folded conv1 weights
    # w2_ref : (9*Cp, Cp)      bf16, im2col-folded conv2 weights
    # s*/b*  : (1, Cp)         f32, folded BN scale / bias
    # o_ref  : (1, H, W, Cp)   f32
    # pad_sc : (H+2, W+2, Cp)  bf16 VMEM scratch with a zero 1-pixel halo
    H, W, Cp = o_ref.shape[1], o_ref.shape[2], o_ref.shape[3]
    Hp, Wp = H + 2, W + 2

    # Zero ONLY the halo border (the interior is fully rewritten every step).
    # Done per grid step — it is tiny — so it stays correct even if the batch
    # axis is split across TensorCores (megacore), unlike a program_id==0 gate.
    zrow = jnp.zeros((1, Wp, Cp), pad_sc.dtype)
    zcol = jnp.zeros((Hp, 1, Cp), pad_sc.dtype)
    pad_sc[0:1, :, :] = zrow
    pad_sc[Hp - 1:Hp, :, :] = zrow
    pad_sc[:, 0:1, :] = zcol
    pad_sc[:, Wp - 1:Wp, :] = zcol

    x = x_ref[0]                                    # (H, W, Cp) bf16

    def conv3x3(w_ref):
        # im2col: build one (H*W, 9*Cp) patch -> single MXU matmul, K = 9*Cp.
        xp = pad_sc[...]                            # (Hp, Wp, Cp)
        patches = jnp.concatenate(
            [xp[kh:kh + H, kw:kw + W, :]
             for kh in range(3) for kw in range(3)],
            axis=-1).reshape(H * W, 9 * Cp)
        return jnp.dot(patches, w_ref[...],
                       preferred_element_type=jnp.float32)  # (H*W, Cp) f32

    # ---- conv1 -> bn1 (folded) -> relu ----
    pad_sc[1:H + 1, 1:W + 1, :] = x
    out1 = jnp.maximum(conv3x3(w1_ref) * s1_ref[...] + b1_ref[...], 0.0)

    # ---- conv2 -> bn2 (folded); reuse the same padded scratch (border still 0)
    pad_sc[1:H + 1, 1:W + 1, :] = out1.reshape(H, W, Cp).astype(pad_sc.dtype)
    out2 = conv3x3(w2_ref) * s2_ref[...] + b2_ref[...]

    # ---- residual add + relu ----
    res = x.reshape(H * W, Cp).astype(jnp.float32)
    o_ref[0] = jnp.maximum(out2 + res, 0.0).reshape(H, W, Cp).astype(o_ref.dtype)


def basic_block_pallas(x_nhwc, w1, scale1, bias1, w2, scale2, bias2):
    """Fused BasicBlock forward (stride=1, downsample=None).

    x_nhwc: (N, H, W, C) f32; w*: (3, 3, C, C) HWIO; scale*/bias*: (C,) f32.
    Returns (N, H, W, C) f32.
    """
    N, H, W, C = x_nhwc.shape
    assert w1.shape == (3, 3, C, C) and w2.shape == (3, 3, C, C), \
        "downsample=None with stride=1 requires inplanes == planes"
    Cp = ((C + _LANE - 1) // _LANE) * _LANE   # lane-dense channel padding

    def pad_c(a, axes):
        pads = [(0, 0)] * a.ndim
        for ax in axes:
            pads[ax] = (0, Cp - a.shape[ax])
        return jnp.pad(a, pads)

    # bf16 activations/weights (MXU native rate, half the HBM/VMEM bytes);
    # BN params stay f32.  No spatial pre-padding — halo handled in-kernel.
    xb = pad_c(x_nhwc, [3]).astype(jnp.bfloat16)                   # (N,H,W,Cp)
    w1p = pad_c(w1, [2, 3]).astype(jnp.bfloat16).reshape(9 * Cp, Cp)
    w2p = pad_c(w2, [2, 3]).astype(jnp.bfloat16).reshape(9 * Cp, Cp)
    s1 = pad_c(scale1.reshape(1, C).astype(jnp.float32), [1])
    b1 = pad_c(bias1.reshape(1, C).astype(jnp.float32), [1])
    s2 = pad_c(scale2.reshape(1, C).astype(jnp.float32), [1])
    b2 = pad_c(bias2.reshape(1, C).astype(jnp.float32), [1])

    out = pl.pallas_call(
        _basic_block_kernel,
        out_shape=jax.ShapeDtypeStruct((N, H, W, Cp), jnp.float32),
        grid_spec=pltpu.PrefetchScalarGridSpec(
            num_scalar_prefetch=0,
            grid=(N,),
            in_specs=[
                pl.BlockSpec((1, H, W, Cp), lambda n: (n, 0, 0, 0)),
                pl.BlockSpec((9 * Cp, Cp), lambda n: (0, 0)),
                pl.BlockSpec((1, Cp), lambda n: (0, 0)),
                pl.BlockSpec((1, Cp), lambda n: (0, 0)),
                pl.BlockSpec((9 * Cp, Cp), lambda n: (0, 0)),
                pl.BlockSpec((1, Cp), lambda n: (0, 0)),
                pl.BlockSpec((1, Cp), lambda n: (0, 0)),
            ],
            out_specs=pl.BlockSpec((1, H, W, Cp), lambda n: (n, 0, 0, 0)),
            scratch_shapes=[pltpu.VMEM((H + 2, W + 2, Cp), jnp.bfloat16)],
        ),
        compiler_params=pltpu.CompilerParams(
            dimension_semantics=("parallel",)),
    )(xb, w1p, s1, b1, w2p, s2, b2)

    return out[..., :C]


def ref_forward(x_nhwc, w1, s1, b1, w2, s2, b2):
    """Plain-JAX reference mirroring the kernel's bf16/f32 mixed precision."""
    dn = ('NHWC', 'HWIO', 'NHWC')
    xb = x_nhwc.astype(jnp.bfloat16)
    y = lax.conv_general_dilated(xb, w1.astype(jnp.bfloat16), (1, 1), 'SAME',
                                 dimension_numbers=dn,
                                 preferred_element_type=jnp.float32)
    y = jnp.maximum(y * s1 + b1, 0.0)
    z = lax.conv_general_dilated(y.astype(jnp.bfloat16),
                                 w2.astype(jnp.bfloat16), (1, 1), 'SAME',
                                 dimension_numbers=dn,
                                 preferred_element_type=jnp.float32)
    z = z * s2 + b2
    return jnp.maximum(z + xb.astype(jnp.float32), 0.0)


if __name__ == "__main__":
    # Small shapes consistent with BasicBlock(inplanes=4, planes=4, stride=1).
    N, C, H, W = 2, 4, 16, 16  # PyTorch NCHW input shape: (2, 4, 16, 16)
    key = jax.random.PRNGKey(0)
    (kx, kw1, kw2, kg1, kb1, km1, kv1,
     kg2, kb2, km2, kv2) = jax.random.split(key, 11)

    x_nchw = jax.random.normal(kx, (N, C, H, W), jnp.float32)
    x_nhwc = jnp.transpose(x_nchw, (0, 2, 3, 1))  # to kernel layout

    # conv weights (HWIO), deterministic
    w1 = jax.random.normal(kw1, (3, 3, C, C), jnp.float32) * 0.1
    w2 = jax.random.normal(kw2, (3, 3, C, C), jnp.float32) * 0.1

    # BatchNorm params (inference mode), folded into per-channel scale/bias
    eps = 1e-5
    gamma1 = 1.0 + 0.1 * jax.random.normal(kg1, (C,), jnp.float32)
    beta1 = 0.1 * jax.random.normal(kb1, (C,), jnp.float32)
    mean1 = 0.1 * jax.random.normal(km1, (C,), jnp.float32)
    var1 = 1.0 + 0.1 * jax.random.uniform(kv1, (C,), jnp.float32)
    gamma2 = 1.0 + 0.1 * jax.random.normal(kg2, (C,), jnp.float32)
    beta2 = 0.1 * jax.random.normal(kb2, (C,), jnp.float32)
    mean2 = 0.1 * jax.random.normal(km2, (C,), jnp.float32)
    var2 = 1.0 + 0.1 * jax.random.uniform(kv2, (C,), jnp.float32)

    scale1 = gamma1 / jnp.sqrt(var1 + eps)
    bias1 = beta1 - mean1 * scale1
    scale2 = gamma2 / jnp.sqrt(var2 + eps)
    bias2 = beta2 - mean2 * scale2

    out = basic_block_pallas(x_nhwc, w1, scale1, bias1, w2, scale2, bias2)
    out = jax.block_until_ready(out)

    ref = ref_forward(x_nhwc, w1,
                      scale1.reshape(1, 1, 1, C), bias1.reshape(1, 1, 1, C),
                      w2,
                      scale2.reshape(1, 1, 1, C), bias2.reshape(1, 1, 1, C))
    ref = jax.block_until_ready(ref)

    assert out.shape == (N, H, W, C)
    err = float(jnp.max(jnp.abs(out - ref)))
    assert err < 2e-2, f"mismatch vs reference: {err}"

    print("KERNEL_OK")
</pallas_src>

<mosaic_0001>
module attributes {stable_mosaic.version = 11 : i64} {
  func.func @_basic_block_kernel(%arg0: i32, %arg1: memref<1x16x16x128xbf16, #tpu.memory_space<vmem>>, %arg2: memref<1152x128xbf16, #tpu.memory_space<vmem>>, %arg3: memref<1x128xf32, #tpu.memory_space<vmem>>, %arg4: memref<1x128xf32, #tpu.memory_space<vmem>>, %arg5: memref<1152x128xbf16, #tpu.memory_space<vmem>>, %arg6: memref<1x128xf32, #tpu.memory_space<vmem>>, %arg7: memref<1x128xf32, #tpu.memory_space<vmem>>, %arg8: memref<1x16x16x128xf32, #tpu.memory_space<vmem>>, %arg9: memref<18x18x128xbf16, #tpu.memory_space<vmem>>) attributes {dimension_semantics = [#tpu.dimension_semantics<parallel>], iteration_bounds = array<i64: 2>, scalar_prefetch = 0 : i64, scratch_operands = 1 : i64, tpu.core_type = #tpu.core_type<tc>, window_params = [{transform_indices = @transform_0, window_bounds = array<i64: 1, 16, 16, 128>}, {pipeline_mode = #tpu.pipeline_mode<synchronous>, transform_indices = @transform_1, window_bounds = array<i64: 1152, 128>}, {pipeline_mode = #tpu.pipeline_mode<synchronous>, transform_indices = @transform_2, window_bounds = array<i64: 1, 128>}, {pipeline_mode = #tpu.pipeline_mode<synchronous>, transform_indices = @transform_3, window_bounds = array<i64: 1, 128>}, {pipeline_mode = #tpu.pipeline_mode<synchronous>, transform_indices = @transform_4, window_bounds = array<i64: 1152, 128>}, {pipeline_mode = #tpu.pipeline_mode<synchronous>, transform_indices = @transform_5, window_bounds = array<i64: 1, 128>}, {pipeline_mode = #tpu.pipeline_mode<synchronous>, transform_indices = @transform_6, window_bounds = array<i64: 1, 128>}, {transform_indices = @transform_7, window_bounds = array<i64: 1, 16, 16, 128>}]} {
    %cst = arith.constant 0.000000e+00 : bf16
    %0 = vector.broadcast %cst : bf16 to vector<1x18x128xbf16>
    %cst_0 = arith.constant 0.000000e+00 : bf16
    %1 = vector.broadcast %cst_0 : bf16 to vector<18x1x128xbf16>
    %c0 = arith.constant 0 : index
    %c0_1 = arith.constant 0 : index
    %c0_2 = arith.constant 0 : index
    %2 = vector.load %arg9[%c0, %c0_1, %c0_2] : memref<18x18x128xbf16, #tpu.memory_space<vmem>>, vector<1x18x128xbf16>
    tpu.vector_store %arg9[%c0, %c0_1, %c0_2], %0 {strides = array<i32>} : memref<18x18x128xbf16, #tpu.memory_space<vmem>>, vector<1x18x128xbf16>,
    %c17 = arith.constant 17 : index
    %c0_3 = arith.constant 0 : index
    %c0_4 = arith.constant 0 : index
    %3 = vector.load %arg9[%c17, %c0_3, %c0_4] : memref<18x18x128xbf16, #tpu.memory_space<vmem>>, vector<1x18x128xbf16>
    tpu.vector_store %arg9[%c17, %c0_3, %c0_4], %0 {strides = array<i32>} : memref<18x18x128xbf16, #tpu.memory_space<vmem>>, vector<1x18x128xbf16>,
    %c0_5 = arith.constant 0 : index
    %c0_6 = arith.constant 0 : index
    %c0_7 = arith.constant 0 : index
    %4 = vector.load %arg9[%c0_5, %c0_6, %c0_7] : memref<18x18x128xbf16, #tpu.memory_space<vmem>>, vector<18x1x128xbf16>
    tpu.vector_store %arg9[%c0_5, %c0_6, %c0_7], %1 {strides = array<i32>} : memref<18x18x128xbf16, #tpu.memory_space<vmem>>, vector<18x1x128xbf16>,
    %c0_8 = arith.constant 0 : index
    %c17_9 = arith.constant 17 : index
    %c0_10 = arith.constant 0 : index
    %5 = vector.load %arg9[%c0_8, %c17_9, %c0_10] : memref<18x18x128xbf16, #tpu.memory_space<vmem>>, vector<18x1x128xbf16>
    tpu.vector_store %arg9[%c0_8, %c17_9, %c0_10], %1 {strides = array<i32>} : memref<18x18x128xbf16, #tpu.memory_space<vmem>>, vector<18x1x128xbf16>,
    %c0_11 = arith.constant 0 : index
    %c0_12 = arith.constant 0 : index
    %c0_13 = arith.constant 0 : index
    %c0_14 = arith.constant 0 : index
    %6 = vector.load %arg1[%c0_11, %c0_12, %c0_13, %c0_14] : memref<1x16x16x128xbf16, #tpu.memory_space<vmem>>, vector<1x16x16x128xbf16>
    %7 = vector.shape_cast %6 : vector<1x16x16x128xbf16> to vector<16x16x128xbf16>
    %c1 = arith.constant 1 : index
    %c1_15 = arith.constant 1 : index
    %c0_16 = arith.constant 0 : index
    %8 = vector.load %arg9[%c1, %c1_15, %c0_16] : memref<18x18x128xbf16, #tpu.memory_space<vmem>>, vector<16x16x128xbf16>
    tpu.vector_store %arg9[%c1, %c1_15, %c0_16], %7 {strides = array<i32>} : memref<18x18x128xbf16, #tpu.memory_space<vmem>>, vector<16x16x128xbf16>,
    %c0_17 = arith.constant 0 : index
    %c0_18 = arith.constant 0 : index
    %c0_19 = arith.constant 0 : index
    %9 = vector.load %arg9[%c0_17, %c0_18, %c0_19] : memref<18x18x128xbf16, #tpu.memory_space<vmem>>, vector<18x18x128xbf16>
    %10 = vector.extract_strided_slice %9 {offsets = [0, 0, 0], sizes = [16, 16, 128], strides = [1, 1, 1]} : vector<18x18x128xbf16> to vector<16x16x128xbf16>
    %11 = vector.extract_strided_slice %9 {offsets = [0, 1, 0], sizes = [16, 16, 128], strides = [1, 1, 1]} : vector<18x18x128xbf16> to vector<16x16x128xbf16>
    %12 = vector.extract_strided_slice %9 {offsets = [0, 2, 0], sizes = [16, 16, 128], strides = [1, 1, 1]} : vector<18x18x128xbf16> to vector<16x16x128xbf16>
    %13 = vector.extract_strided_slice %9 {offsets = [1, 0, 0], sizes = [16, 16, 128], strides = [1, 1, 1]} : vector<18x18x128xbf16> to vector<16x16x128xbf16>
    %14 = vector.extract_strided_slice %9 {offsets = [1, 1, 0], sizes = [16, 16, 128], strides = [1, 1, 1]} : vector<18x18x128xbf16> to vector<16x16x128xbf16>
    %15 = vector.extract_strided_slice %9 {offsets = [1, 2, 0], sizes = [16, 16, 128], strides = [1, 1, 1]} : vector<18x18x128xbf16> to vector<16x16x128xbf16>
    %16 = vector.extract_strided_slice %9 {offsets = [2, 0, 0], sizes = [16, 16, 128], strides = [1, 1, 1]} : vector<18x18x128xbf16> to vector<16x16x128xbf16>
    %17 = vector.extract_strided_slice %9 {offsets = [2, 1, 0], sizes = [16, 16, 128], strides = [1, 1, 1]} : vector<18x18x128xbf16> to vector<16x16x128xbf16>
    %18 = vector.extract_strided_slice %9 {offsets = [2, 2, 0], sizes = [16, 16, 128], strides = [1, 1, 1]} : vector<18x18x128xbf16> to vector<16x16x128xbf16>
    %19 = tpu.concatenate %10, %11, %12, %13, %14, %15, %16, %17, %18 in 2 : vector<16x16x128xbf16>, vector<16x16x128xbf16>, vector<16x16x128xbf16>, vector<16x16x128xbf16>, vector<16x16x128xbf16>, vector<16x16x128xbf16>, vector<16x16x128xbf16>, vector<16x16x128xbf16>, vector<16x16x128xbf16> -> vector<16x16x1152xbf16>
    %20 = vector.shape_cast %19 : vector<16x16x1152xbf16> to vector<256x1152xbf16>
    %c0_20 = arith.constant 0 : index
    %c0_21 = arith.constant 0 : index
    %21 = vector.load %arg2[%c0_20, %c0_21] : memref<1152x128xbf16, #tpu.memory_space<vmem>>, vector<1152x128xbf16>
    %cst_22 = arith.constant dense<0.000000e+00> : vector<256x128xf32>
    %22 = tpu.matmul %20, %21, %cst_22 {dimension_numbers = #tpu.dot_dimension_numbers<[1], [0], [0], [1], [0, 0, 1, 1], [], []>} : vector<256x1152xbf16>, vector<1152x128xbf16>, vector<256x128xf32> -> vector<256x128xf32>
    %c0_23 = arith.constant 0 : index
    %c0_24 = arith.constant 0 : index
    %23 = vector.load %arg3[%c0_23, %c0_24] : memref<1x128xf32, #tpu.memory_space<vmem>>, vector<1x128xf32>
    %24 = vector.broadcast %23 : vector<1x128xf32> to vector<256x128xf32>
    %25 = arith.mulf %22, %24 : vector<256x128xf32>
    %c0_25 = arith.constant 0 : index
    %c0_26 = arith.constant 0 : index
    %26 = vector.load %arg4[%c0_25, %c0_26] : memref<1x128xf32, #tpu.memory_space<vmem>>, vector<1x128xf32>
    %27 = vector.broadcast %26 : vector<1x128xf32> to vector<256x128xf32>
    %28 = arith.addf %25, %27 : vector<256x128xf32>
    %cst_27 = arith.constant 0.000000e+00 : f32
    %29 = vector.broadcast %cst_27 : f32 to vector<256x128xf32>
    %30 = arith.maximumf %28, %29 : vector<256x128xf32>
    %31 = vector.shape_cast %30 : vector<256x128xf32> to vector<16x16x128xf32>
    %32 = arith.truncf %31 : vector<16x16x128xf32> to vector<16x16x128xbf16>
    %c1_28 = arith.constant 1 : index
    %c1_29 = arith.constant 1 : index
    %c0_30 = arith.constant 0 : index
    %33 = vector.load %arg9[%c1_28, %c1_29, %c0_30] : memref<18x18x128xbf16, #tpu.memory_space<vmem>>, vector<16x16x128xbf16>
    tpu.vector_store %arg9[%c1_28, %c1_29, %c0_30], %32 {strides = array<i32>} : memref<18x18x128xbf16, #tpu.memory_space<vmem>>, vector<16x16x128xbf16>,
    %c0_31 = arith.constant 0 : index
    %c0_32 = arith.constant 0 : index
    %c0_33 = arith.constant 0 : index
    %34 = vector.load %arg9[%c0_31, %c0_32, %c0_33] : memref<18x18x128xbf16, #tpu.memory_space<vmem>>, vector<18x18x128xbf16>
    %35 = vector.extract_strided_slice %34 {offsets = [0, 0, 0], sizes = [16, 16, 128], strides = [1, 1, 1]} : vector<18x18x128xbf16> to vector<16x16x128xbf16>
    %36 = vector.extract_strided_slice %34 {offsets = [0, 1, 0], sizes = [16, 16, 128], strides = [1, 1, 1]} : vector<18x18x128xbf16> to vector<16x16x128xbf16>
    %37 = vector.extract_strided_slice %34 {offsets = [0, 2, 0], sizes = [16, 16, 128], strides = [1, 1, 1]} : vector<18x18x128xbf16> to vector<16x16x128xbf16>
    %38 = vector.extract_strided_slice %34 {offsets = [1, 0, 0], sizes = [16, 16, 128], strides = [1, 1, 1]} : vector<18x18x128xbf16> to vector<16x16x128xbf16>
    %39 = vector.extract_strided_slice %34 {offsets = [1, 1, 0], sizes = [16, 16, 128], strides = [1, 1, 1]} : vector<18x18x128xbf16> to vector<16x16x128xbf16>
    %40 = vector.extract_strided_slice %34 {offsets = [1, 2, 0], sizes = [16, 16, 128], strides = [1, 1, 1]} : vector<18x18x128xbf16> to vector<16x16x128xbf16>
    %41 = vector.extract_strided_slice %34 {offsets = [2, 0, 0], sizes = [16, 16, 128], strides = [1, 1, 1]} : vector<18x18x128xbf16> to vector<16x16x128xbf16>
    %42 = vector.extract_strided_slice %34 {offsets = [2, 1, 0], sizes = [16, 16, 128], strides = [1, 1, 1]} : vector<18x18x128xbf16> to vector<16x16x128xbf16>
    %43 = vector.extract_strided_slice %34 {offsets = [2, 2, 0], sizes = [16, 16, 128], strides = [1, 1, 1]} : vector<18x18x128xbf16> to vector<16x16x128xbf16>
    %44 = tpu.concatenate %35, %36, %37, %38, %39, %40, %41, %42, %43 in 2 : vector<16x16x128xbf16>, vector<16x16x128xbf16>, vector<16x16x128xbf16>, vector<16x16x128xbf16>, vector<16x16x128xbf16>, vector<16x16x128xbf16>, vector<16x16x128xbf16>, vector<16x16x128xbf16>, vector<16x16x128xbf16> -> vector<16x16x1152xbf16>
    %45 = vector.shape_cast %44 : vector<16x16x1152xbf16> to vector<256x1152xbf16>
    %c0_34 = arith.constant 0 : index
    %c0_35 = arith.constant 0 : index
    %46 = vector.load %arg5[%c0_34, %c0_35] : memref<1152x128xbf16, #tpu.memory_space<vmem>>, vector<1152x128xbf16>
    %cst_36 = arith.constant dense<0.000000e+00> : vector<256x128xf32>
    %47 = tpu.matmul %45, %46, %cst_36 {dimension_numbers = #tpu.dot_dimension_numbers<[1], [0], [0], [1], [0, 0, 1, 1], [], []>} : vector<256x1152xbf16>, vector<1152x128xbf16>, vector<256x128xf32> -> vector<256x128xf32>
    %c0_37 = arith.constant 0 : index
    %c0_38 = arith.constant 0 : index
    %48 = vector.load %arg6[%c0_37, %c0_38] : memref<1x128xf32, #tpu.memory_space<vmem>>, vector<1x128xf32>
    %49 = vector.broadcast %48 : vector<1x128xf32> to vector<256x128xf32>
    %50 = arith.mulf %47, %49 : vector<256x128xf32>
    %c0_39 = arith.constant 0 : index
    %c0_40 = arith.constant 0 : index
    %51 = vector.load %arg7[%c0_39, %c0_40] : memref<1x128xf32, #tpu.memory_space<vmem>>, vector<1x128xf32>
    %52 = vector.broadcast %51 : vector<1x128xf32> to vector<256x128xf32>
    %53 = arith.addf %50, %52 : vector<256x128xf32>
    %54 = vector.shape_cast %7 : vector<16x16x128xbf16> to vector<256x128xbf16>
    %55 = arith.extf %54 : vector<256x128xbf16> to vector<256x128xf32>
    %56 = arith.addf %53, %55 : vector<256x128xf32>
    %cst_41 = arith.constant 0.000000e+00 : f32
    %57 = vector.broadcast %cst_41 : f32 to vector<256x128xf32>
    %58 = arith.maximumf %56, %57 : vector<256x128xf32>
    %59 = vector.shape_cast %58 : vector<256x128xf32> to vector<16x16x128xf32>
    %c0_42 = arith.constant 0 : index
    %c0_43 = arith.constant 0 : index
    %c0_44 = arith.constant 0 : index
    %c0_45 = arith.constant 0 : index
    %60 = vector.load %arg8[%c0_42, %c0_43, %c0_44, %c0_45] : memref<1x16x16x128xf32, #tpu.memory_space<vmem>>, vector<1x16x16x128xf32>
    %61 = vector.shape_cast %60 : vector<1x16x16x128xf32> to vector<16x16x128xf32>
    %62 = vector.shape_cast %59 : vector<16x16x128xf32> to vector<1x16x16x128xf32>
    tpu.vector_store %arg8[%c0_42, %c0_43, %c0_44, %c0_45], %62 {strides = array<i32>} : memref<1x16x16x128xf32, #tpu.memory_space<vmem>>, vector<1x16x16x128xf32>,
    return
  }
  func.func @transform_0(%arg0: i32) -> (i32, i32, i32, i32) {
    %c0_i32 = arith.constant 0 : i32
    %c0_i32_0 = arith.constant 0 : i32
    %c0_i32_1 = arith.constant 0 : i32
    %c0_i32_2 = arith.constant 0 : i32
    return %arg0, %c0_i32, %c0_i32_0, %c0_i32_1 : i32, i32, i32, i32
  }
  func.func @transform_1(%arg0: i32) -> (i32, i32) {
    %c0_i32 = arith.constant 0 : i32
    %c0_i32_0 = arith.constant 0 : i32
    %c0_i32_1 = arith.constant 0 : i32
    return %c0_i32, %c0_i32_0 : i32, i32
  }
  func.func @transform_2(%arg0: i32) -> (i32, i32) {
    %c0_i32 = arith.constant 0 : i32
    %c0_i32_0 = arith.constant 0 : i32
    %c0_i32_1 = arith.constant 0 : i32
    return %c0_i32, %c0_i32_0 : i32, i32
  }
  func.func @transform_3(%arg0: i32) -> (i32, i32) {
    %c0_i32 = arith.constant 0 : i32
    %c0_i32_0 = arith.constant 0 : i32
    %c0_i32_1 = arith.constant 0 : i32
    return %c0_i32, %c0_i32_0 : i32, i32
  }
  func.func @transform_4(%arg0: i32) -> (i32, i32) {
    %c0_i32 = arith.constant 0 : i32
    %c0_i32_0 = arith.constant 0 : i32
    %c0_i32_1 = arith.constant 0 : i32
    return %c0_i32, %c0_i32_0 : i32, i32
  }
  func.func @transform_5(%arg0: i32) -> (i32, i32) {
    %c0_i32 = arith.constant 0 : i32
    %c0_i32_0 = arith.constant 0 : i32
    %c0_i32_1 = arith.constant 0 : i32
    return %c0_i32, %c0_i32_0 : i32, i32
  }
  func.func @transform_6(%arg0: i32) -> (i32, i32) {
    %c0_i32 = arith.constant 0 : i32
    %c0_i32_0 = arith.constant 0 : i32
    %c0_i32_1 = arith.constant 0 : i32
    return %c0_i32, %c0_i32_0 : i32, i32
  }
  func.func @transform_7(%arg0: i32) -> (i32, i32, i32, i32) {
    %c0_i32 = arith.constant 0 : i32
    %c0_i32_0 = arith.constant 0 : i32
    %c0_i32_1 = arith.constant 0 : i32
    %c0_i32_2 = arith.constant 0 : i32
    return %arg0, %c0_i32, %c0_i32_0, %c0_i32_1 : i32, i32, i32, i32
  }
}

</mosaic_0001>

<bundles_post_ra>
// kernel: tpu_custom_call.1
= control target key start
LH: loop header
LB: loop body
LE: loop exit
PB: predicated region body
PF: predicated region fallthrough
CT: control target
= control target key end

     0   :  { %12 = vsyncpa [#allocation4], 0  ;;  %s9559_s0 = inlined_call_operand.hbm [shape: bf16[2,16,16,128], index: 0, kind: input, shape index: {}]   ;;  %s9560_s1 = inlined_call_operand.hbm [shape: bf16[1152,128], index: 1, kind: input, shape index: {}]   ;;  %s9561_s2 = inlined_call_operand.vmem [shape: f32[1,128], index: 2, kind: input, shape index: {}]   ;;  %s9562_s3 = inlined_call_operand.vmem [shape: f32[1,128], index: 3, kind: input, shape index: {}]   ;;  %s9563_s4 = inlined_call_operand.hbm [shape: bf16[1152,128], index: 4, kind: input, shape index: {}]   ;;  %s9564_s5 = inlined_call_operand.vmem [shape: f32[1,128], index: 5, kind: input, shape index: {}]   ;;  %s9565_s6 = inlined_call_operand.vmem [shape: f32[1,128], index: 6, kind: input, shape index: {}]   ;;  %s9566_s7 = inlined_call_operand.hbm [shape: f32[2,16,16,128], index: 7, kind: output, shape index: {}]  }
   0x1   :  { %14 = vsyncpa [#allocation4 + $0x1], 0 }
   0x2   :  { %15 = vsyncpa [#allocation7], 0 }
   0x3   :  { %16 = vsyncpa [#allocation5], 0 }
   0x4   :  { %18 = vsyncpa [#allocation5 + $0x1], 0  ;;  %s7557_s24 = smov 0   ;;  %s7559_s25 = smov 0  }
   0x5   :  { %s7561_s26 = smov 0   ;;  %s7563_s27 = smov 0  }
   0x6 LB: > { %s7578_s28 = sadd.s32 4294967295, %s7506_s27   ;;  %s5674_s29 = sadd.s32 4294967294, %s7506_s27   ;;  %s7506_s27 = sphi %s7563_s27, %s9596_s27   ;;  %s7502_s26 = sphi %s7561_s26, %s9595_s26   ;;  %s7498_s25 = sphi %s7559_s25, %s9594_s25   ;;  %s7494_s24 = sphi %s7557_s24, %s9593_s24  }
   0x7   : > { %p44_p0 = scmp.ne.s32.totalorder %s7498_s25, %s7494_s24  ;;  %p9567_p1 = scmp.eq.s32.totalorder %s7578_s28, 0 }
   0x8   : > { %p200_p3 = scmp.eq.s32.totalorder %s5674_s29, 1  ;;  %p5675_p5 = scmp.ge.s32.totalorder %s7506_s27, 1 }
   0x9   : > { %p7587_p4 = por %p9567_p1, %p44_p0  ;;  %p207_p7 = scmp.lt.s32.totalorder %s7506_s27, 3 }
   0xa   : > { %p7592_p6 = por %p200_p3, %p44_p0  ;;  %s7508_s10 = smov [#allocation6]  }
   0xb   : > { %s9571_s30 = scalar_select %p7587_p4, 1, 0 }
   0xc   : > { %s9572_s8 = scalar_select %p7592_p6, 1, 0 }
   0xd   : > { %p7597_p8 = pnand %p5675_p5, %p207_p7  ;;  %s219_s11 = sshll.u32 %s7508_s10, 4  ;;  %s7601_s11 = int_to_ptr.vmem [resolvable:$true] %s219_s11 }
   0xe   : > { %s7509_s13 = smov [#allocation8]   ;;  %s7350_s17 = scalar_lea.hbm %s9560_s1, 9216 }
   0xf   : > { %p7030_p9 = pneg %p7597_p8  ;;  %s238_s14 = sshll.u32 %s7509_s13, 4  ;;  %s7612_s14 = int_to_ptr.vmem [resolvable:$true] %s238_s14 }
  0x10   : > { %p7351_p12 = scmp.ne.s32.totalorder %s9560_s1, %s7350_s17  ;;  %p7357_p5 = scmp.lt.u32.totalorder %s7350_s17, %s9560_s1 }
  0x11   : > { %p7608_p11 = pnand %p7030_p9, %p9567_p1 }
  0x13   : > { %p7352_p13 = pneg %p7608_p11 }
  0x15   : > { %p7353_p0 = pnand %p7352_p13, %p7351_p12 }
  0x17   : > { %p7354_p3 = pneg %p7353_p0 }
  0x19   : > { %p7359_p7 = pnand %p7357_p5, %p7354_p3 }
  0x1b   : > { %7362 = shalt.err (!%p7359_p7)
}
  0x1c   : > { %s7363_s22 = scalar_lea.vmem %s7601_s11, 9216  ;;  %p7371_p2 = scmp.lt.s32.totalorder %s7601_s11, %s7601_s11 }
  0x1d   : > { %p7364_p9 = scmp.ne.s32.totalorder %s7601_s11, %s7363_s22  ;;  %p7372_p12 = scmp.lt.s32.totalorder %s7363_s22, %s7363_s22 }
  0x1f   : > { %p7366_p10 = pnand %p7364_p9, %p7352_p13  ;;  %p7373_p0 = por %p7372_p12, %p7371_p2 }
  0x21   : > { %p7367_p1 = pneg %p7366_p10 }
  0x23   : > { %p7374_p6 = pnand %p7373_p0, %p7367_p1 }
  0x25   : > { %7377 = shalt.err (!%p7374_p6)
}
  0x26   : > { %s9568_s23 = smov 64   ;;  %s7511_s29 = smov 4  }
  0x27   : > { %7033 = dma.hbm_to_vmem [thread:$0]  (!%p7608_p11), %s9560_s1, 9216, %s7601_s11, [#allocation7], %s9568_s23, %s9568_s23, %s7511_s29  }
  0x28   : > { %s7378_s17 = scalar_lea.hbm %s9563_s4, 9216 }
  0x29   : > { %p7379_p1 = scmp.ne.s32.totalorder %s9563_s4, %s7378_s17  ;;  %p7385_p10 = scmp.lt.u32.totalorder %s7378_s17, %s9563_s4 }
  0x2b   : > { %p7381_p2 = pnand %p7379_p1, %p7352_p13 }
  0x2d   : > { %p7382_p6 = pneg %p7381_p2 }
  0x2f   : > { %p7387_p3 = pnand %p7385_p10, %p7382_p6 }
  0x31   : > { %7390 = shalt.err (!%p7387_p3)
}
  0x32   : > { %s7391_s11 = scalar_lea.vmem %s7612_s14, 9216  ;;  %p7399_p12 = scmp.lt.s32.totalorder %s7612_s14, %s7612_s14 }
  0x33   : > { %p7392_p5 = scmp.ne.s32.totalorder %s7612_s14, %s7391_s11  ;;  %p7400_p0 = scmp.lt.s32.totalorder %s7391_s11, %s7391_s11 }
  0x35   : > { %p7394_p7 = pnand %p7392_p5, %p7352_p13  ;;  %p7401_p1 = por %p7400_p0, %p7399_p12 }
  0x37   : > { %p7395_p9 = pneg %p7394_p7 }
  0x39   : > { %p7402_p2 = pnand %p7401_p1, %p7395_p9 }
  0x3b   : > { %7405 = shalt.err (!%p7402_p2)
}
  0x3c   : > { %7036 = dma.hbm_to_vmem [thread:$0]  (!%p7608_p11), %s9563_s4, 9216, %s7612_s14, [#allocation7], %s9568_s23, %s9568_s23, %s7511_s29  }
  0x3d   : > { %s7673_s12 = sadd.s32 1, %s7506_s27   ;;  %s31_s13 = sadd.s32 1, %s7502_s26 }
  0x3e   : > { %s28_s15 = ssub.s32 %s7506_s27, %s7673_s12  ;;  %p38_p13 = scmp.ne.s32.totalorder %s7502_s26, %s7498_s25 }
  0x3f   : > { %p29_p6 = scmp.eq.s32.totalorder %s28_s15, 0  ;;  %p39_p10 = scmp.eq.s32.totalorder %s7506_s27, 0 }
  0x40   : > { %p9575_p3 = scmp.eq.s32.totalorder %s7578_s28, 1  ;;  %p7047_p7 = scmp.lt.s32.totalorder %s7506_s27, 2 }
  0x41   : > { %s7689_s17 = scalar_select %p29_p6, %s7502_s26, %s31_s13  }
  0x42   : > { %p7683_p5 = por %p9575_p3, %p38_p13  ;;  %p40_p9 = por %p39_p10, %p38_p13 }
  0x43   : > { %s258_s18 = sand.u32 1, %s7502_s26   ;;  %s5944_s14 = sshll.u32 %s7506_s27, 11 }
  0x44   : > { %s9576_s16 = scalar_select %p7683_p5, 1, 0 }
  0x45   : > { %s5679_s19 = sshll.u32 %s258_s18, 7  ;;  %s7696_s11 = scalar_lea.hbm %s9559_s0, %s5944_s14 }
  0x46   : > { %s262_s22 = scalar_lea.vmem [#allocation3], %s5679_s19  ;;  %p7700_p11 = pnand %p7047_p7, %p40_p9 }
  0x47   : > { %s269_s10 = sshll.u32 %s262_s22, 4  ;;  %s7704_s15 = scalar_lea.sflag [#allocation4], %s258_s18  ;;  %s7698_s10 = int_to_ptr.vmem [resolvable:$true] %s269_s10 }
  0x48   : > { %s7406_s23 = scalar_lea.hbm %s7696_s11, 2048  ;;  %p7408_p0 = pneg %p7700_p11 }
  0x49   : > { %p7407_p12 = scmp.ne.s32.totalorder %s7696_s11, %s7406_s23  ;;  %s7411_s20 = scalar_lea.hbm %s9559_s0, 4096 }
  0x4a   : > { %p7412_p13 = scmp.lt.u32.totalorder %s7696_s11, %s9559_s0  ;;  %p7413_p6 = scmp.lt.u32.totalorder %s7411_s20, %s7406_s23 }
  0x4b   : > { %p7409_p1 = pnand %p7408_p0, %p7407_p12  ;;  %p7415_p3 = scmp.lt.u32.totalorder %s7406_s23, %s7696_s11 }
  0x4c   : > { %p7414_p10 = por %p7413_p6, %p7412_p13 }
  0x4d   : > { %p7410_p2 = pneg %p7409_p1 }
  0x4e   : > { %p7416_p7 = por %p7415_p3, %p7414_p10 }
  0x50   : > { %p7417_p9 = pnand %p7416_p7, %p7410_p2 }
  0x52   : > { %7420 = shalt.err (!%p7417_p9)
}
  0x53   : > { %s7421_s18 = scalar_lea.vmem %s7698_s10, 2048  ;;  %s7512_s19 = smov [#allocation3]  }
  0x54   : > { %p7422_p12 = scmp.ne.s32.totalorder %s7698_s10, %s7421_s18  ;;  %s7426_s14 = sshll.u32 %s7512_s19, 4  ;;  %s7427_s14 = int_to_ptr.vmem [resolvable:$false] %s7426_s14 }
  0x55   : > { %s7428_s21 = scalar_lea.vmem %s7427_s14, 4096  ;;  %p7429_p4 = scmp.lt.s32.totalorder %s7698_s10, %s7427_s14 }
  0x56   : > { %p7424_p1 = pnand %p7422_p12, %p7408_p0  ;;  %p7430_p13 = scmp.lt.s32.totalorder %s7428_s21, %s7421_s18 }
  0x58   : > { %p7425_p5 = pneg %p7424_p1  ;;  %p7431_p6 = por %p7430_p13, %p7429_p4 }
  0x5a   : > { %p7432_p10 = pnand %p7431_p6, %p7425_p5 }
  0x5c   : > { %7435 = shalt.err (!%p7432_p10)
}
  0x5d   : > { %s9578_s23 = smov 64   ;;  %281 = sbr.rel (%p7597_p8) target bundleno = 1229 (0x4cd), region = 48 }
  0x5e   : > { %7040 = dma.hbm_to_vmem [thread:$0]  (!%p7700_p11), %s7696_s11, 2048, %s7698_s10, %s7704_s15, %s9578_s23, %s9578_s23, %s7511_s29  }
  0x5f   : > { %s7738_s20 = sand.u32 (!%p7597_p8), 1, %s7498_s25   ;;  %p9579_p4 = scmp.ne.s32.totalorder (!%p7597_p8), %s9571_s30, 0 }
  0x60   : > { %s5683_s22 = sshll.u32 (!%p7597_p8), %s7738_s20, 7  ;;  %s284_s18 = scalar_lea.sflag (!%p7597_p8), [#allocation4], %s7738_s20 }
  0x61   : > { %s7742_s19 = scalar_lea.vmem (!%p7597_p8), [#allocation3], %s5683_s22 }
  0x64   : > { %7481 = dma.done.wait (%p9579_p4), %s284_s18, 2048  }
  0x65   : > { %7483 = vsyncadd (%p9579_p4), %s284_s18, 4294965248  ;;  %p9580_p5 = scmp.eq.s32.totalorder %s7578_s28, 0 }
  0x67   : > { %7485 = dma.done.wait (%p9580_p5), [#allocation7], 18432   ;;  %p9581_p8 = pmov %p9580_p5 }
  0x68   : > { %v7513_v0 = vmov 0   ;;  %v7090_v1 = vld [vmem:[#allocation6 + $0x40] sm:$0xff]   ;;  %v7094_v5 = vld [vmem:[#allocation6 + $0x48] sm:$0xff]   ;;  %v7098_v9 = vld [vmem:[#allocation6 + $0x50] sm:$0xff]   ;;  %vm391_vm0 = vsmask.f32 7938 }
  0x69   : > { %7487 = vsyncadd (%p9581_p8), [#allocation7], 4294948864  ;;  %327 = vst [vmem:[#allocation2] sm:$0xf] %v7513_v0  ;;  %v7091_v2 = vld [vmem:[#allocation6 + $0xc0] sm:$0xff]   ;;  %5978 = vmatprep.subr.bf16.mxu0 %v7090_v1  ;;  %v7095_v6 = vld [vmem:[#allocation6 + $0xc8] sm:$0xff]  }
  0x6a   : > { %328 = vst [vmem:[#allocation2 + $0x4] sm:$0xf] %v7513_v0  ;;  %329 = vst [vmem:[#allocation2 + $0x8] sm:$0x1] %v7513_v0  ;;  %v7092_v3 = vld [vmem:[#allocation6] sm:$0xff]   ;;  %6090 = vmatprep.subr.bf16.mxu1 %v7091_v2  ;;  %v7096_v7 = vld [vmem:[#allocation6 + $0x8] sm:$0xff]  }
  0x6b   : > { %331 = vst [vmem:[#allocation2 + $0xcc] sm:$0xf] %v7513_v0  ;;  %332 = vst [vmem:[#allocation2 + $0xd0] sm:$0xf] %v7513_v0  ;;  %v7093_v4 = vld [vmem:[#allocation6 + $0x80] sm:$0xff]   ;;  %5979 = vmatpush3.bf16.msra.mxu0 %v7092_v3  ;;  %v7097_v8 = vld [vmem:[#allocation6 + $0x88] sm:$0xff]  }
  0x6c   : > { %333 = vst [vmem:[#allocation2 + $0xd4] sm:$0x1] %v7513_v0  ;;  %6091 = vmatpush3.bf16.msra.mxu1 %v7093_v4  ;;  %5980 = vmatprep.subr.bf16.mxu0 %v7094_v5  ;;  %v7099_v10 = vld [vmem:[#allocation6 + $0xd0] sm:$0xff]   ;;  %v7102_v13 = vld [vmem:[#allocation6 + $0x58] sm:$0xff]   ;;  %vm335_vm1 = vsmask.f32 256 }
  0x6d   : > { %6092 = vmatprep.subr.bf16.mxu1 %v7095_v6  ;;  %v7100_v11 = vld [vmem:[#allocation6 + $0x10] sm:$0xff]   ;;  %v7103_v14 = vld [vmem:[#allocation6 + $0xd8] sm:$0xff]   ;;  %v7106_v17 = vld [vmem:[#allocation6 + $0x60] sm:$0xff]   ;;  %vm334_vm2 = vcmask 1040384   ;;  %vm479_vm5 = vsmask.f32 4368 }
  0x6e   : > { %v7101_v12 = vld [vmem:[#allocation6 + $0x90] sm:$0xff]   ;;  %v7104_v15 = vld [vmem:[#allocation6 + $0x18] sm:$0xff]   ;;  %v7107_v18 = vld [vmem:[#allocation6 + $0xe0] sm:$0xff]   ;;  %vm802_vm6 = vcmask 1043456   ;;  %vm1114_vm8 = vsmask.f32 7424 }
  0x6f   : > { %5981 = vmatpush3.bf16.msra.mxu0 %v7096_v7  ;;  %v7105_v16 = vld [vmem:[#allocation6 + $0x98] sm:$0xff]   ;;  %v7108_v19 = vld [vmem:[#allocation6 + $0x20] sm:$0xff]   ;;  %v7110_v21 = vld [vmem:[#allocation6 + $0x68] sm:$0xff]   ;;  %vm1323_vm10 = vcmask 1046528   ;;  %s5686_s30 = sshll.u32 %s7738_s20, 8  ;;  %s5977_s29 = sshll.u32 %s7578_s28, 12 }
  0x70   : > { %6093 = vmatpush3.bf16.msra.mxu1 %v7097_v8  ;;  %5982 = vmatprep.subr.bf16.mxu0 %v7098_v9  ;;  %v7109_v20 = vld [vmem:[#allocation6 + $0xa0] sm:$0xff]   ;;  %v7111_v22 = vld [vmem:[#allocation6 + $0xe8] sm:$0xff]   ;;  %vm7753_vm3 = vmand %vm334_vm2, %vm391_vm0  ;;  %s9364_s9 = scalar_lea.vmem [#allocation9], %s5686_s30  ;;  %s9510_s13 = scalar_lea.hbm %s9566_s7, %s5977_s29 }
  0x71   : > { %6094 = vmatprep.subr.bf16.mxu1 %v7099_v10  ;;  %v7112_v23 = vld [vmem:[#allocation6 + $0x28] sm:$0xff]   ;;  %vm7758_vm4 = vmand %vm334_vm2, %vm335_vm1  ;;  %v7114_v27 = vld [vmem:[#allocation6 + $0x70] sm:$0xff]   ;;  %s5582_s11 = sshll.u32 %s9364_s9, 4  ;;  %s5569_s28 = scalar_lea.sflag [#allocation5], %s7738_s20  ;;  %s9512_s11 = int_to_ptr.vmem [resolvable:$true] %s5582_s11 }
  0x72   : > { %v7113_v25 = vld [vmem:[#allocation6 + $0xa8] sm:$0xff]   ;;  %v7115_v28 = vld [vmem:[#allocation6 + $0xf0] sm:$0xff]   ;;  %v7118_v31 = vld [vmem:[#allocation6 + $0x78] sm:$0xff]   ;;  %s7436_s15 = scalar_lea.vmem %s9512_s11, 4096  ;;  %p9590_p0 = scmp.ne.s32.totalorder %s9576_s16, 0 }
  0x73   : > { %5983 = vmatpush3.bf16.msra.mxu0 %v7100_v11  ;;  %v7116_v29 = vld [vmem:[#allocation6 + $0x30] sm:$0xff]   ;;  %v7119_v32 = vld [vmem:[#allocation6 + $0xf8] sm:$0xff]   ;;  %v337_v35 = vld [vmem:[#allocation2] sm:$0x1]  ;;  %p7437_p11 = scmp.ne.s32.totalorder %s9512_s11, %s7436_s15  ;;  %s7514_s14 = smov [#allocation9]  }
  0x74   : > { %6095 = vmatpush3.bf16.msra.mxu1 %v7101_v12  ;;  %5984 = vmatprep.subr.bf16.mxu0 %v7102_v13  ;;  %v7117_v30 = vld [vmem:[#allocation6 + $0xb0] sm:$0xff]   ;;  %v7120_v33 = vld [vmem:[#allocation6 + $0x38] sm:$0xff]   ;;  %v338_v37 = vsel %vm7758_vm4, 0, %v337_v35  ;;  %v447_v40 = vld [vmem:[%s7742_s19] sm:$0xf]  ;;  %s7440_s21 = sshll.u32 %s7514_s14, 4  ;;  %s7441_s21 = int_to_ptr.vmem [resolvable:$false] %s7440_s21 }
  0x75   : > { %6096 = vmatprep.subr.bf16.mxu1 %v7103_v14  ;;  %v7121_v34 = vld [vmem:[#allocation6 + $0xb8] sm:$0xff]   ;;  %v393_v36 = vld [vmem:[#allocation2 + $0x8] sm:$0x1]  ;;  %v340_v39 = vld [vmem:[#allocation2 + $0xc] sm:$0x1]  ;;  %v482_v43 = vshrl.u32 %v447_v40, 16  ;;  %p7438_p2 = pnand %p7437_p11, %p9590_p0  ;;  %p7443_p7 = scmp.lt.s32.totalorder %s9512_s11, %s7441_s21 }
  0x76   : > { %v394_v38 = vsel %vm7753_vm3, 0, %v393_v36  ;;  %339 = vst [vmem:[#allocation2] sm:$0x1] %v338_v37  ;;  %v341_v41 = vsel %vm7758_vm4, 0, %v340_v39  ;;  %v448_v42 = vld [vmem:[%s7742_s19 + $0x4] sm:$0xf]  ;;  %vm7772_vm7 = vmor %vm335_vm1, %vm479_vm5 }
  0x77   : > { %5985 = vmatpush3.bf16.msra.mxu0 %v7104_v15  ;;  %395 = vst [vmem:[#allocation2 + $0x8] sm:$0x1] %v394_v38  ;;  %v485_v44 = vshll.u32 %v447_v40, 16  ;;  %v7125_v45 = vld [vmem:[#allocation6 + $0x140] sm:$0xff]   ;;  %342 = vst [vmem:[#allocation2 + $0xc] sm:$0x1] %v341_v41  ;;  %p7439_p3 = pneg %p7438_p2 }
  0x78   : > { %6097 = vmatpush3.bf16.msra.mxu1 %v7105_v16  ;;  %5986 = vmatprep.subr.bf16.mxu0 %v7106_v17  ;;  %v490_v46 = vshrl.u32 %v448_v42, 16  ;;  %v493_v47 = vshll.u32 %v448_v42, 16  ;;  %v484_v48 = vrot.slane %v482_v43, 7  ;;  %v396_v50 = vld [vmem:[#allocation2 + $0x14] sm:$0x1]  ;;  %vm7784_vm9 = vmand %vm802_vm6, %vm391_vm0  ;;  %v7131_v40 = vld [vmem:[#allocation6 + $0x148] sm:$0xff]  }
  0x79   : > { %6098 = vmatprep.subr.bf16.mxu1 %v7107_v18  ;;  %v343_v51 = vld [vmem:[#allocation2 + $0x18] sm:$0x1]  ;;  %v397_v54 = vsel %vm7753_vm3, 0, %v396_v50  ;;  %v449_v56 = vld [vmem:[%s7742_s19 + $0x8] sm:$0xf]  ;;  %s7442_s23 = scalar_lea.vmem %s7441_s21, 8192 }
  0x7a   : > { %v492_v49 = vrot.slane %v490_v46, 7  ;;  %v488_v53 = vrot.slane %v484_v48, 4  ;;  %v344_v55 = vsel %vm7758_vm4, 0, %v343_v51  ;;  %v487_v57 = vor.u32 %v485_v44, %v484_v48  ;;  %398 = vst [vmem:[#allocation2 + $0x14] sm:$0x1] %v397_v54  ;;  %p7444_p9 = scmp.lt.s32.totalorder %s7442_s23, %s7436_s15 }
  0x7b   : > { %5987 = vmatpush3.bf16.msra.mxu0 %v7108_v19  ;;  %345 = vst [vmem:[#allocation2 + $0x18] sm:$0x1] %v344_v55  ;;  %v450_v59 = vld [vmem:[%s7742_s19 + $0xc] sm:$0xf]  ;;  %v499_v60 = vshrl.u32 %v449_v56, 16  ;;  %v502_v63 = vshll.u32 %v449_v56, 16 }
  0x7c   : > { %6099 = vmatpush3.bf16.msra.mxu1 %v7109_v20  ;;  %5988 = vmatprep.subr.bf16.mxu0 %v7110_v21  ;;  %v495_v58 = vor.u32 %v493_v47, %v492_v49  ;;  %v497_v62 = vrot.slane %v492_v49, 4  ;;  %v507_v0 = vshrl.u32 %v450_v59, 16  ;;  %v510_v1 = vshll.u32 %v450_v59, 16  ;;  %v399_v2 = vld [vmem:[#allocation2 + $0x20] sm:$0x1]  ;;  %p7445_p12 = por %p7444_p9, %p7443_p7 }
  0x7d   : > { %6100 = vmatprep.subr.bf16.mxu1 %v7111_v22  ;;  %v7122_v3 = vld [vmem:[#allocation2] sm:$0xff]   ;;  %v501_v5 = vrot.slane %v499_v60, 7  ;;  %v451_v18 = vld [vmem:[%s7742_s19 + $0x10] sm:$0xf]  ;;  %v400_v21 = vsel %vm7753_vm3, 0, %v399_v2 }
  0x7e   : > { %v496_v4 = vsel %vm7772_vm7, %v488_v53, %v495_v58  ;;  %v7123_v6 = vld [vmem:[#allocation2 + $0x8] ss:$0 sps:$4 sm:$0x11]   ;;  %v804_v7 = vld [vmem:[#allocation2 + $0xc] sm:$0xf]  ;;  %v7790_v8 = vrot.slane %v507_v0, 7  ;;  %p7446_p1 = pnand %p7445_p12, %p7439_p3 }
  0x7f   : > { %5989 = vmatpush3.bf16.msra.mxu0 %v7112_v23  ;;  %807 = vst [vmem:[#allocation2 + $0x10] sm:$0xf] %v496_v4  ;;  %v1116_v9 = vshrl.u32 %v7122_v3, 16  ;;  %v1118_v10 = vshll.u32 %v7122_v3, 16  ;;  %v805_v11 = vsel %vm7784_vm9, %v487_v57, %v804_v7  ;;  %v1324_v12 = vrot.slane %v7122_v3, 1  ;;  %v7132_v56 = vld [vmem:[#allocation6 + $0x108] sm:$0xff]  }
  0x80   : > { %6101 = vmatpush3.bf16.msra.mxu1 %v7113_v25  ;;  %5990 = vmatprep.subr.bf16.mxu0 %v7114_v27  ;;  %v346_v13 = vld [vmem:[#allocation2 + $0x24] sm:$0x1]  ;;  %v1123_v14 = vshll.u32 %v7123_v6, 16  ;;  %806 = vst [vmem:[#allocation2 + $0xc] sm:$0xf] %v805_v11  ;;  %v1325_v15 = vrot.slane %v7123_v6, 1  ;;  %v504_v16 = vor.u32 %v502_v63, %v501_v5  ;;  %v512_v20 = vor.u32 %v510_v1, %v7790_v8 }
  0x81   : > { %6102 = vmatprep.subr.bf16.mxu1 %v7115_v28  ;;  %v505_v17 = vrot.slane %v501_v5, 4  ;;  %v1120_v19 = vrot.slane %v1118_v10, 1  ;;  %v452_v22 = vld [vmem:[%s7742_s19 + $0x14] sm:$0xf]  ;;  %v7126_v25 = vld [vmem:[#allocation6 + $0x100] sm:$0xff]   ;;  %v519_v35 = vshll.u32 %v451_v18, 16 }
  0x82   : > { %v1125_v23 = vrot.slane %v1123_v14, 1  ;;  %v808_v27 = vld [vmem:[#allocation2 + $0x14] sm:$0x1]  ;;  %v811_v28 = vld [vmem:[#allocation2 + $0x18] sm:$0xf]  ;;  %v524_v36 = vshrl.u32 %v452_v22, 16  ;;  %v1326_v49 = vsel %vm1323_vm10, %v1324_v12, %v1325_v15 }
  0x83   : > { %5991 = vmatpush3.bf16.msra.mxu0 %v7116_v29  ;;  %401 = vst [vmem:[#allocation2 + $0x20] sm:$0x1] %v400_v21  ;;  %v347_v29 = vsel %vm7758_vm4, 0, %v346_v13  ;;  %v527_v37 = vshll.u32 %v452_v22, 16  ;;  %v402_v38 = vld [vmem:[#allocation2 + $0x2c] sm:$0x1] }
  0x84   : > { %6103 = vmatpush3.bf16.msra.mxu1 %v7117_v30  ;;  %5992 = vmatprep.subr.bf16.mxu0 %v7118_v31  ;;  %v1121_v30 = vor.u32 %v1120_v19, %v1116_v9  ;;  %v809_v31 = vsel %vm7758_vm4, %v497_v62, %v808_v27  ;;  %348 = vst [vmem:[#allocation2 + $0x24] sm:$0x1] %v347_v29  ;;  %v403_v41 = vsel %vm7753_vm3, 0, %v402_v38  ;;  %v349_v42 = vld [vmem:[#allocation2 + $0x30] sm:$0x1]  ;;  %v514_v43 = vrot.slane %v7790_v8, 4 }
  0x85   : > { %6104 = vmatprep.subr.bf16.mxu1 %v7119_v32  ;;  %v513_v32 = vsel %vm7772_vm7, %v505_v17, %v512_v20  ;;  %810 = vst [vmem:[#allocation2 + $0x14] sm:$0x1] %v809_v31  ;;  %404 = vst [vmem:[#allocation2 + $0x2c] sm:$0x1] %v403_v41  ;;  %v350_v46 = vsel %vm7758_vm4, 0, %v349_v42  ;;  %v7137_v58 = vld [vmem:[#allocation6 + $0x150] sm:$0xff]  }
  0x86   : > { %814 = vst [vmem:[#allocation2 + $0x1c] sm:$0xf] %v513_v32  ;;  %v1126_v39 = vsel %vm1114_vm8, %v1121_v30, %v1125_v23  ;;  %v453_v47 = vld [vmem:[%s7742_s19 + $0x18] sm:$0xf]  ;;  %351 = vst [vmem:[#allocation2 + $0x30] sm:$0x1] %v350_v46 }
  0x87   : > { %5993 = vmatpush3.bf16.msra.mxu0 %v7120_v33  ;;  %v812_v33 = vsel %vm7784_vm9, %v504_v16, %v811_v28  ;;  %2048 = vmatprep.mubr.bf16.mxu0 %v1126_v39  ;;  %v7814_v48 = vld [vmem:[#allocation2 + $0xc] sm:$0xff]   ;;  %v7818_v50 = vld [vmem:[%s7742_s19 + $0x1c] sm:$0xf]  ;;  %v533_v51 = vshrl.u32 %v453_v47, 16  ;;  %v536_v4 = vshll.u32 %v453_v47, 16  ;;  %v7150_v46 = vld [vmem:[#allocation6 + $0x120] sm:$0xff]  }
  0x88   : > { %6105 = vmatpush3.bf16.msra.mxu1 %v7121_v34  ;;  %6202 = vmatprep.subr.bf16.mxu0 %v7125_v45  ;;  %813 = vst [vmem:[#allocation2 + $0x18] sm:$0xf] %v812_v33  ;;  %v516_v34 = vshrl.u32 %v451_v18, 16  ;;  %v526_v45 = vrot.slane %v524_v36, 7  ;;  %v1128_v59 = vshrl.u32 %v7814_v48, 16  ;;  %v1130_v60 = vshll.u32 %v7814_v48, 16 }
  0x89   : > { %2209 = vmatprep.mubr.bf16.mxu1 %v7814_v48  ;;  %v1327_v62 = vrot.slane %v7814_v48, 1  ;;  %v7824_v0 = vrot.slane %v533_v51, 7  ;;  %v541_v5 = vshrl.u32 %v7818_v50, 16  ;;  %v7138_v6 = vld [vmem:[#allocation6 + $0x110] sm:$0xff]   ;;  %v405_v10 = vld [vmem:[#allocation2 + $0x38] sm:$0x1] }
  0x8a   : > { %v518_v44 = vrot.slane %v516_v34, 7  ;;  %2049 = vmatmul.mubr.bf16.vlgmr.msra.gmra.mrb[0].mxu0 %v7122_v3  ;;  %v529_v55 = vor.u32 %v527_v37, %v526_v45  ;;  %v531_v57 = vrot.slane %v526_v45, 4  ;;  %v815_v63 = vld [vmem:[#allocation2 + $0x20] sm:$0x1]  ;;  %v1132_v8 = vrot.slane %v1130_v60, 1  ;;  %v7143_v21 = vld [vmem:[#allocation6 + $0x158] sm:$0xff]  }
  0x8b   : > { %6203 = vmatpush3.bf16.msra.mxu0 %v7126_v25  ;;  %2210 = vmatmul.mubr.bf16.vlgmr.msra.gmra.mrb[0].mxu1 %v1326_v49  ;;  %v816_v1 = vsel %vm7758_vm4, %v514_v43, %v815_v63  ;;  %v818_v3 = vld [vmem:[#allocation2 + $0x24] sm:$0xf]  ;;  %v352_v11 = vld [vmem:[#allocation2 + $0x3c] sm:$0x1]  ;;  %v538_v13 = vor.u32 %v536_v4, %v7824_v0  ;;  %v539_v14 = vrot.slane %v7824_v0, 4  ;;  %v7838_v20 = vrot.slane %v541_v5, 7 }
  0x8c   : > { %v521_v53 = vor.u32 %v519_v35, %v518_v44  ;;  %v522_v54 = vrot.slane %v518_v44, 4  ;;  %6204 = vmatprep.subr.bf16.mxu0 %v7131_v40  ;;  %v7127_v7 = vld [vmem:[#allocation2 + $0x14] ss:$0 sps:$4 sm:$0x11]   ;;  %817 = vst [vmem:[#allocation2 + $0x20] sm:$0x1] %v816_v1  ;;  %v1133_v16 = vor.u32 %v1132_v8, %v1128_v59 }
  0x8d   : > { %v455_v15 = vld [vmem:[%s7742_s19 + $0x20] sm:$0xf]  ;;  %v1135_v17 = vshll.u32 %v7127_v7, 16  ;;  %v1328_v18 = vrot.slane %v7127_v7, 1  ;;  %v822_v19 = vld [vmem:[#allocation2 + $0x2c] sm:$0x1] }
  0x8e   : > { %v530_v2 = vsel %vm7772_vm7, %v522_v54, %v529_v55  ;;  %v819_v9 = vsel %vm7784_vm9, %v521_v53, %v818_v3  ;;  %v823_v27 = vsel %vm7758_vm4, %v531_v57, %v822_v19  ;;  %v825_v28 = vld [vmem:[#allocation2 + $0x30] sm:$0xf]  ;;  %v544_v32 = vshll.u32 %v7818_v50, 16  ;;  %v456_v34 = vld [vmem:[%s7742_s19 + $0x24] sm:$0xf]  ;;  %v7155_v63 = vld [vmem:[#allocation6 + $0x168] sm:$0xff]  }
  0x8f   : > { %821 = vst [vmem:[#allocation2 + $0x28] sm:$0xf] %v530_v2  ;;  %v7833_v12 = vld [vmem:[#allocation2 + $0x18] sm:$0xff]   ;;  %820 = vst [vmem:[#allocation2 + $0x24] sm:$0xf] %v819_v9  ;;  %6205 = vmatpush3.bf16.msra.mxu0 %v7132_v56  ;;  %v7144_v29 = vld [vmem:[#allocation6 + $0x118] sm:$0xff]   ;;  %v7847_v31 = vsel %vm1323_vm10, %v1327_v62, %v1328_v18  ;;  %v826_v33 = vsel %vm7784_vm9, %v538_v13, %v825_v28 }
  0x90   : > { %6206 = vmatprep.subr.bf16.mxu0 %v7137_v58  ;;  %2217 = vmatprep.mubr.bf16.mxu1 %v7833_v12  ;;  %v1140_v22 = vshrl.u32 %v7833_v12, 16  ;;  %v1142_v23 = vshll.u32 %v7833_v12, 16  ;;  %v1330_v25 = vrot.slane %v7833_v12, 1  ;;  %v1137_v30 = vrot.slane %v1135_v17, 1  ;;  %824 = vst [vmem:[#allocation2 + $0x2c] sm:$0x1] %v823_v27 }
  0x91   : > { %v7149_v35 = vld [vmem:[#allocation6 + $0x160] sm:$0xff]   ;;  %827 = vst [vmem:[#allocation2 + $0x30] sm:$0xf] %v826_v33  ;;  %v406_v37 = vsel %vm7753_vm3, 0, %v405_v10  ;;  %v548_v38 = vrot.slane %v7838_v20, 4  ;;  %v353_v39 = vsel %vm7758_vm4, 0, %v352_v11  ;;  %v546_v41 = vor.u32 %v544_v32, %v7838_v20 }
  0x92   : > { %v1144_v36 = vrot.slane %v1142_v23, 1  ;;  %v7859_v40 = vsel %vm1114_vm8, %v1133_v16, %v1137_v30  ;;  %407 = vst [vmem:[#allocation2 + $0x38] sm:$0x1] %v406_v37  ;;  %354 = vst [vmem:[#allocation2 + $0x3c] sm:$0x1] %v353_v39  ;;  %v550_v42 = vshrl.u32 %v455_v15, 16 }
  0x93   : > { %6207 = vmatpush3.bf16.msra.mxu0 %v7138_v6  ;;  %v553_v43 = vshll.u32 %v455_v15, 16  ;;  %2056 = vmatprep.mubr.bf16.mxu0 %v7859_v40  ;;  %v7129_v44 = vld [vmem:[#allocation2 + $0x20] ss:$0 sps:$4 sm:$0x11]   ;;  %v558_v45 = vshrl.u32 %v456_v34, 16  ;;  %v547_v50 = vsel %vm7772_vm7, %v539_v14, %v546_v41  ;;  %v561_v56 = vshll.u32 %v456_v34, 16 }
  0x94   : > { %6208 = vmatprep.subr.bf16.mxu0 %v7143_v21  ;;  %2218 = vmatmul.mubr.bf16.gmra.mrb[4].mxu1 %v7847_v31  ;;  %v1145_v47 = vor.u32 %v1144_v36, %v1140_v22  ;;  %v552_v51 = vrot.slane %v550_v42, 7  ;;  %v1147_v53 = vshll.u32 %v7129_v44, 16  ;;  %v1331_v54 = vrot.slane %v7129_v44, 1  ;;  %828 = vst [vmem:[#allocation2 + $0x34] sm:$0xf] %v547_v50  ;;  %v7156_v4 = vld [vmem:[#allocation6 + $0x128] sm:$0xff]  }
  0x95   : > { %2057 = vmatmul.mubr.bf16.gmra.mrb[4].mxu0 %v7814_v48  ;;  %v7869_v55 = vrot.slane %v558_v45, 7  ;;  %v408_v57 = vld [vmem:[#allocation2 + $0x44] sm:$0x1]  ;;  %v355_v62 = vld [vmem:[#allocation2 + $0x48] sm:$0x1] }
  0x96   : > { %v7865_v49 = vld [vmem:[#allocation2 + $0x24] sm:$0xff]   ;;  %v555_v60 = vor.u32 %v553_v43, %v552_v51  ;;  %v1149_v0 = vrot.slane %v1147_v53, 1  ;;  %v7876_v1 = vsel %vm1323_vm10, %v1330_v25, %v1331_v54  ;;  %v556_v6 = vrot.slane %v552_v51, 4  ;;  %v457_v20 = vld [vmem:[%s7742_s19 + $0x28] sm:$0xf]  ;;  %v7164_v53 = vld [vmem:[#allocation6 + $0x180] sm:$0xff]  }
  0x97   : > { %6209 = vmatpush3.bf16.msra.mxu0 %v7144_v29  ;;  %2225 = vmatprep.mubr.bf16.mxu1 %v7865_v49  ;;  %v1152_v58 = vshrl.u32 %v7865_v49, 16  ;;  %v1154_v48 = vshll.u32 %v7865_v49, 16  ;;  %v1333_v59 = vrot.slane %v7865_v49, 1  ;;  %v7133_v2 = vld [vmem:[#allocation2 + $0x2c] ss:$0 sps:$4 sm:$0x11]   ;;  %v563_v3 = vor.u32 %v561_v56, %v7869_v55 }
  0x98   : > { %6210 = vmatprep.subr.bf16.mxu0 %v7149_v35  ;;  %v409_v7 = vsel %vm7753_vm3, 0, %v408_v57  ;;  %v565_v8 = vrot.slane %v7869_v55, 4  ;;  %v7883_v9 = vsel %vm1114_vm8, %v1145_v47, %v1149_v0  ;;  %v1159_v10 = vshll.u32 %v7133_v2, 16  ;;  %v7161_v15 = vld [vmem:[#allocation6 + $0x170] sm:$0xff]   ;;  %v458_v21 = vld [vmem:[%s7742_s19 + $0x2c] sm:$0xf] }
  0x99   : > { %v1156_v5 = vrot.slane %v1154_v48, 1  ;;  %v1334_v11 = vrot.slane %v7133_v2, 1  ;;  %v829_v13 = vld [vmem:[#allocation2 + $0x38] sm:$0x1]  ;;  %v832_v14 = vld [vmem:[#allocation2 + $0x3c] sm:$0xf]  ;;  %2064 = vmatprep.mubr.bf16.mxu0 %v7883_v9  ;;  %v564_v18 = vsel %vm7772_vm7, %v556_v6, %v563_v3 }
  0x9a   : > { %410 = vst [vmem:[#allocation2 + $0x44] sm:$0x1] %v409_v7  ;;  %v830_v17 = vsel %vm7758_vm4, %v548_v38, %v829_v13  ;;  %v833_v19 = vsel %vm7784_vm9, %v555_v60, %v832_v14  ;;  %v411_v22 = vld [vmem:[#allocation2 + $0x50] sm:$0x1]  ;;  %v1161_v23 = vrot.slane %v1159_v10, 1  ;;  %v356_v25 = vsel %vm7758_vm4, 0, %v355_v62 }
  0x9b   : > { %6211 = vmatpush3.bf16.msra.mxu0 %v7150_v46  ;;  %v1157_v16 = vor.u32 %v1156_v5, %v1152_v58  ;;  %831 = vst [vmem:[#allocation2 + $0x38] sm:$0x1] %v830_v17  ;;  %834 = vst [vmem:[#allocation2 + $0x3c] sm:$0xf] %v833_v19  ;;  %v567_v27 = vshrl.u32 %v457_v20, 16  ;;  %v7162_v29 = vld [vmem:[#allocation6 + $0x130] sm:$0xff]   ;;  %v7917_v46 = vsel %vm1323_vm10, %v1333_v59, %v1334_v11 }
  0x9c   : > { %2226 = vmatmul.mubr.bf16.gmra.mrb[8].mxu1 %v7876_v1  ;;  %835 = vst [vmem:[#allocation2 + $0x40] sm:$0xf] %v564_v18  ;;  %v358_v28 = vld [vmem:[#allocation2 + $0x54] sm:$0x1]  ;;  %6212 = vmatprep.subr.bf16.mxu0 %v7155_v63  ;;  %357 = vst [vmem:[#allocation2 + $0x48] sm:$0x1] %v356_v25 }
  0x9d   : > { %2065 = vmatmul.mubr.bf16.gmra.mrb[8].mxu0 %v7833_v12  ;;  %v7898_v30 = vld [vmem:[#allocation2 + $0x30] sm:$0xff]   ;;  %v570_v32 = vshll.u32 %v457_v20, 16  ;;  %v575_v33 = vshrl.u32 %v458_v21, 16  ;;  %v578_v34 = vshll.u32 %v458_v21, 16  ;;  %v7901_v35 = vsel %vm1114_vm8, %v1157_v16, %v1161_v23  ;;  %v459_v39 = vld [vmem:[%s7742_s19 + $0x30] sm:$0xf] }
  0x9e   : > { %v569_v36 = vrot.slane %v567_v27, 7  ;;  %v412_v37 = vsel %vm7753_vm3, 0, %v411_v22  ;;  %v359_v38 = vsel %vm7758_vm4, 0, %v358_v28  ;;  %v7163_v12 = vld [vmem:[#allocation6 + $0x1c0] sm:$0xff]   ;;  %2072 = vmatprep.mubr.bf16.mxu0 %v7901_v35  ;;  %2233 = vmatprep.mubr.bf16.mxu1 %v7898_v30  ;;  %v1164_v41 = vshrl.u32 %v7898_v30, 16  ;;  %v7165_v60 = vld [vmem:[#allocation6 + $0x1c8] sm:$0xff]  }
  0x9f   : > { %6213 = vmatpush3.bf16.msra.mxu0 %v7156_v4  ;;  %v1166_v42 = vshll.u32 %v7898_v30, 16  ;;  %v1336_v43 = vrot.slane %v7898_v30, 1  ;;  %v577_v44 = vrot.slane %v575_v33, 7  ;;  %413 = vst [vmem:[#allocation2 + $0x50] sm:$0x1] %v412_v37  ;;  %v584_v50 = vshrl.u32 %v459_v39, 16  ;;  %6314 = vmatprep.subr.bf16.mxu1 %v7163_v12 }
  0xa0   : > { %360 = vst [vmem:[#allocation2 + $0x54] sm:$0x1] %v359_v38  ;;  %v460_v45 = vld [vmem:[%s7742_s19 + $0x34] sm:$0xf]  ;;  %v573_v47 = vrot.slane %v569_v36, 4  ;;  %v587_v51 = vshll.u32 %v459_v39, 16  ;;  %6214 = vmatprep.subr.bf16.mxu0 %v7161_v15  ;;  %v572_v63 = vor.u32 %v570_v32, %v569_v36  ;;  %6315 = vmatpush3.bf16.msra.mxu1 %v7164_v53 }
  0xa1   : > { %v1168_v54 = vrot.slane %v1166_v42, 1  ;;  %v836_v56 = vld [vmem:[#allocation2 + $0x44] sm:$0x1]  ;;  %v580_v57 = vor.u32 %v578_v34, %v577_v44  ;;  %v582_v58 = vrot.slane %v577_v44, 4  ;;  %v592_v48 = vshrl.u32 %v460_v45, 16  ;;  %6316 = vmatprep.subr.bf16.mxu1 %v7165_v60  ;;  %v7169_v60 = vld [vmem:[#allocation6 + $0x1d0] sm:$0xff]  }
  0xa2   : > { %v837_v62 = vsel %vm7758_vm4, %v565_v8, %v836_v56  ;;  %v586_v59 = vrot.slane %v584_v50, 7  ;;  %v595_v0 = vshll.u32 %v460_v45, 16  ;;  %v7135_v2 = vld [vmem:[#allocation2 + $0x38] ss:$0 sps:$4 sm:$0x11]   ;;  %v7168_v17 = vld [vmem:[#allocation6 + $0x188] sm:$0xff]  }
  0xa3   : > { %6215 = vmatpush3.bf16.msra.mxu0 %v7162_v29  ;;  %v7923_v3 = vld [vmem:[#allocation2 + $0x3c] sm:$0xff]   ;;  %838 = vst [vmem:[#allocation2 + $0x44] sm:$0x1] %v837_v62  ;;  %v581_v4 = vsel %vm7772_vm7, %v573_v47, %v580_v57  ;;  %v839_v5 = vld [vmem:[#allocation2 + $0x48] sm:$0xf]  ;;  %v1169_v6 = vor.u32 %v1168_v54, %v1164_v41  ;;  %v1171_v7 = vshll.u32 %v7135_v2, 16 }
  0xa4   : > { %2234 = vmatmul.mubr.bf16.gmra.mrb[12].mxu1 %v7917_v46  ;;  %842 = vst [vmem:[#allocation2 + $0x4c] sm:$0xf] %v581_v4  ;;  %v589_v55 = vor.u32 %v587_v51, %v586_v59  ;;  %v1337_v8 = vrot.slane %v7135_v2, 1  ;;  %v1178_v10 = vshll.u32 %v7923_v3, 16  ;;  %v1176_v11 = vshrl.u32 %v7923_v3, 16 }
  0xa5   : > { %2073 = vmatmul.mubr.bf16.gmra.mrb[12].mxu0 %v7865_v49  ;;  %2241 = vmatprep.mubr.bf16.mxu1 %v7923_v3  ;;  %v840_v13 = vsel %vm7784_vm9, %v572_v63, %v839_v5  ;;  %v590_v15 = vrot.slane %v586_v59, 4  ;;  %v7934_v16 = vrot.slane %v592_v48, 7  ;;  %v1173_v18 = vrot.slane %v1171_v7, 1  ;;  %v414_v21 = vld [vmem:[#allocation2 + $0x5c] sm:$0x1] }
  0xa6   : > { %v843_v14 = vld [vmem:[#allocation2 + $0x50] sm:$0x1]  ;;  %841 = vst [vmem:[#allocation2 + $0x48] sm:$0xf] %v840_v13  ;;  %v1339_v49 = vrot.slane %v7923_v3, 1  ;;  %v1180_v22 = vrot.slane %v1178_v10, 1  ;;  %6317 = vmatpush3.bf16.msra.mxu1 %v7168_v17  ;;  %v7949_v33 = vsel %vm1323_vm10, %v1336_v43, %v1337_v8 }
  0xa7   : > { %v844_v19 = vsel %vm7758_vm4, %v582_v58, %v843_v14  ;;  %v846_v20 = vld [vmem:[#allocation2 + $0x54] sm:$0xf]  ;;  %v597_v23 = vor.u32 %v595_v0, %v7934_v16  ;;  %v415_v27 = vsel %vm7753_vm3, 0, %v414_v21  ;;  %v361_v28 = vld [vmem:[#allocation2 + $0x60] sm:$0x1]  ;;  %v7946_v32 = vsel %vm1114_vm8, %v1169_v6, %v1173_v18  ;;  %6318 = vmatprep.subr.bf16.mxu1 %v7169_v60 }
  0xa8   : > { %845 = vst [vmem:[#allocation2 + $0x50] sm:$0x1] %v844_v19  ;;  %v847_v25 = vsel %vm7784_vm9, %v589_v55, %v846_v20  ;;  %v461_v29 = vld [vmem:[%s7742_s19 + $0x38] sm:$0xf]  ;;  %416 = vst [vmem:[#allocation2 + $0x5c] sm:$0x1] %v415_v27  ;;  %2080 = vmatprep.mubr.bf16.mxu0 %v7946_v32  ;;  %v1181_v47 = vor.u32 %v1180_v22, %v1176_v11 }
  0xa9   : > { %848 = vst [vmem:[#allocation2 + $0x54] sm:$0xf] %v847_v25  ;;  %v362_v34 = vsel %vm7758_vm4, 0, %v361_v28  ;;  %v462_v36 = vld [vmem:[%s7742_s19 + $0x3c] sm:$0xf]  ;;  %v601_v37 = vshrl.u32 %v461_v29, 16  ;;  %v598_v12 = vsel %vm7772_vm7, %v590_v15, %v597_v23 }
  0xaa   : > { %v417_v38 = vld [vmem:[#allocation2 + $0x68] sm:$0x1]  ;;  %v7139_v39 = vld [vmem:[#allocation2 + $0x44] ss:$0 sps:$4 sm:$0x11]   ;;  %v604_v41 = vshll.u32 %v461_v29, 16 }
  0xab   : > { %363 = vst [vmem:[#allocation2 + $0x60] sm:$0x1] %v362_v34  ;;  %849 = vst [vmem:[#allocation2 + $0x58] sm:$0xf] %v598_v12  ;;  %v603_v42 = vrot.slane %v601_v37, 7  ;;  %v609_v43 = vshrl.u32 %v462_v36, 16 }
  0xac   : > { %v612_v44 = vshll.u32 %v462_v36, 16  ;;  %v418_v45 = vsel %vm7753_vm3, 0, %v417_v38  ;;  %2242 = vmatmul.mubr.bf16.gmra.mrb[16].mxu1 %v7949_v33  ;;  %v1183_v50 = vshll.u32 %v7139_v39, 16  ;;  %v599_v51 = vrot.slane %v7934_v16, 4  ;;  %v364_v53 = vld [vmem:[#allocation2 + $0x6c] sm:$0x1] }
  0xad   : > { %419 = vst [vmem:[#allocation2 + $0x68] sm:$0x1] %v418_v45  ;;  %v463_v54 = vld [vmem:[%s7742_s19 + $0x40] sm:$0xf]  ;;  %2081 = vmatmul.mubr.bf16.gmra.mrb[16].mxu0 %v7898_v30  ;;  %v1340_v56 = vrot.slane %v7139_v39, 1  ;;  %v607_v57 = vrot.slane %v603_v42, 4  ;;  %v606_v59 = vor.u32 %v604_v41, %v603_v42 }
  0xae   : > { %v611_v58 = vrot.slane %v609_v43, 7  ;;  %v365_v48 = vsel %vm7758_vm4, 0, %v364_v53  ;;  %v1185_v62 = vrot.slane %v1183_v50, 1  ;;  %v7965_v63 = vld [vmem:[#allocation2 + $0x48] sm:$0xff]   ;;  %v464_v0 = vld [vmem:[%s7742_s19 + $0x44] sm:$0xf] }
  0xaf   : > { %366 = vst [vmem:[#allocation2 + $0x6c] sm:$0x1] %v365_v48  ;;  %v618_v2 = vshrl.u32 %v463_v54, 16  ;;  %v621_v4 = vshll.u32 %v463_v54, 16  ;;  %2249 = vmatprep.mubr.bf16.mxu1 %v7965_v63  ;;  %v1188_v7 = vshrl.u32 %v7965_v63, 16  ;;  %v1190_v8 = vshll.u32 %v7965_v63, 16 }
  0xb0   : > { %v7141_v5 = vld [vmem:[#allocation2 + $0x50] ss:$0 sps:$4 sm:$0x11]   ;;  %v614_v55 = vor.u32 %v612_v44, %v611_v58  ;;  %v616_v6 = vrot.slane %v611_v58, 4  ;;  %v7969_v30 = vsel %vm1114_vm8, %v1181_v47, %v1185_v62  ;;  %v1342_v10 = vrot.slane %v7965_v63, 1  ;;  %v7170_v11 = vld [vmem:[#allocation6 + $0x190] sm:$0xff]  }
  0xb1   : > { %2088 = vmatprep.mubr.bf16.mxu0 %v7969_v30  ;;  %v7977_v13 = vsel %vm1323_vm10, %v1339_v49, %v1340_v56  ;;  %v1195_v14 = vshll.u32 %v7141_v5, 16  ;;  %v1343_v15 = vrot.slane %v7141_v5, 1  ;;  %v850_v16 = vld [vmem:[#allocation2 + $0x5c] sm:$0x1]  ;;  %v1192_v19 = vrot.slane %v1190_v8, 1  ;;  %6319 = vmatpush3.bf16.msra.mxu1 %v7170_v11  ;;  %v7171_v49 = vld [vmem:[#allocation6 + $0x1d8] sm:$0xff]  }
  0xb2   : > { %v615_v17 = vsel %vm7772_vm7, %v607_v57, %v614_v55  ;;  %v853_v18 = vld [vmem:[#allocation2 + $0x60] sm:$0xf]  ;;  %v7981_v20 = vld [vmem:[#allocation2 + $0x54] sm:$0xff]   ;;  %v851_v21 = vsel %vm7758_vm4, %v599_v51, %v850_v16  ;;  %v620_v23 = vrot.slane %v618_v2, 7  ;;  %v626_v28 = vshrl.u32 %v464_v0, 16  ;;  %6320 = vmatprep.subr.bf16.mxu1 %v7171_v49 }
  0xb3   : > { %v854_v22 = vsel %vm7784_vm9, %v606_v59, %v853_v18  ;;  %856 = vst [vmem:[#allocation2 + $0x64] sm:$0xf] %v615_v17  ;;  %v1197_v25 = vrot.slane %v1195_v14, 1  ;;  %852 = vst [vmem:[#allocation2 + $0x5c] sm:$0x1] %v851_v21  ;;  %v629_v29 = vshll.u32 %v464_v0, 16  ;;  %v1193_v36 = vor.u32 %v1192_v19, %v1188_v7 }
  0xb4   : > { %855 = vst [vmem:[#allocation2 + $0x60] sm:$0xf] %v854_v22  ;;  %v857_v27 = vld [vmem:[#allocation2 + $0x68] sm:$0x1]  ;;  %v7174_v34 = vld [vmem:[#allocation6 + $0x198] sm:$0xff]   ;;  %2250 = vmatmul.mubr.bf16.gmra.mrb[20].mxu1 %v7977_v13  ;;  %v1200_v37 = vshrl.u32 %v7981_v20, 16  ;;  %v623_v42 = vor.u32 %v621_v4, %v620_v23  ;;  %v8006_v48 = vsel %vm1323_vm10, %v1342_v10, %v1343_v15 }
  0xb5   : > { %v1202_v38 = vshll.u32 %v7981_v20, 16  ;;  %v1345_v39 = vrot.slane %v7981_v20, 1  ;;  %v7175_v12 = vld [vmem:[#allocation6 + $0x178] sm:$0xff]   ;;  %2089 = vmatmul.mubr.bf16.gmra.mrb[20].mxu0 %v7923_v3  ;;  %2257 = vmatprep.mubr.bf16.mxu1 %v7981_v20  ;;  %v858_v41 = vsel %vm7758_vm4, %v616_v6, %v857_v27  ;;  %v624_v43 = vrot.slane %v620_v23, 4  ;;  %v367_v57 = vld [vmem:[#allocation2 + $0x78] sm:$0x1] }
  0xb6   : > { %v7995_v44 = vrot.slane %v626_v28, 7  ;;  %v860_v45 = vld [vmem:[#allocation2 + $0x6c] sm:$0xf]  ;;  %v7998_v47 = vsel %vm1114_vm8, %v1193_v36, %v1197_v25  ;;  %859 = vst [vmem:[#allocation2 + $0x68] sm:$0x1] %v858_v41  ;;  %6321 = vmatpush3.bf16.msra.mxu1 %v7174_v34  ;;  %6216 = vmatprep.subr.bf16.mxu0 %v7175_v12  ;;  %v7176_v3 = vld [vmem:[#allocation6 + $0x138] sm:$0xff]  }
  0xb7   : > { %v1204_v50 = vrot.slane %v1202_v38, 1  ;;  %2096 = vmatprep.mubr.bf16.mxu0 %v7998_v47  ;;  %v861_v53 = vsel %vm7784_vm9, %v623_v42, %v860_v45  ;;  %v420_v54 = vld [vmem:[#allocation2 + $0x74] sm:$0x1]  ;;  %v7177_v58 = vld [vmem:[#allocation6 + $0x1e0] sm:$0xff]   ;;  %v368_v62 = vsel %vm7758_vm4, 0, %v367_v57  ;;  %6217 = vmatpush3.bf16.msra.mxu0 %v7176_v3  ;;  %v7179_v15 = vld [vmem:[#allocation6 + $0x1e8] sm:$0xff]  }
  0xb8   : > { %v631_v51 = vor.u32 %v629_v29, %v7995_v44  ;;  %v633_v56 = vrot.slane %v7995_v44, 4  ;;  %862 = vst [vmem:[#allocation2 + $0x6c] sm:$0xf] %v861_v53  ;;  %v421_v60 = vsel %vm7753_vm3, 0, %v420_v54  ;;  %v465_v59 = vld [vmem:[%s7742_s19 + $0x48] sm:$0xf]  ;;  %6322 = vmatprep.subr.bf16.mxu1 %v7177_v58 }
  0xb9   : > { %v466_v0 = vld [vmem:[%s7742_s19 + $0x4c] sm:$0xf]  ;;  %422 = vst [vmem:[#allocation2 + $0x74] sm:$0x1] %v421_v60  ;;  %369 = vst [vmem:[#allocation2 + $0x78] sm:$0x1] %v368_v62  ;;  %v1205_v16 = vor.u32 %v1204_v50, %v1200_v37 }
  0xba   : > { %v632_v2 = vsel %vm7772_vm7, %v624_v43, %v631_v51  ;;  %v635_v4 = vshrl.u32 %v465_v59, 16  ;;  %v638_v5 = vshll.u32 %v465_v59, 16  ;;  %v643_v55 = vshrl.u32 %v466_v0, 16  ;;  %v7178_v6 = vld [vmem:[#allocation6 + $0x1a0] sm:$0xff]   ;;  %v423_v21 = vld [vmem:[#allocation2 + $0x80] sm:$0x1] }
  0xbb   : > { %v7145_v7 = vld [vmem:[#allocation2 + $0x5c] ss:$0 sps:$4 sm:$0x11]   ;;  %v8016_v8 = vld [vmem:[#allocation2 + $0x60] sm:$0xff]   ;;  %863 = vst [vmem:[#allocation2 + $0x70] sm:$0xf] %v632_v2  ;;  %6323 = vmatpush3.bf16.msra.mxu1 %v7178_v6 }
  0xbc   : > { %v637_v10 = vrot.slane %v635_v4, 7  ;;  %v8018_v11 = vrot.slane %v643_v55, 7  ;;  %v646_v14 = vshll.u32 %v466_v0, 16  ;;  %2258 = vmatmul.mubr.bf16.gmra.mrb[24].mxu1 %v8006_v48  ;;  %v1207_v17 = vshll.u32 %v7145_v7, 16  ;;  %v370_v34 = vld [vmem:[#allocation2 + $0x84] sm:$0x1]  ;;  %6324 = vmatprep.subr.bf16.mxu1 %v7179_v15 }
  0xbd   : > { %v1212_v18 = vshrl.u32 %v8016_v8, 16  ;;  %v1214_v19 = vshll.u32 %v8016_v8, 16  ;;  %2097 = vmatmul.mubr.bf16.gmra.mrb[24].mxu0 %v7965_v63  ;;  %2265 = vmatprep.mubr.bf16.mxu1 %v8016_v8  ;;  %v1346_v22 = vrot.slane %v7145_v7, 1  ;;  %v8025_v23 = vld [vmem:[#allocation2 + $0x68] ss:$0 sps:$4 sm:$0x11]  }
  0xbe   : > { %v640_v49 = vor.u32 %v638_v5, %v637_v10  ;;  %v648_v25 = vor.u32 %v646_v14, %v8018_v11  ;;  %v1209_v27 = vrot.slane %v1207_v17, 1  ;;  %v641_v29 = vrot.slane %v637_v10, 4  ;;  %v7182_v36 = vld [vmem:[#allocation6 + $0x1a8] sm:$0xff]   ;;  %v7183_v50 = vld [vmem:[#allocation6 + $0x1f0] sm:$0xff]   ;;  %v7185_v7 = vld [vmem:[#allocation6 + $0x1f8] sm:$0xff]  }
  0xbf   : > { %v1216_v28 = vrot.slane %v1214_v19, 1  ;;  %v1219_v37 = vshll.u32 %v8025_v23, 16  ;;  %v1348_v38 = vrot.slane %v8016_v8, 1  ;;  %v424_v63 = vsel %vm7753_vm3, 0, %v423_v21  ;;  %6325 = vmatpush3.bf16.msra.mxu1 %v7182_v36  ;;  %v467_v58 = vld [vmem:[%s7742_s19 + $0x50] sm:$0xf] }
  0xc0   : > { %v8033_v12 = vsel %vm1114_vm8, %v1205_v16, %v1209_v27  ;;  %v864_v42 = vld [vmem:[#allocation2 + $0x74] sm:$0x1]  ;;  %v649_v43 = vsel %vm7772_vm7, %v641_v29, %v648_v25  ;;  %v867_v44 = vld [vmem:[#allocation2 + $0x78] sm:$0xf]  ;;  %425 = vst [vmem:[#allocation2 + $0x80] sm:$0x1] %v424_v63  ;;  %v8043_v3 = vsel %vm1323_vm10, %v1345_v39, %v1346_v22  ;;  %6326 = vmatprep.subr.bf16.mxu1 %v7183_v50 }
  0xc1   : > { %v1217_v41 = vor.u32 %v1216_v28, %v1212_v18  ;;  %v371_v45 = vsel %vm7758_vm4, 0, %v370_v34  ;;  %2104 = vmatprep.mubr.bf16.mxu0 %v8033_v12  ;;  %v1221_v51 = vrot.slane %v1219_v37, 1  ;;  %v865_v54 = vsel %vm7758_vm4, %v633_v56, %v864_v42  ;;  %870 = vst [vmem:[#allocation2 + $0x7c] sm:$0xf] %v649_v43  ;;  %v468_v60 = vld [vmem:[%s7742_s19 + $0x54] sm:$0xf] }
  0xc2   : > { %v8045_v53 = vld [vmem:[#allocation2 + $0x6c] sm:$0xff]   ;;  %v868_v57 = vsel %vm7784_vm9, %v640_v49, %v867_v44  ;;  %372 = vst [vmem:[#allocation2 + $0x84] sm:$0x1] %v371_v45  ;;  %866 = vst [vmem:[#allocation2 + $0x74] sm:$0x1] %v865_v54  ;;  %v652_v62 = vshrl.u32 %v467_v58, 16 }
  0xc3   : > { %869 = vst [vmem:[#allocation2 + $0x78] sm:$0xf] %v868_v57  ;;  %v655_v59 = vshll.u32 %v467_v58, 16  ;;  %v8054_v39 = vsel %vm1114_vm8, %v1217_v41, %v1221_v51  ;;  %v1349_v0 = vrot.slane %v8025_v23, 1  ;;  %v1226_v2 = vshll.u32 %v8045_v53, 16  ;;  %v7184_v4 = vld [vmem:[#allocation6 + $0x1b0] sm:$0xff]  }
  0xc4   : > { %v650_v56 = vrot.slane %v8018_v11, 4  ;;  %2266 = vmatmul.mubr.bf16.gmra.mrb[28].mxu1 %v8043_v3  ;;  %v654_v5 = vrot.slane %v652_v62, 7  ;;  %v660_v55 = vshrl.u32 %v468_v60, 16  ;;  %v663_v6 = vshll.u32 %v468_v60, 16  ;;  %v426_v14 = vld [vmem:[#allocation2 + $0x8c] sm:$0x1] }
  0xc5   : > { %2105 = vmatmul.mubr.bf16.gmra.mrb[28].mxu0 %v7981_v20  ;;  %2273 = vmatprep.mubr.bf16.mxu1 %v8045_v53  ;;  %v1224_v10 = vshrl.u32 %v8045_v53, 16  ;;  %v7186_v15 = vld [vmem:[#allocation6 + $0x1b8] sm:$0xff]   ;;  %v427_v18 = vsel %vm7753_vm3, 0, %v426_v14  ;;  %v8066_v21 = vld [vmem:[#allocation6 + $0x200] sm:$0xff]   ;;  %v1228_v20 = vrot.slane %v1226_v2, 1  ;;  %v1351_v25 = vrot.slane %v8045_v53, 1 }
  0xc6   : > { %2112 = vmatprep.mubr.bf16.mxu0 %v8054_v39  ;;  %v657_v16 = vor.u32 %v655_v59, %v654_v5  ;;  %v658_v11 = vrot.slane %v654_v5, 4  ;;  %v662_v17 = vrot.slane %v660_v55, 7  ;;  %v373_v19 = vld [vmem:[#allocation2 + $0x90] sm:$0x1]  ;;  %6327 = vmatpush3.bf16.msra.mxu1 %v7184_v4  ;;  %428 = vst [vmem:[#allocation2 + $0x8c] sm:$0x1] %v427_v18  ;;  %v8078_v36 = vsel %vm1323_vm10, %v1348_v38, %v1349_v0 }
  0xc7   : > { %v871_v22 = vld [vmem:[#allocation2 + $0x80] sm:$0x1]  ;;  %v374_v23 = vsel %vm7758_vm4, 0, %v373_v19  ;;  %v469_v49 = vld [vmem:[%s7742_s19 + $0x58] sm:$0xf]  ;;  %6328 = vmatprep.subr.bf16.mxu1 %v7185_v7  ;;  %6922 = vmatprep.subr.bf16.mxu0 %v8066_v21  ;;  %v1229_v50 = vor.u32 %v1228_v20, %v1224_v10 }
  0xc8   : > { %v872_v27 = vsel %vm7758_vm4, %v650_v56, %v871_v22  ;;  %v665_v28 = vor.u32 %v663_v6, %v662_v17  ;;  %375 = vst [vmem:[#allocation2 + $0x90] sm:$0x1] %v374_v23  ;;  %v669_v34 = vshrl.u32 %v469_v49, 16  ;;  %v470_v43 = vld [vmem:[%s7742_s19 + $0x5c] sm:$0xf]  ;;  %v672_v45 = vshll.u32 %v469_v49, 16 }
  0xc9   : > { %v874_v29 = vld [vmem:[#allocation2 + $0x84] sm:$0xf]  ;;  %v7151_v37 = vld [vmem:[#allocation2 + $0x74] ss:$0 sps:$4 sm:$0x11]   ;;  %v667_v54 = vrot.slane %v662_v17, 4 }
  0xca   : > { %v8080_v63 = vld [vmem:[#allocation2 + $0x78] sm:$0xff]   ;;  %873 = vst [vmem:[#allocation2 + $0x80] sm:$0x1] %v872_v27  ;;  %v875_v41 = vsel %vm7784_vm9, %v657_v16, %v874_v29  ;;  %v666_v42 = vsel %vm7772_vm7, %v658_v11, %v665_v28  ;;  %v671_v44 = vrot.slane %v669_v34, 7  ;;  %6329 = vmatpush3.bf16.msra.mxu1 %v7186_v15  ;;  %v1231_v51 = vshll.u32 %v7151_v37, 16 }
  0xcb   : > { %876 = vst [vmem:[#allocation2 + $0x84] sm:$0xf] %v875_v41  ;;  %v1238_v38 = vshll.u32 %v8080_v63, 16  ;;  %877 = vst [vmem:[#allocation2 + $0x88] sm:$0xf] %v666_v42  ;;  %v1352_v58 = vrot.slane %v7151_v37, 1 }
  0xcc   : > { %v429_v57 = vld [vmem:[#allocation2 + $0x98] sm:$0x1]  ;;  %2274 = vmatmul.mubr.bf16.gmra.mrb[32].mxu1 %v8078_v36  ;;  %v1236_v60 = vshrl.u32 %v8080_v63, 16  ;;  %v674_v62 = vor.u32 %v672_v45, %v671_v44  ;;  %v677_v59 = vshrl.u32 %v470_v43, 16  ;;  %v376_v0 = vld [vmem:[#allocation2 + $0x9c] sm:$0x1] }
  0xcd   : > { %2113 = vmatmul.mubr.bf16.gmra.mrb[32].mxu0 %v8016_v8  ;;  %v1233_v2 = vrot.slane %v1231_v51, 1  ;;  %2281 = vmatprep.mubr.bf16.mxu1 %v8080_v63  ;;  %v1240_v56 = vrot.slane %v1238_v38, 1  ;;  %v675_v4 = vrot.slane %v671_v44, 4  ;;  %v680_v5 = vshll.u32 %v470_v43, 16  ;;  %v471_v55 = vld [vmem:[%s7742_s19 + $0x60] sm:$0xf] }
  0xce   : > { %v878_v6 = vld [vmem:[#allocation2 + $0x8c] sm:$0x1]  ;;  %v679_v7 = vrot.slane %v677_v59, 7  ;;  %v430_v10 = vsel %vm7753_vm3, 0, %v429_v57  ;;  %v377_v14 = vsel %vm7758_vm4, 0, %v376_v0  ;;  %v686_v15 = vshrl.u32 %v471_v55, 16 }
  0xcf   : > { %v8098_v16 = vsel %vm1114_vm8, %v1229_v50, %v1233_v2  ;;  %v879_v8 = vsel %vm7758_vm4, %v667_v54, %v878_v6  ;;  %v881_v11 = vld [vmem:[#allocation2 + $0x90] sm:$0xf]  ;;  %431 = vst [vmem:[#allocation2 + $0x98] sm:$0x1] %v430_v10  ;;  %378 = vst [vmem:[#allocation2 + $0x9c] sm:$0x1] %v377_v14  ;;  %v8107_v23 = vsel %vm1323_vm10, %v1351_v25, %v1352_v58 }
  0xd0   : > { %v472_v17 = vld [vmem:[%s7742_s19 + $0x64] sm:$0xf]  ;;  %v689_v18 = vshll.u32 %v471_v55, 16  ;;  %2120 = vmatprep.mubr.bf16.mxu0 %v8098_v16  ;;  %880 = vst [vmem:[#allocation2 + $0x8c] sm:$0x1] %v879_v8  ;;  %v682_v20 = vor.u32 %v680_v5, %v679_v7  ;;  %v882_v22 = vsel %vm7784_vm9, %v674_v62, %v881_v11  ;;  %v688_v49 = vrot.slane %v686_v15, 7 }
  0xd1   : > { %v7153_v19 = vld [vmem:[#allocation2 + $0x80] ss:$0 sps:$4 sm:$0x11]   ;;  %883 = vst [vmem:[#allocation2 + $0x90] sm:$0xf] %v882_v22  ;;  %v694_v27 = vshrl.u32 %v472_v17, 16  ;;  %v1241_v29 = vor.u32 %v1240_v56, %v1236_v60 }
  0xd2   : > { %v697_v28 = vshll.u32 %v472_v17, 16  ;;  %v1243_v34 = vshll.u32 %v7153_v19, 16  ;;  %v8109_v37 = vld [vmem:[#allocation2 + $0x84] sm:$0xff]   ;;  %v683_v41 = vsel %vm7772_vm7, %v675_v4, %v682_v20  ;;  %v684_v42 = vrot.slane %v679_v7, 4 }
  0xd3   : > { %884 = vst [vmem:[#allocation2 + $0x94] sm:$0xf] %v683_v41  ;;  %v691_v43 = vor.u32 %v689_v18, %v688_v49  ;;  %v692_v44 = vrot.slane %v688_v49, 4  ;;  %v8113_v45 = vrot.slane %v694_v27, 7  ;;  %v1354_v50 = vrot.slane %v8080_v63, 1 }
  0xd4   : > { %2282 = vmatmul.mubr.bf16.gmra.mrb[36].mxu1 %v8107_v23  ;;  %v1245_v25 = vrot.slane %v1243_v34, 1  ;;  %v1250_v51 = vshll.u32 %v8109_v37, 16  ;;  %v1355_v38 = vrot.slane %v7153_v19, 1  ;;  %v1248_v54 = vshrl.u32 %v8109_v37, 16  ;;  %v432_v10 = vld [vmem:[#allocation2 + $0xa4] sm:$0x1] }
  0xd5   : > { %2121 = vmatmul.mubr.bf16.gmra.mrb[36].mxu0 %v8045_v53  ;;  %2289 = vmatprep.mubr.bf16.mxu1 %v8109_v37  ;;  %v699_v57 = vor.u32 %v697_v28, %v8113_v45  ;;  %v379_v14 = vld [vmem:[#allocation2 + $0xa8] sm:$0x1]  ;;  %v1357_v15 = vrot.slane %v8109_v37, 1  ;;  %v433_v17 = vsel %vm7753_vm3, 0, %v432_v10  ;;  %v473_v18 = vld [vmem:[%s7742_s19 + $0x68] sm:$0xf] }
  0xd6   : > { %v8123_v58 = vsel %vm1114_vm8, %v1241_v29, %v1245_v25  ;;  %v1252_v60 = vrot.slane %v1250_v51, 1  ;;  %v885_v62 = vld [vmem:[#allocation2 + $0x98] sm:$0x1]  ;;  %v888_v59 = vld [vmem:[#allocation2 + $0x9c] sm:$0xf]  ;;  %v8133_v4 = vsel %vm1323_vm10, %v1354_v50, %v1355_v38  ;;  %v380_v22 = vsel %vm7758_vm4, 0, %v379_v14 }
  0xd7   : > { %2128 = vmatprep.mubr.bf16.mxu0 %v8123_v58  ;;  %v7157_v0 = vld [vmem:[#allocation2 + $0x8c] ss:$0 sps:$4 sm:$0x11]   ;;  %v886_v2 = vsel %vm7758_vm4, %v684_v42, %v885_v62  ;;  %v700_v53 = vsel %vm7772_vm7, %v692_v44, %v699_v57  ;;  %v889_v56 = vsel %vm7784_vm9, %v691_v43, %v888_v59  ;;  %434 = vst [vmem:[#allocation2 + $0xa4] sm:$0x1] %v433_v17  ;;  %v703_v27 = vshrl.u32 %v473_v18, 16 }
  0xd8   : > { %887 = vst [vmem:[#allocation2 + $0x98] sm:$0x1] %v886_v2  ;;  %890 = vst [vmem:[#allocation2 + $0x9c] sm:$0xf] %v889_v56  ;;  %v1253_v5 = vor.u32 %v1252_v60, %v1248_v54  ;;  %v1255_v55 = vshll.u32 %v7157_v0, 16  ;;  %v1358_v8 = vrot.slane %v7157_v0, 1 }
  0xd9   : > { %891 = vst [vmem:[#allocation2 + $0xa0] sm:$0xf] %v700_v53  ;;  %v474_v49 = vld [vmem:[%s7742_s19 + $0x6c] sm:$0xf]  ;;  %381 = vst [vmem:[#allocation2 + $0xa8] sm:$0x1] %v380_v22 }
  0xda   : > { %v8135_v6 = vld [vmem:[#allocation2 + $0x90] sm:$0xff]   ;;  %v1257_v7 = vrot.slane %v1255_v55, 1  ;;  %v706_v29 = vshll.u32 %v473_v18, 16  ;;  %v711_v34 = vshrl.u32 %v474_v49, 16  ;;  %v705_v42 = vrot.slane %v703_v27, 7 }
  0xdb   : > { %v1262_v11 = vshll.u32 %v8135_v6, 16  ;;  %v1260_v20 = vshrl.u32 %v8135_v6, 16  ;;  %v8154_v44 = vsel %vm1323_vm10, %v1357_v15, %v1358_v8  ;;  %v701_v38 = vrot.slane %v8113_v45, 4  ;;  %v435_v55 = vld [vmem:[#allocation2 + $0xb0] sm:$0x1] }
  0xdc   : > { %2290 = vmatmul.mubr.bf16.gmra.mrb[40].mxu1 %v8133_v4  ;;  %v8145_v19 = vsel %vm1114_vm8, %v1253_v5, %v1257_v7  ;;  %v713_v43 = vrot.slane %v711_v34, 7  ;;  %v708_v54 = vor.u32 %v706_v29, %v705_v42  ;;  %v709_v57 = vrot.slane %v705_v42, 4  ;;  %v382_v15 = vld [vmem:[#allocation2 + $0xb4] sm:$0x1]  ;;  %v475_v8 = vld [vmem:[%s7742_s19 + $0x70] sm:$0xf] }
  0xdd   : > { %2129 = vmatmul.mubr.bf16.gmra.mrb[40].mxu0 %v8080_v63  ;;  %2297 = vmatprep.mubr.bf16.mxu1 %v8135_v6  ;;  %v1264_v28 = vrot.slane %v1262_v11, 1  ;;  %v714_v63 = vshll.u32 %v474_v49, 16  ;;  %v1360_v45 = vrot.slane %v8135_v6, 1  ;;  %v436_v14 = vsel %vm7753_vm3, 0, %v435_v55  ;;  %v476_v17 = vld [vmem:[%s7742_s19 + $0x74] sm:$0xf] }
  0xde   : > { %2136 = vmatprep.mubr.bf16.mxu0 %v8145_v19  ;;  %v892_v59 = vld [vmem:[#allocation2 + $0xa4] sm:$0x1]  ;;  %437 = vst [vmem:[#allocation2 + $0xb0] sm:$0x1] %v436_v14  ;;  %v383_v11 = vsel %vm7758_vm4, 0, %v382_v15  ;;  %v720_v18 = vshrl.u32 %v475_v8, 16 }
  0xdf   : > { %v7159_v41 = vld [vmem:[#allocation2 + $0x98] ss:$0 sps:$4 sm:$0x11]   ;;  %v1265_v25 = vor.u32 %v1264_v28, %v1260_v20  ;;  %v716_v60 = vor.u32 %v714_v63, %v713_v43  ;;  %v893_v56 = vsel %vm7758_vm4, %v701_v38, %v892_v59  ;;  %v723_v20 = vshll.u32 %v475_v8, 16  ;;  %384 = vst [vmem:[#allocation2 + $0xb4] sm:$0x1] %v383_v11 }
  0xe0   : > { %v1267_v50 = vshll.u32 %v7159_v41, 16  ;;  %v8156_v51 = vld [vmem:[#allocation2 + $0x9c] sm:$0xff]   ;;  %v1361_v53 = vrot.slane %v7159_v41, 1  ;;  %v895_v5 = vld [vmem:[#allocation2 + $0xa8] sm:$0xf]  ;;  %v728_v22 = vshrl.u32 %v476_v17, 16 }
  0xe1   : > { %v717_v0 = vsel %vm7772_vm7, %v709_v57, %v716_v60  ;;  %894 = vst [vmem:[#allocation2 + $0xa4] sm:$0x1] %v893_v56  ;;  %v1274_v7 = vshll.u32 %v8156_v51, 16  ;;  %v896_v10 = vsel %vm7784_vm9, %v708_v54, %v895_v5  ;;  %v731_v49 = vshll.u32 %v476_v17, 16  ;;  %v385_v14 = vld [vmem:[#allocation2 + $0xc0] sm:$0x1] }
  0xe2   : > { %v1269_v62 = vrot.slane %v1267_v50, 1  ;;  %898 = vst [vmem:[#allocation2 + $0xac] sm:$0xf] %v717_v0  ;;  %897 = vst [vmem:[#allocation2 + $0xa8] sm:$0xf] %v896_v10  ;;  %v8181_v27 = vsel %vm1323_vm10, %v1360_v45, %v1361_v53  ;;  %v1272_v28 = vshrl.u32 %v8156_v51, 16 }
  0xe3   : > { %v722_v29 = vrot.slane %v720_v18, 7  ;;  %v1276_v34 = vrot.slane %v1274_v7, 1  ;;  %v8184_v63 = vrot.slane %v728_v22, 7  ;;  %v718_v41 = vrot.slane %v713_v43, 4  ;;  %v438_v10 = vld [vmem:[#allocation2 + $0xbc] sm:$0x1] }
  0xe4   : > { %2298 = vmatmul.mubr.bf16.gmra.mrb[44].mxu1 %v8154_v44  ;;  %v8164_v2 = vsel %vm1114_vm8, %v1265_v25, %v1269_v62  ;;  %v1363_v54 = vrot.slane %v8156_v51, 1  ;;  %v439_v8 = vsel %vm7753_vm3, 0, %v438_v10  ;;  %v386_v17 = vsel %vm7758_vm4, 0, %v385_v14  ;;  %v477_v18 = vld [vmem:[%s7742_s19 + $0x78] sm:$0xf] }
  0xe5   : > { %2137 = vmatmul.mubr.bf16.gmra.mrb[44].mxu0 %v8109_v37  ;;  %2305 = vmatprep.mubr.bf16.mxu1 %v8156_v51  ;;  %v726_v42 = vrot.slane %v722_v29, 4  ;;  %v725_v25 = vor.u32 %v723_v20, %v722_v29  ;;  %v733_v50 = vor.u32 %v731_v49, %v8184_v63  ;;  %v899_v60 = vld [vmem:[#allocation2 + $0xb0] sm:$0x1]  ;;  %v1277_v59 = vor.u32 %v1276_v34, %v1272_v28  ;;  %v478_v22 = vld [vmem:[%s7742_s19 + $0x7c] sm:$0xf] }
  0xe6   : > { %2144 = vmatprep.mubr.bf16.mxu0 %v8164_v2  ;;  %v900_v45 = vsel %vm7758_vm4, %v718_v41, %v899_v60  ;;  %v902_v53 = vld [vmem:[#allocation2 + $0xb4] sm:$0xf]  ;;  %v735_v11 = vrot.slane %v8184_v63, 4  ;;  %440 = vst [vmem:[#allocation2 + $0xbc] sm:$0x1] %v439_v8  ;;  %v737_v49 = vshrl.u32 %v477_v18, 16 }
  0xe7   : > { %v734_v62 = vsel %vm7772_vm7, %v726_v42, %v733_v50  ;;  %901 = vst [vmem:[#allocation2 + $0xb0] sm:$0x1] %v900_v45  ;;  %v903_v56 = vsel %vm7784_vm9, %v725_v25, %v902_v53  ;;  %387 = vst [vmem:[#allocation2 + $0xc0] sm:$0x1] %v386_v17  ;;  %v740_v28 = vshll.u32 %v477_v18, 16  ;;  %v745_v29 = vshrl.u32 %v478_v22, 16 }
  0xe8   : > { %v7166_v38 = vld [vmem:[#allocation2 + $0xa4] ss:$0 sps:$4 sm:$0x11]   ;;  %905 = vst [vmem:[#allocation2 + $0xb8] sm:$0xf] %v734_v62  ;;  %v748_v34 = vshll.u32 %v478_v22, 16 }
  0xe9   : > { %v8190_v57 = vld [vmem:[#allocation2 + $0xa8] sm:$0xff]   ;;  %v1279_v0 = vshll.u32 %v7166_v38, 16  ;;  %v1364_v43 = vrot.slane %v7166_v38, 1  ;;  %904 = vst [vmem:[#allocation2 + $0xb4] sm:$0xf] %v903_v56  ;;  %v739_v41 = vrot.slane %v737_v49, 7 }
  0xea   : > { %v1286_v7 = vshll.u32 %v8190_v57, 16  ;;  %v1284_v15 = vshrl.u32 %v8190_v57, 16  ;;  %v1366_v42 = vrot.slane %v8190_v57, 1  ;;  %v747_v25 = vrot.slane %v745_v29, 7  ;;  %v441_v49 = vld [vmem:[#allocation2 + $0xc8] sm:$0x1] }
  0xeb   : > { %v1281_v5 = vrot.slane %v1279_v0, 1  ;;  %v8200_v55 = vsel %vm1323_vm10, %v1363_v54, %v1364_v43  ;;  %v742_v38 = vor.u32 %v740_v28, %v739_v41  ;;  %v743_v54 = vrot.slane %v739_v41, 4 }
  0xec   : > { %2306 = vmatmul.mubr.bf16.gmra.mrb[48].mxu1 %v8181_v27  ;;  %v1288_v63 = vrot.slane %v1286_v7, 1  ;;  %v750_v62 = vor.u32 %v748_v34, %v747_v25  ;;  %v442_v28 = vsel %vm7753_vm3, 0, %v441_v49  ;;  %v444_v34 = vld [vmem:[#allocation2 + $0xd4] sm:$0x1] }
  0xed   : > { %2145 = vmatmul.mubr.bf16.gmra.mrb[48].mxu0 %v8135_v6  ;;  %2313 = vmatprep.mubr.bf16.mxu1 %v8190_v57  ;;  %v8211_v20 = vsel %vm1114_vm8, %v1277_v59, %v1281_v5  ;;  %v906_v45 = vld [vmem:[#allocation2 + $0xbc] sm:$0x1]  ;;  %443 = vst [vmem:[#allocation2 + $0xc8] sm:$0x1] %v442_v28 }
  0xee   : > { %2152 = vmatprep.mubr.bf16.mxu0 %v8211_v20  ;;  %v7172_v50 = vld [vmem:[#allocation2 + $0xb0] ss:$0 sps:$4 sm:$0x11]   ;;  %v1289_v59 = vor.u32 %v1288_v63, %v1284_v15  ;;  %v751_v5 = vsel %vm7772_vm7, %v743_v54, %v750_v62  ;;  %v909_v7 = vld [vmem:[#allocation2 + $0xc0] sm:$0xf]  ;;  %v907_v15 = vsel %vm7758_vm4, %v735_v11, %v906_v45 }
  0xef   : > { %v1291_v0 = vshll.u32 %v7172_v50, 16  ;;  %v1367_v43 = vrot.slane %v7172_v50, 1  ;;  %v910_v8 = vsel %vm7784_vm9, %v742_v38, %v909_v7  ;;  %912 = vst [vmem:[#allocation2 + $0xc4] sm:$0xf] %v751_v5  ;;  %908 = vst [vmem:[#allocation2 + $0xbc] sm:$0x1] %v907_v15 }
  0xf0   : > { %v8218_v60 = vld [vmem:[#allocation2 + $0xb4] sm:$0xff]   ;;  %911 = vst [vmem:[#allocation2 + $0xc0] sm:$0xf] %v910_v8  ;;  %v388_v11 = vld [vmem:[#allocation2 + $0xcc] sm:$0x1]  ;;  %v7307_v7 = vld [vmem:[#allocation2 + $0x24] sm:$0xff]  }
  0xf1   : > { %v1296_v53 = vshrl.u32 %v8218_v60, 16  ;;  %v1298_v56 = vshll.u32 %v8218_v60, 16  ;;  %v1293_v10 = vrot.slane %v1291_v0, 1  ;;  %v8226_v14 = vsel %vm1323_vm10, %v1366_v42, %v1367_v43  ;;  %v7190_v5 = vld [vmem:[#allocation6 + $0x218] sm:$0xff]   ;;  %v7309_v15 = vld [vmem:[#allocation2 + $0x3c] sm:$0xff]   ;;  %v7310_v8 = vld [vmem:[#allocation2 + $0x48] sm:$0xff]  }
  0xf2   : > { %v1369_v18 = vrot.slane %v8218_v60, 1  ;;  %v389_v29 = vsel %vm7758_vm4, 0, %v388_v11  ;;  %v445_v42 = vsel %vm7753_vm3, 0, %v444_v34  ;;  %v752_v0 = vrot.slane %v747_v25, 4  ;;  %v7188_v25 = vld [vmem:[#allocation6 + $0x208] sm:$0xff]  }
  0xf3   : > { %v1300_v17 = vrot.slane %v1298_v56, 1  ;;  %v8235_v22 = vsel %vm1114_vm8, %v1289_v59, %v1293_v10  ;;  %390 = vst [vmem:[#allocation2 + $0xcc] sm:$0x1] %v389_v29  ;;  %446 = vst [vmem:[#allocation2 + $0xd4] sm:$0x1] %v445_v42  ;;  %v7189_v56 = vld [vmem:[#allocation6 + $0x210] sm:$0xff]  }
  0xf4   : > { %2314 = vmatmul.mubr.bf16.gmra.mrb[52].mxu1 %v8200_v55  ;;  %v913_v24 = vld [vmem:[#allocation2 + $0xc8] sm:$0x1] }
  0xf5   : > { %2153 = vmatmul.mubr.bf16.gmra.mrb[52].mxu0 %v8156_v51  ;;  %2321 = vmatprep.mubr.bf16.mxu1 %v8218_v60  ;;  %v1301_v50 = vor.u32 %v1300_v17, %v1296_v53  ;;  %v914_v45 = vsel %vm7758_vm4, %v752_v0, %v913_v24  ;;  %v7306_v53 = vld [vmem:[#allocation2 + $0x18] sm:$0xff]   ;;  %v7193_v10 = vld [vmem:[#allocation6 + $0x230] sm:$0xff]  }
  0xf6   : > { %2160 = vmatprep.mubr.bf16.mxu0 %v8235_v22  ;;  %v7180_v63 = vld [vmem:[#allocation2 + $0xbc] ss:$0 sps:$4 sm:$0x11]   ;;  %915 = vst [vmem:[#allocation2 + $0xc8] sm:$0x1] %v914_v45  ;;  %v7313_v17 = vld [vmem:[#allocation2 + $0x6c] sm:$0xff]  }
  0xf7   : > { %v8243_v41 = vld [vmem:[#allocation2 + $0xc0] sm:$0xff]   ;;  %v1303_v38 = vshll.u32 %v7180_v63, 16  ;;  %v1370_v54 = vrot.slane %v7180_v63, 1 }
  0xf9   : > { %v1305_v62 = vrot.slane %v1303_v38, 1  ;;  %v8249_v59 = vsel %vm1323_vm10, %v1369_v18, %v1370_v54 }
  0xfb   : > { %v8253_v43 = vsel %vm1114_vm8, %v1301_v50, %v1305_v62 }
  0xfc   : > { %2322 = vmatmul.mubr.bf16.gmra.mrb[56].mxu1 %v8226_v14 }
  0xfd   : > { %2161 = vmatmul.mubr.bf16.gmra.mrb[56].mxu0 %v8190_v57  ;;  %2329 = vmatprep.mubr.bf16.mxu1 %v8243_v41 }
  0xfe   : > { %2168 = vmatprep.mubr.bf16.mxu0 %v8253_v43 }
 0x104   : > { %2330 = vmatmul.mubr.bf16.gmra.mrb[60].mxu1 %v8249_v59 }
 0x105   : > { %2531 = vmatprep.mubr.bf16.mxu1 %v7883_v9  ;;  %2169 = vmatmul.mubr.bf16.gmra.mrb[60].mxu0 %v8218_v60 }
 0x106   : > { %2370 = vmatprep.mubr.bf16.mxu0 %v7847_v31  ;;  %v7191_v31 = vld [vmem:[#allocation6 + $0x220] sm:$0xff]  }
 0x10c   : > { %2532 = vmatmul.mubr.bf16.vlgmr.msra.gmra.mrb[64].mxu1 %v7306_v53  ;;  %v8303_v53 = vld [vmem:[#allocation2 + $0xc8] ss:$0 sps:$4 sm:$0x11]  }
 0x10d   : > { %2539 = vmatprep.mubr.bf16.mxu1 %v7901_v35  ;;  %2371 = vmatmul.mubr.bf16.vlgmr.msra.gmra.mrb[64].mxu0 %v7859_v40  ;;  %v7192_v40 = vld [vmem:[#allocation6 + $0x228] sm:$0xff]  }
 0x10e   : > { %6923 = vmatpush3.bf16.msra.mxu0 %v8066_v21  ;;  %2378 = vmatprep.mubr.bf16.mxu0 %v7876_v1  ;;  %v7308_v21 = vld [vmem:[#allocation2 + $0x30] sm:$0xff]  }
 0x10f   : > { %6924 = vmatprep.subr.bf16.mxu0 %v7188_v25 }
 0x112   : > { %6925 = vmatpush3.bf16.msra.mxu0 %v7188_v25  ;;  %v1400_v25 = vshll.u32 %v8243_v41, 16 }
 0x113   : > { %6926 = vmatprep.subr.bf16.mxu0 %v7189_v56 }
 0x114   : > { %2540 = vmatmul.mubr.bf16.gmra.mrb[68].mxu1 %v7307_v7 }
 0x115   : > { %2547 = vmatprep.mubr.bf16.mxu1 %v7946_v32  ;;  %2379 = vmatmul.mubr.bf16.gmra.mrb[68].mxu0 %v7883_v9  ;;  %v7194_v9 = vld [vmem:[#allocation6 + $0x238] sm:$0xff]  }
 0x116   : > { %2386 = vmatprep.mubr.bf16.mxu0 %v7917_v46  ;;  %6927 = vmatpush3.bf16.msra.mxu0 %v7189_v56 }
 0x117   : > { %6928 = vmatprep.subr.bf16.mxu0 %v7190_v5 }
 0x11a   : > { %6929 = vmatpush3.bf16.msra.mxu0 %v7190_v5 }
 0x11b   : > { %6930 = vmatprep.subr.bf16.mxu0 %v7191_v31 }
 0x11c   : > { %2548 = vmatmul.mubr.bf16.gmra.mrb[72].mxu1 %v7308_v21  ;;  %v1405_v21 = vshll.u32 %v8303_v53, 16 }
 0x11d   : > { %2555 = vmatprep.mubr.bf16.mxu1 %v7969_v30  ;;  %2387 = vmatmul.mubr.bf16.gmra.mrb[72].mxu0 %v7901_v35  ;;  %v7311_v35 = vld [vmem:[#allocation2 + $0x54] sm:$0xff]  }
 0x11e   : > { %2394 = vmatprep.mubr.bf16.mxu0 %v7949_v33  ;;  %6931 = vmatpush3.bf16.msra.mxu0 %v7191_v31  ;;  %v1398_v31 = vshrl.u32 %v8243_v41, 16 }
 0x11f   : > { %6932 = vmatprep.subr.bf16.mxu0 %v7192_v40 }
 0x122   : > { %6933 = vmatpush3.bf16.msra.mxu0 %v7192_v40  ;;  %v1402_v40 = vrot.slane %v1400_v25, 1 }
 0x123   : > { %6934 = vmatprep.subr.bf16.mxu0 %v7193_v10 }
 0x124   : > { %2556 = vmatmul.mubr.bf16.gmra.mrb[76].mxu1 %v7309_v15 }
 0x125   : > { %2563 = vmatprep.mubr.bf16.mxu1 %v7998_v47  ;;  %2395 = vmatmul.mubr.bf16.gmra.mrb[76].mxu0 %v7946_v32  ;;  %v7312_v32 = vld [vmem:[#allocation2 + $0x60] sm:$0xff]  }
 0x126   : > { %2402 = vmatprep.mubr.bf16.mxu0 %v7977_v13  ;;  %6935 = vmatpush3.bf16.msra.mxu0 %v7193_v10  ;;  %v8312_v10 = vld [vmem:[#allocation2 + $0xcc] sm:$0xff]  }
 0x127   : > { %6936 = vmatprep.subr.bf16.mxu0 %v7194_v9 }
 0x12a   : > { %6937 = vmatpush3.bf16.msra.mxu0 %v7194_v9 }
 0x12c   : > { %2564 = vmatmul.mubr.bf16.gmra.mrb[80].mxu1 %v7310_v8 }
 0x12d   : > { %2571 = vmatprep.mubr.bf16.mxu1 %v8033_v12  ;;  %2403 = vmatmul.mubr.bf16.gmra.mrb[80].mxu0 %v7969_v30  ;;  %v7314_v30 = vld [vmem:[#allocation2 + $0x78] sm:$0xff]  }
 0x12e   : > { %2410 = vmatprep.mubr.bf16.mxu0 %v8006_v48 }
 0x134   : > { %2572 = vmatmul.mubr.bf16.gmra.mrb[84].mxu1 %v7311_v35 }
 0x135   : > { %2579 = vmatprep.mubr.bf16.mxu1 %v8054_v39  ;;  %2411 = vmatmul.mubr.bf16.gmra.mrb[84].mxu0 %v7998_v47 }
 0x136   : > { %2418 = vmatprep.mubr.bf16.mxu0 %v8043_v3 }
 0x13c   : > { %2580 = vmatmul.mubr.bf16.gmra.mrb[88].mxu1 %v7312_v32 }
 0x13d   : > { %2587 = vmatprep.mubr.bf16.mxu1 %v8098_v16  ;;  %2419 = vmatmul.mubr.bf16.gmra.mrb[88].mxu0 %v8033_v12 }
 0x13e   : > { %2426 = vmatprep.mubr.bf16.mxu0 %v8078_v36 }
 0x144   : > { %2588 = vmatmul.mubr.bf16.gmra.mrb[92].mxu1 %v7313_v17 }
 0x145   : > { %2595 = vmatprep.mubr.bf16.mxu1 %v8123_v58  ;;  %2427 = vmatmul.mubr.bf16.gmra.mrb[92].mxu0 %v8054_v39 }
 0x146   : > { %2434 = vmatprep.mubr.bf16.mxu0 %v8107_v23 }
 0x14c   : > { %2596 = vmatmul.mubr.bf16.gmra.mrb[96].mxu1 %v7314_v30  ;;  %v8318_v30 = vld [vmem:[#allocation2 + $0xd4] ss:$0 sps:$4 sm:$0x11]  }
 0x14d   : > { %2603 = vmatprep.mubr.bf16.mxu1 %v8145_v19  ;;  %2435 = vmatmul.mubr.bf16.gmra.mrb[96].mxu0 %v8098_v16 }
 0x14e   : > { %2442 = vmatprep.mubr.bf16.mxu0 %v8133_v4 }
 0x154   : > { %2604 = vmatmul.mubr.bf16.gmra.mrb[100].mxu1 %v8109_v37 }
 0x155   : > { %2611 = vmatprep.mubr.bf16.mxu1 %v8164_v2  ;;  %2443 = vmatmul.mubr.bf16.gmra.mrb[100].mxu0 %v8123_v58 }
 0x156   : > { %2450 = vmatprep.mubr.bf16.mxu0 %v8154_v44 }
 0x15c   : > { %2612 = vmatmul.mubr.bf16.gmra.mrb[104].mxu1 %v8135_v6 }
 0x15d   : > { %v5994_v47 = vpop.f32.mrb[0].mxu0  ;;  %2619 = vmatprep.mubr.bf16.mxu1 %v8211_v20  ;;  %2451 = vmatmul.mubr.bf16.gmra.mrb[104].mxu0 %v8145_v19 }
 0x15e   : > { %v5995_v12 = vpop.f32.mrb[1].mxu0  ;;  %v6106_v49 = vpop.f32.mrb[0].mxu1  ;;  %2458 = vmatprep.mubr.bf16.mxu0 %v8181_v27 }
 0x15f   : > { %v5996_v39 = vadd.f32 %v5995_v12, %v5994_v47  ;;  %v5997_v18 = vpop.f32.mrb[2].mxu0  ;;  %v6107_v28 = vpop.f32.mrb[1].mxu1 }
 0x160   : > { %v5998_v11 = vpop.f32.mrb[3].mxu0  ;;  %v6108_v29 = vadd.f32 %v6107_v28, %v6106_v49  ;;  %v6109_v34 = vpop.f32.mrb[2].mxu1  ;;  %v1407_v49 = vrot.slane %v1405_v21, 1 }
 0x161   : > { %v5999_v16 = vadd.f32 %v5998_v11, %v5997_v18  ;;  %v6110_v37 = vpop.f32.mrb[3].mxu1  ;;  %v1403_v18 = vor.u32 %v1402_v40, %v1398_v31  ;;  %v1426_v11 = vshll.u32 %v8312_v10, 16 }
 0x162   : > { %v6111_v58 = vadd.f32 %v6110_v37, %v6109_v34  ;;  %v8296_v63 = vadd.f32 %v6108_v29, %v5996_v39  ;;  %v1424_v34 = vshrl.u32 %v8312_v10, 16 }
 0x163   : > { %v1408_v37 = vsel %vm1114_vm8, %v1403_v18, %v1407_v49 }
 0x164   : > { %v8299_v42 = vadd.f32 %v6111_v58, %v5999_v16  ;;  %2620 = vmatmul.mubr.bf16.gmra.mrb[108].mxu1 %v8156_v51  ;;  %v1428_v58 = vrot.slane %v1426_v11, 1 }
 0x165   : > { %2627 = vmatprep.mubr.bf16.mxu1 %v8235_v22  ;;  %2459 = vmatmul.mubr.bf16.gmra.mrb[108].mxu0 %v8164_v2 }
 0x166   : > { %2466 = vmatprep.mubr.bf16.mxu0 %v8200_v55 }
 0x167   : > { %v6112_v50 = vpop.f32.mrb[4].mxu1 }
 0x168   : > { %v6000_v6 = vpop.f32.mrb[4].mxu0  ;;  %v6113_v38 = vpop.f32.mrb[5].mxu1 }
 0x169   : > { %v6001_v54 = vpop.f32.mrb[5].mxu0  ;;  %v6114_v62 = vadd.f32 %v6113_v38, %v6112_v50  ;;  %v6115_v0 = vpop.f32.mrb[6].mxu1  ;;  %v1431_v50 = vshll.u32 %v8318_v30, 16 }
 0x16a   : > { %v6002_v24 = vadd.f32 %v6001_v54, %v6000_v6  ;;  %v6003_v45 = vpop.f32.mrb[6].mxu0  ;;  %v6116_v19 = vpop.f32.mrb[7].mxu1 }
 0x16b   : > { %v6004_v56 = vpop.f32.mrb[7].mxu0  ;;  %v6117_v5 = vadd.f32 %v6116_v19, %v6115_v0 }
 0x16c   : > { %v6005_v7 = vadd.f32 %v6004_v56, %v6003_v45  ;;  %v8308_v51 = vadd.f32 %v6114_v62, %v6002_v24  ;;  %2628 = vmatmul.mubr.bf16.gmra.mrb[112].mxu1 %v8190_v57  ;;  %v1429_v56 = vor.u32 %v1428_v58, %v1424_v34  ;;  %v7199_v34 = vld [vmem:[#allocation8] sm:$0xff]  }
 0x16d   : > { %2635 = vmatprep.mubr.bf16.mxu1 %v8253_v43  ;;  %2467 = vmatmul.mubr.bf16.gmra.mrb[112].mxu0 %v8211_v20 }
 0x16e   : > { %v8314_v9 = vadd.f32 %v6117_v5, %v6005_v7  ;;  %2474 = vmatprep.mubr.bf16.mxu0 %v8226_v14  ;;  %v1433_v5 = vrot.slane %v1431_v50, 1 }
 0x16f   : > { %v6118_v15 = vpop.f32.mrb[8].mxu1 }
 0x170   : > { %v6006_v2 = vpop.f32.mrb[8].mxu0  ;;  %v6119_v8 = vpop.f32.mrb[9].mxu1 }
 0x171   : > { %v6007_v35 = vpop.f32.mrb[9].mxu0  ;;  %v6120_v32 = vadd.f32 %v6119_v8, %v6118_v15  ;;  %v6121_v17 = vpop.f32.mrb[10].mxu1  ;;  %v1411_v15 = vrot.slane %v8303_v53, 1 }
 0x172   : > { %v6008_v47 = vadd.f32 %v6007_v35, %v6006_v2  ;;  %v6009_v12 = vpop.f32.mrb[10].mxu0  ;;  %v6122_v39 = vpop.f32.mrb[11].mxu1  ;;  %v1434_v2 = vsel %vm1114_vm8, %v1429_v56, %v1433_v5 }
 0x173   : > { %v6010_v28 = vpop.f32.mrb[11].mxu0  ;;  %v6123_v57 = vadd.f32 %v6122_v39, %v6121_v17 }
 0x174   : > { %v6011_v16 = vadd.f32 %v6010_v28, %v6009_v12  ;;  %v8323_v29 = vadd.f32 %v6120_v32, %v6008_v47  ;;  %2636 = vmatmul.mubr.bf16.gmra.mrb[116].mxu1 %v8218_v60  ;;  %v1410_v60 = vrot.slane %v8243_v41, 1 }
 0x175   : > { %2643 = vmatprep.mubr.bf16.mxu1 %v1408_v37  ;;  %2475 = vmatmul.mubr.bf16.gmra.mrb[116].mxu0 %v8235_v22 }
 0x176   : > { %v8328_v6 = vadd.f32 %v6123_v57, %v6011_v16  ;;  %2482 = vmatprep.mubr.bf16.mxu0 %v8249_v59  ;;  %v8342_v39 = vsel %vm1323_vm10, %v1410_v60, %v1411_v15 }
 0x177   : > { %v6124_v38 = vpop.f32.mrb[12].mxu1 }
 0x178   : > { %v6012_v20 = vpop.f32.mrb[12].mxu0  ;;  %v6125_v54 = vpop.f32.mrb[13].mxu1 }
 0x179   : > { %v6013_v62 = vpop.f32.mrb[13].mxu0  ;;  %v6126_v0 = vadd.f32 %v6125_v54, %v6124_v38  ;;  %v6127_v24 = vpop.f32.mrb[14].mxu1 }
 0x17a   : > { %v6014_v45 = vadd.f32 %v6013_v62, %v6012_v20  ;;  %v6015_v19 = vpop.f32.mrb[14].mxu0  ;;  %v6128_v25 = vpop.f32.mrb[15].mxu1 }
 0x17b   : > { %v6016_v7 = vpop.f32.mrb[15].mxu0  ;;  %v6129_v31 = vadd.f32 %v6128_v25, %v6127_v24 }
 0x17c   : > { %v6017_v40 = vadd.f32 %v6016_v7, %v6015_v19  ;;  %v8333_v21 = vadd.f32 %v6126_v0, %v6014_v45  ;;  %2644 = vmatmul.mubr.bf16.gmra.mrb[120].mxu1 %v8243_v41  ;;  %v7198_v41 = vld [vmem:[#allocation8 + $0x40] sm:$0xff]  }
 0x17d   : > { %2651 = vmatprep.mubr.bf16.mxu1 %v1434_v2  ;;  %2483 = vmatmul.mubr.bf16.gmra.mrb[120].mxu0 %v8253_v43 }
 0x17e   : > { %v8338_v8 = vadd.f32 %v6129_v31, %v6017_v40  ;;  %2490 = vmatprep.mubr.bf16.mxu0 %v8342_v39  ;;  %6450 = vmatprep.subr.bf16.mxu1 %v7198_v41 }
 0x17f   : > { %v6130_v35 = vpop.f32.mrb[16].mxu1  ;;  %6451 = vmatpush3.bf16.msra.mxu1 %v7199_v34 }
 0x180   : > { %v6018_v32 = vpop.f32.mrb[16].mxu0  ;;  %v6131_v22 = vpop.f32.mrb[17].mxu1 }
 0x181   : > { %v6019_v17 = vpop.f32.mrb[17].mxu0  ;;  %v6132_v47 = vadd.f32 %v6131_v22, %v6130_v35  ;;  %v6133_v12 = vpop.f32.mrb[18].mxu1 }
 0x182   : > { %v6020_v18 = vadd.f32 %v6019_v17, %v6018_v32  ;;  %v6021_v49 = vpop.f32.mrb[18].mxu0  ;;  %v6134_v11 = vpop.f32.mrb[19].mxu1 }
 0x183   : > { %v6022_v53 = vpop.f32.mrb[19].mxu0  ;;  %v6135_v28 = vadd.f32 %v6134_v11, %v6133_v12 }
 0x184   : > { %v6023_v57 = vadd.f32 %v6022_v53, %v6021_v49  ;;  %v8346_v16 = vadd.f32 %v6132_v47, %v6020_v18  ;;  %2652 = vmatmul.mubr.bf16.gmra.mrb[124].mxu1 %v8312_v10  ;;  %v7201_v49 = vld [vmem:[#allocation8 + $0x8] sm:$0xff]  }
 0x185   : > { %2491 = vmatmul.mubr.bf16.gmra.mrb[124].mxu0 %v1408_v37 }
 0x186   : > { %v8348_v58 = vadd.f32 %v6135_v28, %v6023_v57  ;;  %6938 = vmatprep.mubr.bf16.mxu0 %v7876_v1  ;;  %v7200_v1 = vld [vmem:[#allocation8 + $0x48] sm:$0xff]  }
 0x187   : > { %v6136_v50 = vpop.f32.mrb[20].mxu1  ;;  %6452 = vmatprep.subr.bf16.mxu1 %v7200_v1 }
 0x188   : > { %v6024_v38 = vpop.f32.mrb[20].mxu0  ;;  %v6137_v20 = vpop.f32.mrb[21].mxu1  ;;  %6453 = vmatpush3.bf16.msra.mxu1 %v7201_v49 }
 0x189   : > { %v6025_v54 = vpop.f32.mrb[21].mxu0  ;;  %v6138_v62 = vadd.f32 %v6137_v20, %v6136_v50  ;;  %v6139_v43 = vpop.f32.mrb[22].mxu1 }
 0x18a   : > { %v6026_v0 = vadd.f32 %v6025_v54, %v6024_v38  ;;  %v6027_v24 = vpop.f32.mrb[22].mxu0  ;;  %v6140_v45 = vpop.f32.mrb[23].mxu1 }
 0x18b   : > { %v6028_v19 = vpop.f32.mrb[23].mxu0  ;;  %v6141_v25 = vadd.f32 %v6140_v45, %v6139_v43 }
 0x18c   : > { %v6029_v56 = vadd.f32 %v6028_v19, %v6027_v24  ;;  %v8352_v5 = vadd.f32 %v6138_v62, %v6026_v0 }
 0x18d   : > { %6939 = vmatmul.mubr.bf16.vlgmr.msra.gmra.mrb[128].mxu0 %v7917_v46 }
 0x18e   : > { %v8354_v7 = vadd.f32 %v6141_v25, %v6029_v56  ;;  %6942 = vmatprep.mubr.bf16.mxu0 %v7949_v33 }
 0x18f   : > { %v6142_v31 = vpop.f32.mrb[24].mxu1 }
 0x190   : > { %v6030_v40 = vpop.f32.mrb[24].mxu0  ;;  %v6143_v60 = vpop.f32.mrb[25].mxu1 }
 0x191   : > { %v6031_v15 = vpop.f32.mrb[25].mxu0  ;;  %v6144_v2 = vadd.f32 %v6143_v60, %v6142_v31  ;;  %v6145_v35 = vpop.f32.mrb[26].mxu1 }
 0x192   : > { %v6032_v32 = vadd.f32 %v6031_v15, %v6030_v40  ;;  %v6033_v22 = vpop.f32.mrb[26].mxu0  ;;  %v6146_v17 = vpop.f32.mrb[27].mxu1 }
 0x193   : > { %v6034_v37 = vpop.f32.mrb[27].mxu0  ;;  %v6147_v47 = vadd.f32 %v6146_v17, %v6145_v35  ;;  %v7203_v17 = vld [vmem:[#allocation8 + $0x10] sm:$0xff]  }
 0x194   : > { %v6035_v12 = vadd.f32 %v6034_v37, %v6033_v22  ;;  %v8358_v18 = vadd.f32 %v6144_v2, %v6032_v32  ;;  %v7202_v32 = vld [vmem:[#allocation8 + $0x50] sm:$0xff]  }
 0x195   : > { %6943 = vmatmul.mubr.bf16.gmra.mrb[132].mxu0 %v7977_v13  ;;  %6454 = vmatprep.subr.bf16.mxu1 %v7202_v32 }
 0x196   : > { %v8360_v11 = vadd.f32 %v6147_v47, %v6035_v12  ;;  %6946 = vmatprep.mubr.bf16.mxu0 %v8006_v48  ;;  %6455 = vmatpush3.bf16.msra.mxu1 %v7203_v17 }
 0x197   : > { %v6148_v53 = vpop.f32.mrb[28].mxu1 }
 0x198   : > { %v6036_v28 = vpop.f32.mrb[28].mxu0  ;;  %v6149_v57 = vpop.f32.mrb[29].mxu1 }
 0x199   : > { %v6037_v41 = vpop.f32.mrb[29].mxu0  ;;  %v6150_v34 = vadd.f32 %v6149_v57, %v6148_v53  ;;  %v6151_v50 = vpop.f32.mrb[30].mxu1 }
 0x19a   : > { %v6038_v46 = vadd.f32 %v6037_v41, %v6036_v28  ;;  %v6039_v38 = vpop.f32.mrb[30].mxu0  ;;  %v6152_v20 = vpop.f32.mrb[31].mxu1 }
 0x19b   : > { %v6040_v33 = vpop.f32.mrb[31].mxu0  ;;  %v6153_v54 = vadd.f32 %v6152_v20, %v6151_v50 }
 0x19c   : > { %v6041_v62 = vadd.f32 %v6040_v33, %v6039_v38  ;;  %v8364_v43 = vadd.f32 %v6150_v34, %v6038_v46 }
 0x19d   : > { %6947 = vmatmul.mubr.bf16.gmra.mrb[136].mxu0 %v8043_v3 }
 0x19e   : > { %v8366_v0 = vadd.f32 %v6153_v54, %v6041_v62  ;;  %6950 = vmatprep.mubr.bf16.mxu0 %v8078_v36 }
 0x19f   : > { %v6154_v24 = vpop.f32.mrb[32].mxu1 }
 0x1a0   : > { %v6042_v45 = vpop.f32.mrb[32].mxu0  ;;  %v6155_v19 = vpop.f32.mrb[33].mxu1 }
 0x1a1   : > { %v6043_v25 = vpop.f32.mrb[33].mxu0  ;;  %v6156_v56 = vadd.f32 %v6155_v19, %v6154_v24  ;;  %v6157_v31 = vpop.f32.mrb[34].mxu1 }
 0x1a2   : > { %v6044_v40 = vadd.f32 %v6043_v25, %v6042_v45  ;;  %v6045_v60 = vpop.f32.mrb[34].mxu0  ;;  %v6158_v15 = vpop.f32.mrb[35].mxu1 }
 0x1a3   : > { %v6046_v13 = vpop.f32.mrb[35].mxu0  ;;  %v6159_v2 = vadd.f32 %v6158_v15, %v6157_v31  ;;  %v7205_v15 = vld [vmem:[#allocation8 + $0x18] sm:$0xff]  }
 0x1a4   : > { %v8369_v35 = vadd.f32 %v6156_v56, %v6044_v40  ;;  %v6047_v48 = vadd.f32 %v6046_v13, %v6045_v60 }
 0x1a5   : > { %6951 = vmatmul.mubr.bf16.gmra.mrb[140].mxu0 %v8107_v23 }
 0x1a6   : > { %v8372_v22 = vadd.f32 %v6159_v2, %v6047_v48  ;;  %6954 = vmatprep.mubr.bf16.mxu0 %v8133_v4  ;;  %v7204_v4 = vld [vmem:[#allocation8 + $0x58] sm:$0xff]  }
 0x1a7   : > { %v6160_v37 = vpop.f32.mrb[36].mxu1  ;;  %6456 = vmatprep.subr.bf16.mxu1 %v7204_v4 }
 0x1a8   : > { %v6048_v47 = vpop.f32.mrb[36].mxu0  ;;  %v6161_v12 = vpop.f32.mrb[37].mxu1  ;;  %6457 = vmatpush3.bf16.msra.mxu1 %v7205_v15 }
 0x1a9   : > { %v6049_v1 = vpop.f32.mrb[37].mxu0  ;;  %v6162_v49 = vadd.f32 %v6161_v12, %v6160_v37  ;;  %v6163_v53 = vpop.f32.mrb[38].mxu1 }
 0x1aa   : > { %v6050_v3 = vadd.f32 %v6049_v1, %v6048_v47  ;;  %v6051_v28 = vpop.f32.mrb[38].mxu0  ;;  %v6164_v57 = vpop.f32.mrb[39].mxu1 }
 0x1ab   : > { %v6052_v41 = vpop.f32.mrb[39].mxu0  ;;  %v6165_v34 = vadd.f32 %v6164_v57, %v6163_v53 }
 0x1ac   : > { %v8375_v36 = vadd.f32 %v6162_v49, %v6050_v3  ;;  %v6053_v50 = vadd.f32 %v6052_v41, %v6051_v28 }
 0x1ad   : > { %6955 = vmatmul.mubr.bf16.gmra.mrb[144].mxu0 %v8154_v44 }
 0x1ae   : > { %v8378_v46 = vadd.f32 %v6165_v34, %v6053_v50  ;;  %6958 = vmatprep.mubr.bf16.mxu0 %v8181_v27 }
 0x1af   : > { %v6166_v38 = vpop.f32.mrb[40].mxu1 }
 0x1b0   : > { %v6054_v20 = vpop.f32.mrb[40].mxu0  ;;  %v6167_v33 = vpop.f32.mrb[41].mxu1 }
 0x1b1   : > { %v6055_v54 = vpop.f32.mrb[41].mxu0  ;;  %v6168_v62 = vadd.f32 %v6167_v33, %v6166_v38  ;;  %v6169_v24 = vpop.f32.mrb[42].mxu1 }
 0x1b2   : > { %v6056_v45 = vadd.f32 %v6055_v54, %v6054_v20  ;;  %v6057_v19 = vpop.f32.mrb[42].mxu0  ;;  %v6170_v25 = vpop.f32.mrb[43].mxu1 }
 0x1b3   : > { %v6058_v23 = vpop.f32.mrb[43].mxu0  ;;  %v6171_v56 = vadd.f32 %v6170_v25, %v6169_v24  ;;  %v7206_v25 = vld [vmem:[#allocation8 + $0x60] sm:$0xff]  }
 0x1b4   : > { %v8381_v31 = vadd.f32 %v6168_v62, %v6056_v45  ;;  %v6059_v40 = vadd.f32 %v6058_v23, %v6057_v19  ;;  %v1437_v19 = vrot.slane %v8318_v30, 1  ;;  %6458 = vmatprep.subr.bf16.mxu1 %v7206_v25 }
 0x1b5   : > { %6959 = vmatmul.mubr.bf16.gmra.mrb[148].mxu0 %v8200_v55 }
 0x1b6   : > { %v8384_v60 = vadd.f32 %v6171_v56, %v6059_v40  ;;  %6962 = vmatprep.mubr.bf16.mxu0 %v8226_v14  ;;  %v1436_v14 = vrot.slane %v8312_v10, 1  ;;  %v7207_v56 = vld [vmem:[#allocation8 + $0x20] sm:$0xff]  }
 0x1b7   : > { %v6172_v13 = vpop.f32.mrb[44].mxu1  ;;  %6459 = vmatpush3.bf16.msra.mxu1 %v7207_v56 }
 0x1b8   : > { %v6060_v2 = vpop.f32.mrb[44].mxu0  ;;  %v6173_v48 = vpop.f32.mrb[45].mxu1  ;;  %v1438_v4 = vsel %vm1323_vm10, %v1436_v14, %v1437_v19 }
 0x1b9   : > { %v6061_v32 = vpop.f32.mrb[45].mxu0  ;;  %v6174_v17 = vadd.f32 %v6173_v48, %v6172_v13  ;;  %v6175_v37 = vpop.f32.mrb[46].mxu1 }
 0x1ba   : > { %v6062_v44 = vadd.f32 %v6061_v32, %v6060_v2  ;;  %v6063_v47 = vpop.f32.mrb[46].mxu0  ;;  %v6176_v12 = vpop.f32.mrb[47].mxu1 }
 0x1bb   : > { %v6064_v1 = vpop.f32.mrb[47].mxu0  ;;  %v6177_v49 = vadd.f32 %v6176_v12, %v6175_v37 }
 0x1bc   : > { %v8387_v27 = vadd.f32 %v6174_v17, %v6062_v44  ;;  %v6065_v53 = vadd.f32 %v6064_v1, %v6063_v47 }
 0x1bd   : > { %6963 = vmatmul.mubr.bf16.gmra.mrb[152].mxu0 %v8249_v59 }
 0x1be   : > { %v8390_v3 = vadd.f32 %v6177_v49, %v6065_v53  ;;  %6966 = vmatprep.mubr.bf16.mxu0 %v8342_v39 }
 0x1bf   : > { %v6178_v28 = vpop.f32.mrb[48].mxu1 }
 0x1c0   : > { %v6066_v57 = vpop.f32.mrb[48].mxu0  ;;  %v6179_v41 = vpop.f32.mrb[49].mxu1 }
 0x1c1   : > { %v6067_v34 = vpop.f32.mrb[49].mxu0  ;;  %v6180_v50 = vadd.f32 %v6179_v41, %v6178_v28  ;;  %v6181_v38 = vpop.f32.mrb[50].mxu1 }
 0x1c2   : > { %v6068_v20 = vadd.f32 %v6067_v34, %v6066_v57  ;;  %v6069_v33 = vpop.f32.mrb[50].mxu0  ;;  %v6182_v54 = vpop.f32.mrb[51].mxu1 }
 0x1c3   : > { %v6070_v55 = vpop.f32.mrb[51].mxu0  ;;  %v6183_v62 = vadd.f32 %v6182_v54, %v6181_v38 }
 0x1c4   : > { %v8393_v24 = vadd.f32 %v6180_v50, %v6068_v20  ;;  %v6071_v45 = vadd.f32 %v6070_v55, %v6069_v33  ;;  %v7208_v20 = vld [vmem:[#allocation8 + $0x68] sm:$0xff]  }
 0x1c5   : > { %6967 = vmatmul.mubr.bf16.gmra.mrb[156].mxu0 %v1438_v4  ;;  %6460 = vmatprep.subr.bf16.mxu1 %v7208_v20 }
 0x1c6   : > { %v8398_v23 = vadd.f32 %v6183_v62, %v6071_v45  ;;  %v7209_v62 = vld [vmem:[#allocation8 + $0x28] sm:$0xff]  }
 0x1c7   : > { %v6184_v40 = vpop.f32.mrb[52].mxu1  ;;  %6461 = vmatpush3.bf16.msra.mxu1 %v7209_v62 }
 0x1c8   : > { %v6072_v59 = vpop.f32.mrb[52].mxu0  ;;  %v6185_v15 = vpop.f32.mrb[53].mxu1 }
 0x1c9   : > { %v6073_v13 = vpop.f32.mrb[53].mxu0  ;;  %v6186_v2 = vadd.f32 %v6185_v15, %v6184_v40  ;;  %v6187_v48 = vpop.f32.mrb[54].mxu1 }
 0x1ca   : > { %v6074_v32 = vadd.f32 %v6073_v13, %v6072_v59  ;;  %v6075_v39 = vpop.f32.mrb[54].mxu0  ;;  %v6188_v17 = vpop.f32.mrb[55].mxu1 }
 0x1cb   : > { %v6076_v10 = vpop.f32.mrb[55].mxu0  ;;  %v6189_v30 = vadd.f32 %v6188_v17, %v6187_v48 }
 0x1cc   : > { %v8401_v37 = vadd.f32 %v6186_v2, %v6074_v32  ;;  %v6077_v44 = vadd.f32 %v6076_v10, %v6075_v39  ;;  %v7212_v10 = vld [vmem:[#allocation8 + $0xc0] sm:$0xff]  }
 0x1cd   : > { %6562 = vmatprep.subr.bf16.mxu0 %v7212_v10 }
 0x1ce   : > { %v8403_v47 = vadd.f32 %v6189_v30, %v6077_v44 }
 0x1cf   : > { %v6190_v12 = vpop.f32.mrb[56].mxu1 }
 0x1d0   : > { %v6191_v1 = vpop.f32.mrb[57].mxu1  ;;  %v6078_v28 = vpop.f32.mrb[56].mxu0 }
 0x1d1   : > { %v6192_v49 = vadd.f32 %v6191_v1, %v6190_v12  ;;  %v6193_v53 = vpop.f32.mrb[58].mxu1  ;;  %v6079_v41 = vpop.f32.mrb[57].mxu0  ;;  %v7210_v12 = vld [vmem:[#allocation8 + $0x70] sm:$0xff]   ;;  %v7213_v1 = vld [vmem:[#allocation8 + $0x80] sm:$0xff]  }
 0x1d2   : > { %v6194_v57 = vpop.f32.mrb[59].mxu1  ;;  %v6080_v50 = vadd.f32 %v6079_v41, %v6078_v28  ;;  %v6081_v38 = vpop.f32.mrb[58].mxu0  ;;  %6462 = vmatprep.subr.bf16.mxu1 %v7210_v12  ;;  %6563 = vmatpush3.bf16.msra.mxu0 %v7213_v1 }
 0x1d3   : > { %v6195_v34 = vadd.f32 %v6194_v57, %v6193_v53  ;;  %v6082_v33 = vpop.f32.mrb[59].mxu0 }
 0x1d4   : > { %v8405_v54 = vadd.f32 %v6192_v49, %v6080_v50  ;;  %v6083_v55 = vadd.f32 %v6082_v33, %v6081_v38  ;;  %v7214_v50 = vld [vmem:[#allocation8 + $0xc8] sm:$0xff]  }
 0x1d5   : > { %v7215_v33 = vld [vmem:[#allocation8 + $0x88] sm:$0xff]   ;;  %6564 = vmatprep.subr.bf16.mxu0 %v7214_v50 }
 0x1d6   : > { %v8407_v45 = vadd.f32 %v6195_v34, %v6083_v55  ;;  %6565 = vmatpush3.bf16.msra.mxu0 %v7215_v33 }
 0x1d7   : > { %v6196_v14 = vpop.f32.mrb[60].mxu1 }
 0x1d8   : > { %v6197_v19 = vpop.f32.mrb[61].mxu1  ;;  %v6084_v40 = vpop.f32.mrb[60].mxu0 }
 0x1d9   : > { %v6198_v25 = vadd.f32 %v6197_v19, %v6196_v14  ;;  %v6199_v56 = vpop.f32.mrb[62].mxu1  ;;  %v6085_v59 = vpop.f32.mrb[61].mxu0 }
 0x1da   : > { %v6200_v4 = vpop.f32.mrb[63].mxu1  ;;  %v6086_v13 = vadd.f32 %v6085_v59, %v6084_v40  ;;  %v6087_v2 = vpop.f32.mrb[62].mxu0  ;;  %v7217_v59 = vld [vmem:[#allocation8 + $0x90] sm:$0xff]  }
 0x1db   : > { %v6201_v15 = vadd.f32 %v6200_v4, %v6199_v56  ;;  %v6088_v48 = vpop.f32.mrb[63].mxu0 }
 0x1dc   : > { %v8409_v32 = vadd.f32 %v6198_v25, %v6086_v13  ;;  %v6089_v39 = vadd.f32 %v6088_v48, %v6087_v2  ;;  %v7216_v25 = vld [vmem:[#allocation8 + $0xd0] sm:$0xff]  }
 0x1dd   : > { %6566 = vmatprep.subr.bf16.mxu0 %v7216_v25 }
 0x1de   : > { %v8411_v30 = vadd.f32 %v6201_v15, %v6089_v39  ;;  %6567 = vmatpush3.bf16.msra.mxu0 %v7217_v59 }
 0x1df   : > { %v6330_v17 = vpop.f32.mrb[64].mxu1 }
 0x1e0   : > { %v6331_v44 = vpop.f32.mrb[65].mxu1  ;;  %v6218_v28 = vpop.f32.mrb[64].mxu0 }
 0x1e1   : > { %v6332_v49 = vadd.f32 %v6331_v44, %v6330_v17  ;;  %v6333_v53 = vpop.f32.mrb[66].mxu1  ;;  %v6219_v41 = vpop.f32.mrb[65].mxu0 }
 0x1e2   : > { %v6334_v57 = vpop.f32.mrb[67].mxu1  ;;  %v6220_v38 = vadd.f32 %v6219_v41, %v6218_v28  ;;  %v6221_v20 = vpop.f32.mrb[66].mxu0 }
 0x1e3   : > { %v6335_v34 = vadd.f32 %v6334_v57, %v6333_v53  ;;  %v6222_v55 = vpop.f32.mrb[67].mxu0 }
 0x1e4   : > { %v2373_v62 = vadd.f32 %v6220_v38, %v8296_v63  ;;  %v6223_v14 = vadd.f32 %v6222_v55, %v6221_v20 }
 0x1e6   : > { %v2376_v56 = vadd.f32 %v6223_v14, %v8299_v42  ;;  %v8415_v4 = vadd.f32 %v6332_v49, %v2373_v62 }
 0x1e7   : > { %v6336_v19 = vpop.f32.mrb[68].mxu1 }
 0x1e8   : > { %v6337_v40 = vpop.f32.mrb[69].mxu1  ;;  %v6224_v2 = vpop.f32.mrb[68].mxu0  ;;  %v8417_v39 = vadd.f32 %v6335_v34, %v2376_v56 }
 0x1e9   : > { %v6338_v15 = vadd.f32 %v6337_v40, %v6336_v19  ;;  %v6339_v13 = vpop.f32.mrb[70].mxu1  ;;  %v6225_v17 = vpop.f32.mrb[69].mxu0  ;;  %v7211_v19 = vld [vmem:[#allocation8 + $0x30] sm:$0xff]  }
 0x1ea   : > { %v6340_v48 = vpop.f32.mrb[71].mxu1  ;;  %v6226_v10 = vadd.f32 %v6225_v17, %v6224_v2  ;;  %v6227_v44 = vpop.f32.mrb[70].mxu0  ;;  %6463 = vmatpush3.bf16.msra.mxu1 %v7211_v19 }
 0x1eb   : > { %v6341_v63 = vadd.f32 %v6340_v48, %v6339_v13  ;;  %v6228_v12 = vpop.f32.mrb[71].mxu0 }
 0x1ec   : > { %v2381_v1 = vadd.f32 %v6226_v10, %v8308_v51  ;;  %v6229_v42 = vadd.f32 %v6228_v12, %v6227_v44  ;;  %v7218_v51 = vld [vmem:[#allocation8 + $0xd8] sm:$0xff]  }
 0x1ed   : > { %6568 = vmatprep.subr.bf16.mxu0 %v7218_v51  ;;  %v7226_v51 = vld [vmem:[#allocation8 + $0xf0] sm:$0xff]  }
 0x1ee   : > { %v2384_v49 = vadd.f32 %v6229_v42, %v8314_v9  ;;  %v8421_v57 = vadd.f32 %v6338_v15, %v2381_v1  ;;  %v7219_v9 = vld [vmem:[#allocation8 + $0x98] sm:$0xff]   ;;  %v7223_v1 = vld [vmem:[#allocation8 + $0xa0] sm:$0xff]  }
 0x1ef   : > { %v6342_v53 = vpop.f32.mrb[72].mxu1  ;;  %6569 = vmatpush3.bf16.msra.mxu0 %v7219_v9 }
 0x1f0   : > { %v6343_v28 = vpop.f32.mrb[73].mxu1  ;;  %v6230_v38 = vpop.f32.mrb[72].mxu0  ;;  %v8423_v20 = vadd.f32 %v6341_v63, %v2384_v49  ;;  %v7222_v63 = vld [vmem:[#allocation8 + $0xe0] sm:$0xff]  }
 0x1f1   : > { %v6344_v41 = vadd.f32 %v6343_v28, %v6342_v53  ;;  %v6345_v50 = vpop.f32.mrb[74].mxu1  ;;  %v6231_v33 = vpop.f32.mrb[73].mxu0  ;;  %6570 = vmatprep.subr.bf16.mxu0 %v7222_v63 }
 0x1f2   : > { %v6346_v34 = vpop.f32.mrb[75].mxu1  ;;  %v6232_v62 = vadd.f32 %v6231_v33, %v6230_v38  ;;  %v6233_v14 = vpop.f32.mrb[74].mxu0  ;;  %v7225_v38 = vld [vmem:[#allocation8 + $0xa8] sm:$0xff]  }
 0x1f3   : > { %v6347_v55 = vadd.f32 %v6346_v34, %v6345_v50  ;;  %v6234_v25 = vpop.f32.mrb[75].mxu0  ;;  %6571 = vmatpush3.bf16.msra.mxu0 %v7223_v1 }
 0x1f4   : > { %v2389_v56 = vadd.f32 %v6232_v62, %v8323_v29  ;;  %v6235_v40 = vadd.f32 %v6234_v25, %v6233_v14  ;;  %v7220_v25 = vld [vmem:[#allocation8 + $0x78] sm:$0xff]  }
 0x1f5   : > { %6464 = vmatprep.subr.bf16.mxu1 %v7220_v25  ;;  %v7230_v25 = vld [vmem:[#allocation8 + $0xf8] sm:$0xff]  }
 0x1f6   : > { %v2392_v15 = vadd.f32 %v6235_v40, %v8328_v6  ;;  %v8427_v2 = vadd.f32 %v6344_v41, %v2389_v56  ;;  %v7224_v6 = vld [vmem:[#allocation8 + $0xe8] sm:$0xff]  }
 0x1f7   : > { %v6348_v59 = vpop.f32.mrb[76].mxu1  ;;  %6572 = vmatprep.subr.bf16.mxu0 %v7224_v6  ;;  %v7228_v56 = vld [vmem:[#allocation2] sm:$0xff]  }
 0x1f8   : > { %v6349_v13 = vpop.f32.mrb[77].mxu1  ;;  %v6236_v10 = vpop.f32.mrb[76].mxu0  ;;  %v8429_v12 = vadd.f32 %v6347_v55, %v2392_v15  ;;  %6573 = vmatpush3.bf16.msra.mxu0 %v7225_v38  ;;  %v7227_v15 = vld [vmem:[#allocation8 + $0xb0] sm:$0xff]   ;;  %v3660_v63 = vshll.u32 %v7228_v56, 16  ;;  %v3658_v1 = vshrl.u32 %v7228_v56, 16 }
 0x1f9   : > { %v6350_v48 = vadd.f32 %v6349_v13, %v6348_v59  ;;  %v6351_v17 = vpop.f32.mrb[78].mxu1  ;;  %v6237_v29 = vpop.f32.mrb[77].mxu0  ;;  %6574 = vmatprep.subr.bf16.mxu0 %v7226_v51 }
 0x1fa   : > { %v6352_v44 = vpop.f32.mrb[79].mxu1  ;;  %v6238_v53 = vadd.f32 %v6237_v29, %v6236_v10  ;;  %v6239_v49 = vpop.f32.mrb[78].mxu0  ;;  %v3662_v29 = vrot.slane %v3660_v63, 1 }
 0x1fb   : > { %v6353_v42 = vadd.f32 %v6352_v44, %v6351_v17  ;;  %v6240_v28 = vpop.f32.mrb[79].mxu0 }
 0x1fc   : > { %v2397_v41 = vadd.f32 %v6238_v53, %v8333_v21  ;;  %v6241_v50 = vadd.f32 %v6240_v28, %v6239_v49  ;;  %v7221_v21 = vld [vmem:[#allocation8 + $0x38] sm:$0xff]   ;;  %6575 = vmatpush3.bf16.msra.mxu0 %v7227_v15  ;;  %v3663_v6 = vor.u32 %v3662_v29, %v3658_v1 }
 0x1fd   : > { %6465 = vmatpush3.bf16.msra.mxu1 %v7221_v21  ;;  %6576 = vmatprep.subr.bf16.mxu0 %v7230_v25 }
 0x1fe   : > { %v2400_v33 = vadd.f32 %v6241_v50, %v8338_v8  ;;  %v8433_v55 = vadd.f32 %v6350_v48, %v2397_v41  ;;  %v7229_v8 = vld [vmem:[#allocation2 + $0x8] ss:$0 sps:$4 sm:$0x11]  }
 0x1ff   : > { %v6354_v34 = vpop.f32.mrb[80].mxu1  ;;  %v3665_v53 = vshll.u32 %v7229_v8, 16  ;;  %v3866_v63 = vrot.slane %v7229_v8, 1 }
 0x200   : > { %v6355_v62 = vpop.f32.mrb[81].mxu1  ;;  %v6242_v40 = vpop.f32.mrb[80].mxu0  ;;  %v8435_v59 = vadd.f32 %v6353_v42, %v2400_v33 }
 0x201   : > { %v6356_v14 = vadd.f32 %v6355_v62, %v6354_v34  ;;  %v6357_v19 = vpop.f32.mrb[82].mxu1  ;;  %v6243_v13 = vpop.f32.mrb[81].mxu0  ;;  %v3667_v41 = vrot.slane %v3665_v53, 1 }
 0x202   : > { %v6358_v9 = vpop.f32.mrb[83].mxu1  ;;  %v6244_v48 = vadd.f32 %v6243_v13, %v6242_v40  ;;  %v6245_v10 = vpop.f32.mrb[82].mxu0 }
 0x203   : > { %v6359_v17 = vadd.f32 %v6358_v9, %v6357_v19  ;;  %v6246_v44 = vpop.f32.mrb[83].mxu0  ;;  %v3668_v19 = vsel %vm1114_vm8, %v3663_v6, %v3667_v41 }
 0x204   : > { %v2405_v49 = vadd.f32 %v6244_v48, %v8346_v16  ;;  %v6247_v42 = vadd.f32 %v6246_v44, %v6245_v10  ;;  %4589 = vmatprep.mubr.bf16.mxu1 %v3668_v19  ;;  %v7231_v16 = vld [vmem:[#allocation8 + $0xb8] sm:$0xff]  }
 0x205   : > { %4590 = vmatmul.mubr.bf16.vlgmr.msra.gmra.mrb[128].mxu1 %v7228_v56  ;;  %6577 = vmatpush3.bf16.msra.mxu0 %v7231_v16 }
 0x206   : > { %v2408_v50 = vadd.f32 %v6247_v42, %v8348_v58  ;;  %v8439_v34 = vadd.f32 %v6356_v14, %v2405_v49  ;;  %v3865_v14 = vrot.slane %v7228_v56, 1 }
 0x207   : > { %v6360_v28 = vpop.f32.mrb[84].mxu1 }
 0x208   : > { %v6361_v38 = vpop.f32.mrb[85].mxu1  ;;  %v6248_v51 = vpop.f32.mrb[84].mxu0  ;;  %v8442_v9 = vadd.f32 %v6359_v17, %v2408_v50  ;;  %v8446_v1 = vsel %vm1323_vm10, %v3865_v14, %v3866_v63 }
 0x209   : > { %v6362_v33 = vadd.f32 %v6361_v38, %v6360_v28  ;;  %v6363_v62 = vpop.f32.mrb[86].mxu1  ;;  %v6249_v21 = vpop.f32.mrb[85].mxu0 }
 0x20a   : > { %v6364_v40 = vpop.f32.mrb[87].mxu1  ;;  %v6250_v13 = vadd.f32 %v6249_v21, %v6248_v51  ;;  %v6251_v58 = vpop.f32.mrb[86].mxu0 }
 0x20b   : > { %v6365_v15 = vadd.f32 %v6364_v40, %v6363_v62  ;;  %v6252_v48 = vpop.f32.mrb[87].mxu0 }
 0x20c   : > { %v2413_v10 = vadd.f32 %v6250_v13, %v8352_v5  ;;  %v6253_v44 = vadd.f32 %v6252_v48, %v6251_v58 }
 0x20e   : > { %v2416_v29 = vadd.f32 %v6253_v44, %v8354_v7  ;;  %v8449_v49 = vadd.f32 %v6362_v33, %v2413_v10 }
 0x20f   : > { %v6366_v17 = vpop.f32.mrb[88].mxu1 }
 0x210   : > { %v6367_v53 = vpop.f32.mrb[89].mxu1  ;;  %v6254_v6 = vpop.f32.mrb[88].mxu0  ;;  %v8451_v50 = vadd.f32 %v6365_v15, %v2416_v29 }
 0x211   : > { %v6368_v42 = vadd.f32 %v6367_v53, %v6366_v17  ;;  %v6369_v28 = vpop.f32.mrb[90].mxu1  ;;  %v6255_v56 = vpop.f32.mrb[89].mxu0  ;;  %v7233_v17 = vld [vmem:[#allocation8 + $0x140] sm:$0xff]  }
 0x212   : > { %v6370_v41 = vpop.f32.mrb[91].mxu1  ;;  %v6256_v38 = vadd.f32 %v6255_v56, %v6254_v6  ;;  %v6257_v5 = vpop.f32.mrb[90].mxu0  ;;  %6674 = vmatprep.subr.bf16.mxu1 %v7233_v17 }
 0x213   : > { %v6371_v8 = vadd.f32 %v6370_v41, %v6369_v28  ;;  %v6258_v62 = vpop.f32.mrb[91].mxu0 }
 0x214   : > { %v2421_v19 = vadd.f32 %v6256_v38, %v8358_v18  ;;  %v6259_v25 = vadd.f32 %v6258_v62, %v6257_v5 }
 0x216   : > { %v2424_v7 = vadd.f32 %v6259_v25, %v8360_v11  ;;  %v8455_v33 = vadd.f32 %v6368_v42, %v2421_v19  ;;  %v7234_v11 = vld [vmem:[#allocation8 + $0x100] sm:$0xff]  }
 0x217   : > { %v6372_v51 = vpop.f32.mrb[92].mxu1  ;;  %6675 = vmatpush3.bf16.msra.mxu1 %v7234_v11 }
 0x218   : > { %v6373_v40 = vpop.f32.mrb[93].mxu1  ;;  %v6260_v13 = vpop.f32.mrb[92].mxu0  ;;  %v8457_v15 = vadd.f32 %v6371_v8, %v2424_v7 }
 0x219   : > { %v6374_v16 = vadd.f32 %v6373_v40, %v6372_v51  ;;  %v6375_v21 = vpop.f32.mrb[94].mxu1  ;;  %v6261_v14 = vpop.f32.mrb[93].mxu0 }
 0x21a   : > { %v6376_v58 = vpop.f32.mrb[95].mxu1  ;;  %v6262_v48 = vadd.f32 %v6261_v14, %v6260_v13  ;;  %v6263_v10 = vpop.f32.mrb[94].mxu0 }
 0x21b   : > { %v6377_v63 = vadd.f32 %v6376_v58, %v6375_v21  ;;  %v6264_v44 = vpop.f32.mrb[95].mxu0 }
 0x21c   : > { %v2429_v18 = vadd.f32 %v6262_v48, %v8364_v43  ;;  %v6265_v29 = vadd.f32 %v6264_v44, %v6263_v10 }
 0x21e   : > { %v2432_v42 = vadd.f32 %v6265_v29, %v8366_v0  ;;  %v8461_v6 = vadd.f32 %v6374_v16, %v2429_v18 }
 0x21f   : > { %v6378_v53 = vpop.f32.mrb[96].mxu1 }
 0x220   : > { %v6379_v28 = vpop.f32.mrb[97].mxu1  ;;  %v6266_v8 = vpop.f32.mrb[96].mxu0  ;;  %v8463_v5 = vadd.f32 %v6377_v63, %v2432_v42 }
 0x221   : > { %v6380_v41 = vadd.f32 %v6379_v28, %v6378_v53  ;;  %v6381_v56 = vpop.f32.mrb[98].mxu1  ;;  %v6267_v62 = vpop.f32.mrb[97].mxu0 }
 0x222   : > { %v6382_v38 = vpop.f32.mrb[99].mxu1  ;;  %v6268_v25 = vadd.f32 %v6267_v62, %v6266_v8  ;;  %v6269_v43 = vpop.f32.mrb[98].mxu0 }
 0x223   : > { %v6383_v19 = vadd.f32 %v6382_v38, %v6381_v56  ;;  %v6270_v51 = vpop.f32.mrb[99].mxu0 }
 0x224   : > { %v2437_v7 = vadd.f32 %v6268_v25, %v8369_v35  ;;  %v6271_v40 = vadd.f32 %v6270_v51, %v6269_v43 }
 0x226   : > { %v2440_v0 = vadd.f32 %v6271_v40, %v8372_v22  ;;  %v8467_v13 = vadd.f32 %v6380_v41, %v2437_v7 }
 0x227   : > { %v6384_v21 = vpop.f32.mrb[100].mxu1 }
 0x228   : > { %v6385_v16 = vpop.f32.mrb[101].mxu1  ;;  %v6272_v48 = vpop.f32.mrb[100].mxu0  ;;  %v8469_v63 = vadd.f32 %v6383_v19, %v2440_v0 }
 0x229   : > { %v6386_v58 = vadd.f32 %v6385_v16, %v6384_v21  ;;  %v6387_v14 = vpop.f32.mrb[102].mxu1  ;;  %v6273_v44 = vpop.f32.mrb[101].mxu0  ;;  %v7239_v16 = vld [vmem:[#allocation8 + $0x148] sm:$0xff]  }
 0x22a   : > { %v6388_v10 = vpop.f32.mrb[103].mxu1  ;;  %v6274_v18 = vadd.f32 %v6273_v44, %v6272_v48  ;;  %v6275_v29 = vpop.f32.mrb[102].mxu0  ;;  %6676 = vmatprep.subr.bf16.mxu1 %v7239_v16 }
 0x22b   : > { %v6389_v17 = vadd.f32 %v6388_v10, %v6387_v14  ;;  %v6276_v53 = vpop.f32.mrb[103].mxu0 }
 0x22c   : > { %v2445_v35 = vadd.f32 %v6274_v18, %v8375_v36  ;;  %v6277_v11 = vadd.f32 %v6276_v53, %v6275_v29  ;;  %v7241_v29 = vld [vmem:[#allocation8 + $0x108] sm:$0xff]  }
 0x22d   : > { %6677 = vmatpush3.bf16.msra.mxu1 %v7241_v29 }
 0x22e   : > { %v2448_v22 = vadd.f32 %v6277_v11, %v8378_v46  ;;  %v8473_v41 = vadd.f32 %v6386_v58, %v2445_v35 }
 0x22f   : > { %v6390_v42 = vpop.f32.mrb[104].mxu1 }
 0x230   : > { %v6391_v28 = vpop.f32.mrb[105].mxu1  ;;  %v6278_v38 = vpop.f32.mrb[104].mxu0  ;;  %v8475_v19 = vadd.f32 %v6389_v17, %v2448_v22 }
 0x231   : > { %v6392_v56 = vadd.f32 %v6391_v28, %v6390_v42  ;;  %v6393_v8 = vpop.f32.mrb[106].mxu1  ;;  %v6279_v25 = vpop.f32.mrb[105].mxu0 }
 0x232   : > { %v6394_v62 = vpop.f32.mrb[107].mxu1  ;;  %v6280_v51 = vadd.f32 %v6279_v25, %v6278_v38  ;;  %v6281_v7 = vpop.f32.mrb[106].mxu0 }
 0x233   : > { %v6395_v43 = vadd.f32 %v6394_v62, %v6393_v8  ;;  %v6282_v40 = vpop.f32.mrb[107].mxu0 }
 0x234   : > { %v2453_v36 = vadd.f32 %v6280_v51, %v8381_v31  ;;  %v6283_v21 = vadd.f32 %v6282_v40, %v6281_v7 }
 0x236   : > { %v2456_v46 = vadd.f32 %v6283_v21, %v8384_v60  ;;  %v8479_v14 = vadd.f32 %v6392_v56, %v2453_v36 }
 0x237   : > { %v6396_v0 = vpop.f32.mrb[108].mxu1 }
 0x238   : > { %v6397_v58 = vpop.f32.mrb[109].mxu1  ;;  %v6284_v44 = vpop.f32.mrb[108].mxu0  ;;  %v8481_v18 = vadd.f32 %v6395_v43, %v2456_v46 }
 0x239   : > { %v6398_v48 = vadd.f32 %v6397_v58, %v6396_v0  ;;  %v6399_v10 = vpop.f32.mrb[110].mxu1  ;;  %v6285_v53 = vpop.f32.mrb[109].mxu0 }
 0x23a   : > { %v6400_v17 = vpop.f32.mrb[111].mxu1  ;;  %v6286_v11 = vadd.f32 %v6285_v53, %v6284_v44  ;;  %v6287_v31 = vpop.f32.mrb[110].mxu0 }
 0x23b   : > { %v6401_v35 = vadd.f32 %v6400_v17, %v6399_v10  ;;  %v6288_v42 = vpop.f32.mrb[111].mxu0 }
 0x23c   : > { %v2461_v22 = vadd.f32 %v6286_v11, %v8387_v27  ;;  %v6289_v60 = vadd.f32 %v6288_v42, %v6287_v31 }
 0x23e   : > { %v2464_v56 = vadd.f32 %v6289_v60, %v8390_v3  ;;  %v8485_v38 = vadd.f32 %v6398_v48, %v2461_v22 }
 0x23f   : > { %v6402_v28 = vpop.f32.mrb[112].mxu1 }
 0x240   : > { %v6403_v8 = vpop.f32.mrb[113].mxu1  ;;  %v6290_v43 = vpop.f32.mrb[112].mxu0  ;;  %v8487_v7 = vadd.f32 %v6401_v35, %v2464_v56 }
 0x241   : > { %v6404_v62 = vadd.f32 %v6403_v8, %v6402_v28  ;;  %v6405_v25 = vpop.f32.mrb[114].mxu1  ;;  %v6291_v40 = vpop.f32.mrb[113].mxu0 }
 0x242   : > { %v6406_v51 = vpop.f32.mrb[115].mxu1  ;;  %v6292_v21 = vadd.f32 %v6291_v40, %v6290_v43  ;;  %v6293_v0 = vpop.f32.mrb[114].mxu0 }
 0x243   : > { %v6407_v36 = vadd.f32 %v6406_v51, %v6405_v25  ;;  %v6294_v16 = vpop.f32.mrb[115].mxu0 }
 0x244   : > { %v2469_v27 = vadd.f32 %v6292_v21, %v8393_v24  ;;  %v6295_v46 = vadd.f32 %v6294_v16, %v6293_v0 }
 0x246   : > { %v2472_v3 = vadd.f32 %v6295_v46, %v8398_v23  ;;  %v8491_v48 = vadd.f32 %v6404_v62, %v2469_v27  ;;  %v7245_v46 = vld [vmem:[#allocation8 + $0x150] sm:$0xff]  }
 0x247   : > { %v6408_v58 = vpop.f32.mrb[116].mxu1  ;;  %6678 = vmatprep.subr.bf16.mxu1 %v7245_v46 }
 0x248   : > { %v6409_v10 = vpop.f32.mrb[117].mxu1  ;;  %v6296_v29 = vpop.f32.mrb[116].mxu0  ;;  %v8493_v35 = vadd.f32 %v6407_v36, %v2472_v3 }
 0x249   : > { %v6410_v44 = vadd.f32 %v6409_v10, %v6408_v58  ;;  %v6411_v17 = vpop.f32.mrb[118].mxu1  ;;  %v6297_v11 = vpop.f32.mrb[117].mxu0  ;;  %v7247_v58 = vld [vmem:[#allocation8 + $0x110] sm:$0xff]  }
 0x24a   : > { %v6412_v53 = vpop.f32.mrb[119].mxu1  ;;  %v6298_v42 = vadd.f32 %v6297_v11, %v6296_v29  ;;  %v6299_v22 = vpop.f32.mrb[118].mxu0  ;;  %6679 = vmatpush3.bf16.msra.mxu1 %v7247_v58  ;;  %v7257_v58 = vld [vmem:[#allocation8 + $0x1c0] sm:$0xff]  }
 0x24b   : > { %v6413_v31 = vadd.f32 %v6412_v53, %v6411_v17  ;;  %v6300_v60 = vpop.f32.mrb[119].mxu0  ;;  %6786 = vmatprep.subr.bf16.mxu0 %v7257_v58 }
 0x24c   : > { %v2477_v24 = vadd.f32 %v6298_v42, %v8401_v37  ;;  %v6301_v28 = vadd.f32 %v6300_v60, %v6299_v22 }
 0x24e   : > { %v2480_v23 = vadd.f32 %v6301_v28, %v8403_v47  ;;  %v8497_v62 = vadd.f32 %v6410_v44, %v2477_v24  ;;  %v7251_v47 = vld [vmem:[#allocation8 + $0x158] sm:$0xff]  }
 0x24f   : > { %v6414_v56 = vpop.f32.mrb[120].mxu1  ;;  %6680 = vmatprep.subr.bf16.mxu1 %v7251_v47 }
 0x250   : > { %v6415_v8 = vpop.f32.mrb[121].mxu1  ;;  %v6302_v51 = vpop.f32.mrb[120].mxu0  ;;  %v8499_v36 = vadd.f32 %v6413_v31, %v2480_v23 }
 0x251   : > { %v6416_v25 = vadd.f32 %v6415_v8, %v6414_v56  ;;  %v6417_v43 = vpop.f32.mrb[122].mxu1  ;;  %v6303_v21 = vpop.f32.mrb[121].mxu0 }
 0x252   : > { %v6418_v40 = vpop.f32.mrb[123].mxu1  ;;  %v6304_v16 = vadd.f32 %v6303_v21, %v6302_v51  ;;  %v6305_v27 = vpop.f32.mrb[122].mxu0  ;;  %v8514_v21 = vld [vmem:[%s9561_s2] ss:$0 sm:$0xff] }
 0x253   : > { %v6419_v0 = vadd.f32 %v6418_v40, %v6417_v43  ;;  %v6306_v37 = vpop.f32.mrb[123].mxu0 }
 0x254   : > { %v2485_v3 = vadd.f32 %v6304_v16, %v8405_v54  ;;  %v6307_v10 = vadd.f32 %v6306_v37, %v6305_v27  ;;  %v7253_v54 = vld [vmem:[#allocation8 + $0x118] sm:$0xff]  }
 0x255   : > { %6681 = vmatpush3.bf16.msra.mxu1 %v7253_v54 }
 0x256   : > { %v2488_v17 = vadd.f32 %v6307_v10, %v8407_v45  ;;  %v8503_v53 = vadd.f32 %v6416_v25, %v2485_v3 }
 0x257   : > { %v6420_v44 = vpop.f32.mrb[124].mxu1 }
 0x258   : > { %v6421_v29 = vpop.f32.mrb[125].mxu1  ;;  %v6308_v42 = vpop.f32.mrb[124].mxu0  ;;  %v8505_v60 = vadd.f32 %v6419_v0, %v2488_v17 }
 0x259   : > { %v6422_v11 = vadd.f32 %v6421_v29, %v6420_v44  ;;  %v6423_v31 = vpop.f32.mrb[126].mxu1  ;;  %v6309_v24 = vpop.f32.mrb[125].mxu0 }
 0x25a   : > { %v6424_v22 = vpop.f32.mrb[127].mxu1  ;;  %v6310_v56 = vadd.f32 %v6309_v24, %v6308_v42  ;;  %v6311_v23 = vpop.f32.mrb[126].mxu0 }
 0x25b   : > { %v6425_v28 = vadd.f32 %v6424_v22, %v6423_v31  ;;  %v6312_v8 = vpop.f32.mrb[127].mxu0 }
 0x25c   : > { %v2493_v43 = vadd.f32 %v6310_v56, %v8409_v32  ;;  %v6313_v45 = vadd.f32 %v6312_v8, %v6311_v23  ;;  %v8522_v32 = vld [vmem:[%s9562_s3] ss:$0 sm:$0xff]  ;;  %v7261_v23 = vld [vmem:[#allocation8 + $0x120] sm:$0xff]  }
 0x25e   : > { %v2496_v25 = vadd.f32 %v6313_v45, %v8411_v30  ;;  %v8509_v51 = vadd.f32 %v6422_v11, %v2493_v43 }
 0x260   : > { %v6940_v40 = vpop.f32.mrb[128].mxu0  ;;  %v8516_v0 = vadd.f32 %v6425_v28, %v2496_v25 }
 0x261   : > { %v2703_v16 = vadd.f32 %v6940_v40, %v8421_v57  ;;  %v2694_v27 = vpop.f32.mrb[129].mxu0  ;;  %v7259_v57 = vld [vmem:[#allocation8 + $0x160] sm:$0xff]  }
 0x262   : > { %v2695_v30 = vadd.f32 %v2694_v27, %v8415_v4  ;;  %v6941_v46 = vpop.f32.mrb[130].mxu0  ;;  %6682 = vmatprep.subr.bf16.mxu1 %v7259_v57 }
 0x263   : > { %v2830_v37 = vmul.f32 %v8514_v21, %v2703_v16  ;;  %v2706_v3 = vadd.f32 %v6941_v46, %v8423_v20  ;;  %v2697_v10 = vpop.f32.mrb[131].mxu0  ;;  %6683 = vmatpush3.bf16.msra.mxu1 %v7261_v23 }
 0x264   : > { %v2828_v47 = vmul.f32 %v8514_v21, %v2695_v30  ;;  %v2698_v44 = vadd.f32 %v2697_v10, %v8417_v39 }
 0x265   : > { %v2869_v17 = vadd.f32 %v8522_v32, %v2830_v37  ;;  %v2831_v29 = vmul.f32 %v8514_v21, %v2706_v3 }
 0x266   : > { %v2867_v11 = vadd.f32 %v8522_v32, %v2828_v47  ;;  %v2829_v4 = vmul.f32 %v8514_v21, %v2698_v44 }
 0x267   : > { %v2901_v31 = vmax.f32 %v2869_v17, 0.0  ;;  %v2870_v42 = vadd.f32 %v8522_v32, %v2831_v29  ;;  %v3354_v17 = vld [vmem:[#allocation2 + $0x18] sm:$0xf] }
 0x268   : > { %v2899_v20 = vmax.f32 %v2867_v11, 0.0  ;;  %v2868_v22 = vadd.f32 %v8522_v32, %v2829_v4  ;;  %v6944_v24 = vpop.f32.mrb[132].mxu0 }
 0x269   : > { %v5947_v28 = vpack.c.bf16 %v2901_v31, %v2901_v31  ;;  %v2902_v39 = vmax.f32 %v2870_v42, 0.0  ;;  %v2719_v54 = vadd.f32 %v6944_v24, %v8433_v55  ;;  %v2710_v56 = vpop.f32.mrb[133].mxu0 }
 0x26a   : > { %v5945_v8 = vpack.c.bf16 %v2899_v20, %v2899_v20  ;;  %v2900_v43 = vmax.f32 %v2868_v22, 0.0  ;;  %v2711_v45 = vadd.f32 %v2710_v56, %v8427_v2  ;;  %v6945_v25 = vpop.f32.mrb[134].mxu0  ;;  %v3347_v20 = vld [vmem:[#allocation2 + $0xc] sm:$0xf] }
 0x26b   : > { %v3045_v40 = vshrl.u32 %v5947_v28, 16  ;;  %v3048_v16 = vshll.u32 %v5947_v28, 16  ;;  %v5948_v27 = vpack.c.bf16 %v2902_v39, %v2902_v39  ;;  %v2834_v30 = vmul.f32 %v8514_v21, %v2719_v54  ;;  %v2713_v46 = vpop.f32.mrb[135].mxu0  ;;  %v3358_v54 = vld [vmem:[#allocation2 + $0x20] sm:$0x1] }
 0x26c   : > { %v3028_v58 = vshrl.u32 %v5945_v8, 16  ;;  %v3031_v37 = vshll.u32 %v5945_v8, 16  ;;  %v5946_v3 = vpack.c.bf16 %v2900_v43, %v2900_v43  ;;  %v2832_v10 = vmul.f32 %v8514_v21, %v2711_v45 }
 0x26d   : > { %v3047_v55 = vrot.slane %v3045_v40, 7  ;;  %v3053_v47 = vshrl.u32 %v5948_v27, 16  ;;  %v3056_v44 = vshll.u32 %v5948_v27, 16  ;;  %v2873_v57 = vadd.f32 %v8522_v32, %v2834_v30  ;;  %v3351_v27 = vld [vmem:[#allocation2 + $0x14] sm:$0x1] }
 0x26e   : > { %v3030_v2 = vrot.slane %v3028_v58, 7  ;;  %v3036_v29 = vshrl.u32 %v5946_v3, 16  ;;  %v3039_v11 = vshll.u32 %v5946_v3, 16  ;;  %v2871_v4 = vadd.f32 %v8522_v32, %v2832_v10 }
 0x26f   : > { %v3050_v31 = vor.u32 %v3048_v16, %v3047_v55  ;;  %v3051_v42 = vrot.slane %v3047_v55, 4  ;;  %v3055_v22 = vrot.slane %v3053_v47, 7  ;;  %v2905_v24 = vmax.f32 %v2873_v57, 0.0 }
 0x270   : > { %v3033_v28 = vor.u32 %v3031_v37, %v3030_v2  ;;  %v3034_v39 = vrot.slane %v3030_v2, 4  ;;  %v3038_v56 = vrot.slane %v3036_v29, 7  ;;  %v2903_v23 = vmax.f32 %v2871_v4, 0.0  ;;  %v6948_v8 = vpop.f32.mrb[136].mxu0 }
 0x271   : > { %v3355_v43 = vsel %vm7784_vm9, %v3050_v31, %v3354_v17  ;;  %v3058_v45 = vor.u32 %v3056_v44, %v3055_v22  ;;  %v3060_v40 = vrot.slane %v3055_v22, 4  ;;  %v5951_v30 = vpack.c.bf16 %v2905_v24, %v2905_v24  ;;  %v2726_v58 = vpop.f32.mrb[137].mxu0 }
 0x272   : > { %3356 = vst [vmem:[#allocation2 + $0x18] sm:$0xf] %v3355_v43  ;;  %v3348_v16 = vsel %vm7784_vm9, %v3033_v28, %v3347_v20  ;;  %v3041_v3 = vor.u32 %v3039_v11, %v3038_v56  ;;  %v3043_v10 = vrot.slane %v3038_v56, 4  ;;  %v5949_v37 = vpack.c.bf16 %v2903_v23, %v2903_v23  ;;  %v6949_v55 = vpop.f32.mrb[138].mxu0  ;;  %v7267_v20 = vld [vmem:[#allocation8 + $0x168] sm:$0xff]  }
 0x273   : > { %3349 = vst [vmem:[#allocation2 + $0xc] sm:$0xf] %v3348_v16  ;;  %v3059_v47 = vsel %vm7772_vm7, %v3051_v42, %v3058_v45  ;;  %v3359_v57 = vsel %vm7758_vm4, %v3060_v40, %v3358_v54  ;;  %v3079_v44 = vshrl.u32 %v5951_v30, 16  ;;  %v3082_v17 = vshll.u32 %v5951_v30, 16  ;;  %v2729_v2 = vpop.f32.mrb[139].mxu0  ;;  %6684 = vmatprep.subr.bf16.mxu1 %v7267_v20 }
 0x274   : > { %3357 = vst [vmem:[#allocation2 + $0x1c] sm:$0xf] %v3059_v47  ;;  %3360 = vst [vmem:[#allocation2 + $0x20] sm:$0x1] %v3359_v57  ;;  %v3042_v29 = vsel %vm7772_vm7, %v3034_v39, %v3041_v3  ;;  %v3352_v11 = vsel %vm7758_vm4, %v3043_v10, %v3351_v27  ;;  %v3062_v4 = vshrl.u32 %v5949_v37, 16  ;;  %v3065_v31 = vshll.u32 %v5949_v37, 16 }
 0x275   : > { %3350 = vst [vmem:[#allocation2 + $0x10] sm:$0xf] %v3042_v29  ;;  %3353 = vst [vmem:[#allocation2 + $0x14] sm:$0x1] %v3352_v11  ;;  %v8553_v42 = vrot.slane %v3079_v44, 7  ;;  %v2722_v22 = vadd.f32 %v6945_v25, %v8435_v59  ;;  %v2714_v24 = vadd.f32 %v2713_v46, %v8429_v12  ;;  %v2735_v28 = vadd.f32 %v6948_v8, %v8449_v49  ;;  %v7269_v3 = vld [vmem:[#allocation8 + $0x128] sm:$0xff]  }
 0x276   : > { %v3368_v54 = vld [vmem:[#allocation2 + $0x30] sm:$0xf]  ;;  %v8558_v56 = vrot.slane %v3062_v4, 7  ;;  %v2727_v39 = vadd.f32 %v2726_v58, %v8439_v34  ;;  %v2738_v23 = vadd.f32 %v6949_v55, %v8451_v50  ;;  %v2730_v43 = vadd.f32 %v2729_v2, %v8442_v9  ;;  %v3361_v27 = vld [vmem:[#allocation2 + $0x24] sm:$0xf]  ;;  %6685 = vmatpush3.bf16.msra.mxu1 %v7269_v3 }
 0x277   : > { %v3084_v45 = vor.u32 %v3082_v17, %v8553_v42  ;;  %v3085_v40 = vrot.slane %v8553_v42, 4  ;;  %v2835_v59 = vmul.f32 %v8514_v21, %v2722_v22  ;;  %v2833_v12 = vmul.f32 %v8514_v21, %v2714_v24 }
 0x278   : > { %v3067_v49 = vor.u32 %v3065_v31, %v8558_v56  ;;  %v3068_v25 = vrot.slane %v8558_v56, 4  ;;  %v2838_v34 = vmul.f32 %v8514_v21, %v2735_v28  ;;  %v2836_v50 = vmul.f32 %v8514_v21, %v2727_v39  ;;  %v6952_v46 = vpop.f32.mrb[140].mxu0  ;;  %v7258_v28 = vld [vmem:[#allocation8 + $0x180] sm:$0xff]  }
 0x279   : > { %v3369_v9 = vsel %vm7784_vm9, %v3084_v45, %v3368_v54  ;;  %v2874_v8 = vadd.f32 %v8522_v32, %v2835_v59  ;;  %v2872_v30 = vadd.f32 %v8522_v32, %v2833_v12  ;;  %v2839_v58 = vmul.f32 %v8514_v21, %v2738_v23  ;;  %v2742_v16 = vpop.f32.mrb[141].mxu0  ;;  %v7265_v45 = vld [vmem:[#allocation8 + $0x1c8] sm:$0xff]  }
 0x27a   : > { %3370 = vst [vmem:[#allocation2 + $0x30] sm:$0xf] %v3369_v9  ;;  %v3362_v10 = vsel %vm7784_vm9, %v3067_v49, %v3361_v27  ;;  %v2877_v37 = vadd.f32 %v8522_v32, %v2838_v34  ;;  %v2875_v55 = vadd.f32 %v8522_v32, %v2836_v50  ;;  %v2837_v47 = vmul.f32 %v8514_v21, %v2730_v43  ;;  %v8581_v57 = vpop.f32.mrb[142].mxu0  ;;  %v3372_v9 = vld [vmem:[#allocation2 + $0x38] sm:$0x1] }
 0x27b   : > { %3363 = vst [vmem:[#allocation2 + $0x24] sm:$0xf] %v3362_v10  ;;  %v2906_v44 = vmax.f32 %v2874_v8, 0.0  ;;  %v2904_v17 = vmax.f32 %v2872_v30, 0.0  ;;  %v2878_v2 = vadd.f32 %v8522_v32, %v2839_v58  ;;  %v2751_v29 = vadd.f32 %v6952_v46, %v8461_v6  ;;  %v8585_v11 = vpop.f32.mrb[143].mxu0  ;;  %v8594_v49 = vld [vmem:[#allocation2 + $0x18] sm:$0xff]  }
 0x27c   : > { %v2909_v4 = vmax.f32 %v2877_v37, 0.0  ;;  %v2907_v31 = vmax.f32 %v2875_v55, 0.0  ;;  %v2876_v20 = vadd.f32 %v8522_v32, %v2837_v47  ;;  %v2743_v22 = vadd.f32 %v2742_v16, %v8455_v33  ;;  %v8589_v24 = vld [vmem:[#allocation2 + $0xc] sm:$0xff]   ;;  %v7266_v37 = vld [vmem:[#allocation8 + $0x188] sm:$0xff]  }
 0x27d   : > { %v5952_v54 = vpack.c.bf16 %v2906_v44, %v2906_v44  ;;  %v5950_v39 = vpack.c.bf16 %v2904_v17, %v2904_v17  ;;  %v2910_v23 = vmax.f32 %v2878_v2, 0.0  ;;  %v2842_v43 = vmul.f32 %v8514_v21, %v2751_v29  ;;  %4750 = vmatprep.mubr.bf16.mxu0 %v8589_v24  ;;  %v3365_v8 = vld [vmem:[#allocation2 + $0x2c] sm:$0x1]  ;;  %v3382_v44 = vld [vmem:[#allocation2 + $0x48] sm:$0xf] }
 0x27e   : > { %v5955_v27 = vpack.c.bf16 %v2909_v4, %v2909_v4  ;;  %v5953_v6 = vpack.c.bf16 %v2907_v31, %v2907_v31  ;;  %v2908_v59 = vmax.f32 %v2876_v20, 0.0  ;;  %v2840_v12 = vmul.f32 %v8514_v21, %v2743_v22  ;;  %4751 = vmatmul.mubr.bf16.vlgmr.msra.gmra.mrb[160].mxu0 %v8446_v1 }
 0x27f   : > { %v3087_v34 = vshrl.u32 %v5952_v54, 16  ;;  %v3090_v33 = vshll.u32 %v5952_v54, 16  ;;  %v3070_v50 = vshrl.u32 %v5950_v39, 16  ;;  %v3073_v46 = vshll.u32 %v5950_v39, 16  ;;  %4758 = vmatprep.mubr.bf16.mxu0 %v8594_v49  ;;  %6787 = vmatpush3.bf16.msra.mxu0 %v7258_v28  ;;  %v7273_v54 = vld [vmem:[#allocation8 + $0x1d0] sm:$0xff]  }
 0x280   : > { %v3113_v30 = vshrl.u32 %v5955_v27, 16  ;;  %v3116_v58 = vshll.u32 %v5955_v27, 16  ;;  %v3096_v16 = vshrl.u32 %v5953_v6, 16  ;;  %v3099_v3 = vshll.u32 %v5953_v6, 16  ;;  %v6956_v10 = vpop.f32.mrb[144].mxu0  ;;  %6788 = vmatprep.subr.bf16.mxu0 %v7265_v45 }
 0x281   : > { %v3089_v55 = vrot.slane %v3087_v34, 7  ;;  %v3072_v47 = vrot.slane %v3070_v50, 7  ;;  %v5956_v17 = vpack.c.bf16 %v2910_v23, %v2910_v23  ;;  %v5954_v2 = vpack.c.bf16 %v2908_v59, %v2908_v59  ;;  %v2758_v29 = vpop.f32.mrb[145].mxu0  ;;  %v3375_v34 = vld [vmem:[#allocation2 + $0x3c] sm:$0xf] }
 0x282   : > { %v8598_v4 = vrot.slane %v3113_v30, 7  ;;  %v8600_v1 = vrot.slane %v3096_v16, 7  ;;  %v2881_v31 = vadd.f32 %v8522_v32, %v2842_v43  ;;  %v2879_v20 = vadd.f32 %v8522_v32, %v2840_v12  ;;  %v8604_v22 = vpop.f32.mrb[146].mxu0  ;;  %v7274_v12 = vld [vmem:[#allocation8 + $0x190] sm:$0xff]  }
 0x283   : > { %v3092_v28 = vor.u32 %v3090_v33, %v3089_v55  ;;  %v3094_v39 = vrot.slane %v3089_v55, 4  ;;  %v3075_v27 = vor.u32 %v3073_v46, %v3072_v47  ;;  %v3077_v6 = vrot.slane %v3072_v47, 4  ;;  %v8606_v23 = vpop.f32.mrb[147].mxu0  ;;  %6789 = vmatpush3.bf16.msra.mxu0 %v7266_v37  ;;  %v7275_v30 = vld [vmem:[#allocation8 + $0x170] sm:$0xff]  }
 0x284   : > { %v3118_v45 = vor.u32 %v3116_v58, %v8598_v4  ;;  %v3119_v59 = vrot.slane %v8598_v4, 4  ;;  %v3101_v50 = vor.u32 %v3099_v3, %v8600_v1  ;;  %v3102_v43 = vrot.slane %v8600_v1, 4  ;;  %6790 = vmatprep.subr.bf16.mxu0 %v7273_v54  ;;  %6686 = vmatprep.subr.bf16.mxu1 %v7275_v30 }
 0x285   : > { %v3093_v33 = vsel %vm7772_vm7, %v3085_v40, %v3092_v28  ;;  %v3373_v46 = vsel %vm7758_vm4, %v3094_v39, %v3372_v9  ;;  %v3076_v58 = vsel %vm7772_vm7, %v3068_v25, %v3075_v27  ;;  %v3366_v16 = vsel %vm7758_vm4, %v3077_v6, %v3365_v8 }
 0x286   : > { %3371 = vst [vmem:[#allocation2 + $0x34] sm:$0xf] %v3093_v33  ;;  %3374 = vst [vmem:[#allocation2 + $0x38] sm:$0x1] %v3373_v46  ;;  %v3383_v42 = vsel %vm7784_vm9, %v3118_v45, %v3382_v44  ;;  %v3376_v40 = vsel %vm7784_vm9, %v3101_v50, %v3375_v34  ;;  %v3121_v9 = vshrl.u32 %v5956_v17, 16  ;;  %v3124_v3 = vshll.u32 %v5956_v17, 16 }
 0x287   : > { %3364 = vst [vmem:[#allocation2 + $0x28] sm:$0xf] %v3076_v58  ;;  %3367 = vst [vmem:[#allocation2 + $0x2c] sm:$0x1] %v3366_v16  ;;  %v3104_v56 = vshrl.u32 %v5954_v2, 16  ;;  %v3107_v25 = vshll.u32 %v5954_v2, 16  ;;  %v2754_v47 = vadd.f32 %v8581_v57, %v8463_v5  ;;  %v2746_v4 = vadd.f32 %v8585_v11, %v8457_v15  ;;  %6791 = vmatpush3.bf16.msra.mxu0 %v7274_v12 }
 0x288   : > { %3384 = vst [vmem:[#allocation2 + $0x48] sm:$0xf] %v3383_v42  ;;  %3377 = vst [vmem:[#allocation2 + $0x3c] sm:$0xf] %v3376_v40  ;;  %v2913_v37 = vmax.f32 %v2881_v31, 0.0  ;;  %v2911_v8 = vmax.f32 %v2879_v20, 0.0  ;;  %v2767_v44 = vadd.f32 %v6956_v10, %v8473_v41  ;;  %v2759_v2 = vadd.f32 %v2758_v29, %v8467_v13 }
 0x289   : > { %v3123_v55 = vrot.slane %v3121_v9, 7  ;;  %v8633_v1 = vpop.f32.mrb[148].mxu0  ;;  %v3386_v17 = vld [vmem:[#allocation2 + $0x50] sm:$0x1]  ;;  %v3106_v54 = vrot.slane %v3104_v56, 7  ;;  %v7277_v20 = vld [vmem:[#allocation8 + $0x130] sm:$0xff]   ;;  %v2843_v57 = vmul.f32 %v8514_v21, %v2754_v47  ;;  %v2841_v15 = vmul.f32 %v8514_v21, %v2746_v4 }
 0x28a   : > { %v5959_v28 = vpack.c.bf16 %v2913_v37, %v2913_v37  ;;  %v5957_v39 = vpack.c.bf16 %v2911_v8, %v2911_v8  ;;  %v8636_v31 = vpop.f32.mrb[149].mxu0  ;;  %v3379_v5 = vld [vmem:[#allocation2 + $0x44] sm:$0x1]  ;;  %6687 = vmatpush3.bf16.msra.mxu1 %v7277_v20  ;;  %v2846_v9 = vmul.f32 %v8514_v21, %v2767_v44  ;;  %v2770_v8 = vadd.f32 %v8604_v22, %v8475_v19 }
 0x28b   : > { %v3126_v27 = vor.u32 %v3124_v3, %v3123_v55  ;;  %v3128_v6 = vrot.slane %v3123_v55, 4  ;;  %v8640_v41 = vpop.f32.mrb[150].mxu0  ;;  %v3109_v11 = vor.u32 %v3107_v25, %v3106_v54  ;;  %v3111_v10 = vrot.slane %v3106_v54, 4  ;;  %v3389_v25 = vld [vmem:[#allocation2 + $0x54] sm:$0xf] }
 0x28c   : > { %v3147_v34 = vshrl.u32 %v5959_v28, 16  ;;  %v3150_v45 = vshll.u32 %v5959_v28, 16  ;;  %v8642_v50 = vpop.f32.mrb[151].mxu0  ;;  %v3130_v12 = vshrl.u32 %v5957_v39, 16  ;;  %v3133_v30 = vshll.u32 %v5957_v39, 16 }
 0x28d   : > { %v3127_v13 = vsel %vm7772_vm7, %v3119_v59, %v3126_v27  ;;  %v3387_v29 = vsel %vm7758_vm4, %v3128_v6, %v3386_v17  ;;  %v3110_v33 = vsel %vm7772_vm7, %v3102_v43, %v3109_v11  ;;  %v3380_v46 = vsel %vm7758_vm4, %v3111_v10, %v3379_v5  ;;  %v3396_v59 = vld [vmem:[#allocation2 + $0x60] sm:$0xf] }
 0x28e   : > { %3385 = vst [vmem:[#allocation2 + $0x4c] sm:$0xf] %v3127_v13  ;;  %3388 = vst [vmem:[#allocation2 + $0x50] sm:$0x1] %v3387_v29  ;;  %v8652_v58 = vrot.slane %v3147_v34, 7  ;;  %v2882_v16 = vadd.f32 %v8522_v32, %v2843_v57  ;;  %v8655_v42 = vrot.slane %v3130_v12, 7  ;;  %v2880_v40 = vadd.f32 %v8522_v32, %v2841_v15 }
 0x28f   : > { %3378 = vst [vmem:[#allocation2 + $0x40] sm:$0xf] %v3110_v33  ;;  %3381 = vst [vmem:[#allocation2 + $0x44] sm:$0x1] %v3380_v46  ;;  %v2844_v3 = vmul.f32 %v8514_v21, %v2759_v2  ;;  %v2885_v17 = vadd.f32 %v8522_v32, %v2846_v9  ;;  %v2847_v2 = vmul.f32 %v8514_v21, %v2770_v8  ;;  %v7281_v57 = vld [vmem:[#allocation8 + $0x1d8] sm:$0xff]  }
 0x290   : > { %v3152_v43 = vor.u32 %v3150_v45, %v8652_v58  ;;  %v3153_v56 = vrot.slane %v8652_v58, 4  ;;  %v2914_v37 = vmax.f32 %v2882_v16, 0.0  ;;  %v3135_v55 = vor.u32 %v3133_v30, %v8655_v42  ;;  %v8667_v54 = vpop.f32.mrb[152].mxu0  ;;  %v7282_v15 = vld [vmem:[#allocation8 + $0x198] sm:$0xff]   ;;  %v3400_v29 = vld [vmem:[#allocation2 + $0x68] sm:$0x1]  ;;  %6792 = vmatprep.subr.bf16.mxu0 %v7281_v57 }
 0x291   : > { %v3136_v47 = vrot.slane %v8655_v42, 4  ;;  %v2912_v4 = vmax.f32 %v2880_v40, 0.0  ;;  %v2883_v39 = vadd.f32 %v8522_v32, %v2844_v3  ;;  %v8673_v20 = vpop.f32.mrb[153].mxu0  ;;  %v2917_v27 = vmax.f32 %v2885_v17, 0.0  ;;  %v3393_v58 = vld [vmem:[#allocation2 + $0x5c] sm:$0x1]  ;;  %6793 = vmatpush3.bf16.msra.mxu0 %v7282_v15 }
 0x292   : > { %v3397_v44 = vsel %vm7784_vm9, %v3152_v43, %v3396_v59  ;;  %v5960_v28 = vpack.c.bf16 %v2914_v37, %v2914_v37  ;;  %v3390_v19 = vsel %vm7784_vm9, %v3135_v55, %v3389_v25  ;;  %v2762_v6 = vadd.f32 %v8606_v23, %v8469_v63  ;;  %v8679_v5 = vpop.f32.mrb[154].mxu0  ;;  %v7283_v63 = vld [vmem:[#allocation8 + $0x178] sm:$0xff]   ;;  %v3410_v8 = vld [vmem:[#allocation2 + $0x78] sm:$0xf]  ;;  %v3403_v57 = vld [vmem:[#allocation2 + $0x6c] sm:$0xf] }
 0x293   : > { %3398 = vst [vmem:[#allocation2 + $0x60] sm:$0xf] %v3397_v44  ;;  %v5958_v22 = vpack.c.bf16 %v2912_v4, %v2912_v4  ;;  %3391 = vst [vmem:[#allocation2 + $0x54] sm:$0xf] %v3390_v19  ;;  %v2915_v34 = vmax.f32 %v2883_v39, 0.0  ;;  %v2886_v45 = vadd.f32 %v8522_v32, %v2847_v2  ;;  %v8682_v13 = vpop.f32.mrb[155].mxu0  ;;  %v5963_v33 = vpack.c.bf16 %v2917_v27, %v2917_v27 }
 0x294   : > { %v3155_v11 = vshrl.u32 %v5960_v28, 16  ;;  %v3158_v10 = vshll.u32 %v5960_v28, 16  ;;  %v2845_v46 = vmul.f32 %v8514_v21, %v2762_v6  ;;  %v3670_v42 = vshrl.u32 %v8589_v24, 16  ;;  %6688 = vmatprep.subr.bf16.mxu1 %v7283_v63  ;;  %v8687_v17 = vld [vmem:[#allocation2 + $0x14] ss:$0 sps:$4 sm:$0x11]  }
 0x295   : > { %v3138_v12 = vshrl.u32 %v5958_v22, 16  ;;  %v3141_v30 = vshll.u32 %v5958_v22, 16  ;;  %v5961_v16 = vpack.c.bf16 %v2915_v34, %v2915_v34  ;;  %v2918_v59 = vmax.f32 %v2886_v45, 0.0 }
 0x296   : > { %v3157_v23 = vrot.slane %v3155_v11, 7  ;;  %v3181_v9 = vshrl.u32 %v5963_v33, 16  ;;  %v3184_v3 = vshll.u32 %v5963_v33, 16  ;;  %v2884_v43 = vadd.f32 %v8522_v32, %v2845_v46 }
 0x297   : > { %v3140_v40 = vrot.slane %v3138_v12, 7  ;;  %v3164_v55 = vshrl.u32 %v5961_v16, 16  ;;  %v3167_v4 = vshll.u32 %v5961_v16, 16  ;;  %v5964_v2 = vpack.c.bf16 %v2918_v59, %v2918_v59  ;;  %v7286_v16 = vld [vmem:[#allocation8 + $0x1e0] sm:$0xff]  }
 0x298   : > { %v3160_v25 = vor.u32 %v3158_v10, %v3157_v23  ;;  %v3162_v37 = vrot.slane %v3157_v23, 4  ;;  %v3183_v39 = vrot.slane %v3181_v9, 7  ;;  %v8689_v19 = vpop.f32.mrb[156].mxu0  ;;  %v2916_v15 = vmax.f32 %v2884_v43, 0.0  ;;  %v7289_v43 = vld [vmem:[#allocation8 + $0x1e8] sm:$0xff]   ;;  %6794 = vmatprep.subr.bf16.mxu0 %v7286_v16 }
 0x299   : > { %v3143_v44 = vor.u32 %v3141_v30, %v3140_v40  ;;  %v3145_v28 = vrot.slane %v3140_v40, 4  ;;  %v8695_v6 = vrot.slane %v3164_v55, 7  ;;  %v8697_v11 = vpop.f32.mrb[157].mxu0  ;;  %v3189_v46 = vshrl.u32 %v5964_v2, 16  ;;  %v3414_v55 = vld [vmem:[#allocation2 + $0x80] sm:$0x1] }
 0x29a   : > { %v3161_v22 = vsel %vm7772_vm7, %v3153_v56, %v3160_v25  ;;  %v3401_v27 = vsel %vm7758_vm4, %v3162_v37, %v3400_v29  ;;  %v3186_v45 = vor.u32 %v3184_v3, %v3183_v39  ;;  %v3187_v12 = vrot.slane %v3183_v39, 4  ;;  %v8703_v56 = vld [vmem:[#allocation2 + $0x20] ss:$0 sps:$4 sm:$0x11]   ;;  %v8705_v30 = vpop.f32.mrb[158].mxu0  ;;  %v7288_v3 = vld [vmem:[#allocation8 + $0x1a0] sm:$0xff]  }
 0x29b   : > { %3399 = vst [vmem:[#allocation2 + $0x64] sm:$0xf] %v3161_v22  ;;  %3402 = vst [vmem:[#allocation2 + $0x68] sm:$0x1] %v3401_v27  ;;  %v3144_v10 = vsel %vm7772_vm7, %v3136_v47, %v3143_v44  ;;  %v3394_v34 = vsel %vm7758_vm4, %v3145_v28, %v3393_v58  ;;  %v3169_v29 = vor.u32 %v3167_v4, %v8695_v6  ;;  %v3170_v33 = vrot.slane %v8695_v6, 4  ;;  %v8709_v23 = vpop.f32.mrb[159].mxu0 }
 0x29c   : > { %3392 = vst [vmem:[#allocation2 + $0x58] sm:$0xf] %v3144_v10  ;;  %3395 = vst [vmem:[#allocation2 + $0x5c] sm:$0x1] %v3394_v34  ;;  %v3192_v63 = vshll.u32 %v5964_v2, 16  ;;  %v7285_v47 = vld [vmem:[#allocation8 + $0x138] sm:$0xff]   ;;  %v3411_v58 = vsel %vm7784_vm9, %v3186_v45, %v3410_v8  ;;  %v5962_v59 = vpack.c.bf16 %v2916_v15, %v2916_v15  ;;  %v2783_v4 = vadd.f32 %v8633_v1, %v8485_v38 }
 0x29d   : > { %v3672_v40 = vshll.u32 %v8589_v24, 16  ;;  %v3677_v9 = vshll.u32 %v8687_v17, 16  ;;  %3412 = vst [vmem:[#allocation2 + $0x78] sm:$0xf] %v3411_v58  ;;  %v3404_v25 = vsel %vm7784_vm9, %v3169_v29, %v3403_v57  ;;  %v3191_v37 = vrot.slane %v3189_v46, 7  ;;  %6689 = vmatpush3.bf16.msra.mxu1 %v7285_v47  ;;  %6795 = vmatpush3.bf16.msra.mxu0 %v7288_v3  ;;  %v7290_v22 = vld [vmem:[#allocation8 + $0x1a8] sm:$0xff]  }
 0x29e   : > { %v3682_v44 = vshrl.u32 %v8594_v49, 16  ;;  %3405 = vst [vmem:[#allocation2 + $0x6c] sm:$0xf] %v3404_v25  ;;  %v3172_v8 = vshrl.u32 %v5962_v59, 16  ;;  %v3175_v28 = vshll.u32 %v5962_v59, 16  ;;  %v2850_v57 = vmul.f32 %v8514_v21, %v2783_v4  ;;  %6796 = vmatprep.subr.bf16.mxu0 %v7289_v43 }
 0x29f   : > { %v3674_v39 = vrot.slane %v3672_v40, 1  ;;  %v3679_v2 = vrot.slane %v3677_v9, 1  ;;  %v3194_v27 = vor.u32 %v3192_v63, %v3191_v37  ;;  %v3196_v6 = vrot.slane %v3191_v37, 4  ;;  %v3407_v38 = vld [vmem:[#allocation2 + $0x74] sm:$0x1]  ;;  %v8734_v40 = vld [vmem:[#allocation2 + $0x24] sm:$0xff]  }
 0x2a0   : > { %v3684_v15 = vshll.u32 %v8594_v49, 16  ;;  %v3174_v10 = vrot.slane %v3172_v8, 7  ;;  %v3689_v34 = vshll.u32 %v8703_v56, 16  ;;  %v3868_v45 = vrot.slane %v8589_v24, 1  ;;  %v7291_v9 = vld [vmem:[#allocation8 + $0x1f0] sm:$0xff]  }
 0x2a1   : > { %v3675_v1 = vor.u32 %v3674_v39, %v3670_v42  ;;  %v3195_v29 = vsel %vm7772_vm7, %v3187_v12, %v3194_v27  ;;  %v3415_v46 = vsel %vm7758_vm4, %v3196_v6, %v3414_v55  ;;  %v2889_v63 = vadd.f32 %v8522_v32, %v2850_v57  ;;  %6797 = vmatpush3.bf16.msra.mxu0 %v7290_v22  ;;  %v7292_v37 = vld [vmem:[#allocation8 + $0x1b0] sm:$0xff]   ;;  %v8765_v39 = vld [vmem:[#allocation8 + $0x200] sm:$0xff]   ;;  %v7294_v57 = vld [vmem:[#allocation8 + $0x1b8] sm:$0xff]  }
 0x2a2   : > { %v3686_v47 = vrot.slane %v3684_v15, 1  ;;  %3413 = vst [vmem:[#allocation2 + $0x7c] sm:$0xf] %v3195_v29  ;;  %3416 = vst [vmem:[#allocation2 + $0x80] sm:$0x1] %v3415_v46  ;;  %v3177_v16 = vor.u32 %v3175_v28, %v3174_v10  ;;  %v3179_v58 = vrot.slane %v3174_v10, 4  ;;  %v2775_v25 = vadd.f32 %v8636_v31, %v8479_v14  ;;  %6798 = vmatprep.subr.bf16.mxu0 %v7291_v9 }
 0x2a3   : > { %v8732_v59 = vsel %vm1114_vm8, %v3675_v1, %v3679_v2  ;;  %v3691_v42 = vrot.slane %v3689_v34, 1  ;;  %v2921_v12 = vmax.f32 %v2889_v63, 0.0  ;;  %v3869_v43 = vrot.slane %v8687_v17, 1  ;;  %v8749_v28 = vld [vmem:[#allocation2 + $0x2c] ss:$0 sps:$4 sm:$0x11]   ;;  %6970 = vmatprep.subr.bf16.mxu1 %v8765_v39 }
 0x2a4   : > { %4597 = vmatprep.mubr.bf16.mxu1 %v8732_v59  ;;  %v3687_v3 = vor.u32 %v3686_v47, %v3682_v44  ;;  %v3178_v55 = vsel %vm7772_vm7, %v3170_v33, %v3177_v16  ;;  %v3408_v4 = vsel %vm7758_vm4, %v3179_v58, %v3407_v38  ;;  %v2786_v8 = vadd.f32 %v8640_v41, %v8487_v7  ;;  %v7293_v17 = vld [vmem:[#allocation8 + $0x1f8] sm:$0xff]  }
 0x2a5   : > { %4598 = vmatmul.mubr.bf16.gmra.mrb[132].mxu1 %v8589_v24  ;;  %v2778_v44 = vadd.f32 %v8642_v50, %v8481_v18  ;;  %3406 = vst [vmem:[#allocation2 + $0x70] sm:$0xf] %v3178_v55  ;;  %3409 = vst [vmem:[#allocation2 + $0x74] sm:$0x1] %v3408_v4  ;;  %v5967_v14 = vpack.c.bf16 %v2921_v12, %v2921_v12  ;;  %v8755_v33 = vsel %vm1323_vm10, %v3868_v45, %v3869_v43  ;;  %v3424_v15 = vld [vmem:[#allocation2 + $0x90] sm:$0xf] }
 0x2a6   : > { %v8752_v31 = vsel %vm1114_vm8, %v3687_v3, %v3691_v42  ;;  %v2848_v24 = vmul.f32 %v8514_v21, %v2775_v25  ;;  %4759 = vmatmul.mubr.bf16.gmra.mrb[164].mxu0 %v8755_v33  ;;  %v2851_v18 = vmul.f32 %v8514_v21, %v2786_v8  ;;  %v2799_v41 = vadd.f32 %v8667_v54, %v8497_v62 }
 0x2a7   : > { %4605 = vmatprep.mubr.bf16.mxu1 %v8752_v31  ;;  %v2849_v7 = vmul.f32 %v8514_v21, %v2778_v44  ;;  %v3694_v50 = vshrl.u32 %v8734_v40, 16  ;;  %v3215_v2 = vshrl.u32 %v5967_v14, 16  ;;  %v3218_v22 = vshll.u32 %v5967_v14, 16  ;;  %4766 = vmatprep.mubr.bf16.mxu0 %v8734_v40 }
 0x2a8   : > { %v2887_v27 = vadd.f32 %v8522_v32, %v2848_v24  ;;  %v3696_v6 = vshll.u32 %v8734_v40, 16  ;;  %6799 = vmatpush3.bf16.msra.mxu0 %v7292_v37  ;;  %v2890_v10 = vadd.f32 %v8522_v32, %v2851_v18  ;;  %v2854_v62 = vmul.f32 %v8514_v21, %v2799_v41 }
 0x2a9   : > { %v2888_v38 = vadd.f32 %v8522_v32, %v2849_v7  ;;  %v3701_v54 = vshll.u32 %v8749_v28, 16  ;;  %6800 = vmatprep.subr.bf16.mxu0 %v7293_v17  ;;  %v3217_v1 = vrot.slane %v3215_v2, 7  ;;  %v3871_v29 = vrot.slane %v8594_v49, 1  ;;  %v3417_v2 = vld [vmem:[#allocation2 + $0x84] sm:$0xf] }
 0x2aa   : > { %v2919_v34 = vmax.f32 %v2887_v27, 0.0  ;;  %v3698_v45 = vrot.slane %v3696_v6, 1  ;;  %v2922_v46 = vmax.f32 %v2890_v10, 0.0  ;;  %v2893_v47 = vadd.f32 %v8522_v32, %v2854_v62  ;;  %v3428_v27 = vld [vmem:[#allocation2 + $0x98] sm:$0x1] }
 0x2ab   : > { %v2920_v63 = vmax.f32 %v2888_v38, 0.0  ;;  %v3703_v16 = vrot.slane %v3701_v54, 1  ;;  %v3220_v58 = vor.u32 %v3218_v22, %v3217_v1  ;;  %v3221_v42 = vrot.slane %v3217_v1, 4  ;;  %v3421_v62 = vld [vmem:[#allocation2 + $0x8c] sm:$0x1] }
 0x2ac   : > { %v5965_v9 = vpack.c.bf16 %v2919_v34, %v2919_v34  ;;  %v3699_v12 = vor.u32 %v3698_v45, %v3694_v50  ;;  %6801 = vmatpush3.bf16.msra.mxu0 %v7294_v57  ;;  %v5968_v3 = vpack.c.bf16 %v2922_v46, %v2922_v46  ;;  %v2925_v25 = vmax.f32 %v2893_v47, 0.0  ;;  %v8790_v50 = vld [vmem:[#allocation2 + $0x30] sm:$0xff]  }
 0x2ad   : > { %v5966_v43 = vpack.c.bf16 %v2920_v63, %v2920_v63  ;;  %4606 = vmatmul.mubr.bf16.gmra.mrb[136].mxu1 %v8594_v49  ;;  %v3872_v37 = vrot.slane %v8703_v56, 1  ;;  %v3425_v55 = vsel %vm7784_vm9, %v3220_v58, %v3424_v15  ;;  %v2791_v56 = vadd.f32 %v8673_v20, %v8491_v48  ;;  %v3438_v58 = vld [vmem:[#allocation2 + $0xa8] sm:$0xf] }
 0x2ae   : > { %v3198_v4 = vshrl.u32 %v5965_v9, 16  ;;  %v3201_v8 = vshll.u32 %v5965_v9, 16  ;;  %v8782_v44 = vsel %vm1114_vm8, %v3699_v12, %v3703_v16  ;;  %3426 = vst [vmem:[#allocation2 + $0x90] sm:$0xf] %v3425_v55  ;;  %v3223_v17 = vshrl.u32 %v5968_v3, 16 }
 0x2af   : > { %v3226_v14 = vshll.u32 %v5968_v3, 16  ;;  %v3206_v24 = vshrl.u32 %v5966_v43, 16  ;;  %v3209_v18 = vshll.u32 %v5966_v43, 16  ;;  %4613 = vmatprep.mubr.bf16.mxu1 %v8782_v44  ;;  %v5971_v49 = vpack.c.bf16 %v2925_v25, %v2925_v25  ;;  %v8822_v3 = vld [vmem:[%s9561_s2] ss:$0 sm:$0xff] }
 0x2b0   : > { %v3200_v7 = vrot.slane %v3198_v4, 7  ;;  %v8786_v41 = vsel %vm1323_vm10, %v3871_v29, %v3872_v37  ;;  %v3225_v22 = vrot.slane %v3223_v17, 7  ;;  %v2802_v57 = vadd.f32 %v8679_v5, %v8499_v36  ;;  %v8804_v5 = vld [vmem:[#allocation2 + $0x38] ss:$0 sps:$4 sm:$0x11]  }
 0x2b1   : > { %v3208_v6 = vrot.slane %v3206_v24, 7  ;;  %4767 = vmatmul.mubr.bf16.gmra.mrb[168].mxu0 %v8786_v41  ;;  %v2794_v15 = vadd.f32 %v8682_v13, %v8493_v35  ;;  %v3249_v54 = vshrl.u32 %v5971_v49, 16  ;;  %v3252_v1 = vshll.u32 %v5971_v49, 16 }
 0x2b2   : > { %v3203_v10 = vor.u32 %v3201_v8, %v3200_v7  ;;  %v3204_v38 = vrot.slane %v3200_v7, 4  ;;  %4774 = vmatprep.mubr.bf16.mxu0 %v8790_v50  ;;  %v3228_v48 = vor.u32 %v3226_v14, %v3225_v22  ;;  %v3230_v20 = vrot.slane %v3225_v22, 4  ;;  %v8835_v14 = vld [vmem:[%s9562_s3] ss:$0 sm:$0xff] }
 0x2b3   : > { %v3211_v34 = vor.u32 %v3209_v18, %v3208_v6  ;;  %v3213_v45 = vrot.slane %v3208_v6, 4  ;;  %v8800_v46 = vrot.slane %v3249_v54, 7  ;;  %v2852_v36 = vmul.f32 %v8514_v21, %v2791_v56 }
 0x2b4   : > { %v3418_v29 = vsel %vm7784_vm9, %v3203_v10, %v3417_v2  ;;  %v2855_v35 = vmul.f32 %v8514_v21, %v2802_v57  ;;  %v3229_v13 = vsel %vm7772_vm7, %v3221_v42, %v3228_v48  ;;  %v3429_v63 = vsel %vm7758_vm4, %v3230_v20, %v3428_v27 }
 0x2b5   : > { %3419 = vst [vmem:[#allocation2 + $0x84] sm:$0xf] %v3418_v29  ;;  %v3212_v47 = vsel %vm7772_vm7, %v3204_v38, %v3211_v34  ;;  %v3422_v16 = vsel %vm7758_vm4, %v3213_v45, %v3421_v62  ;;  %4614 = vmatmul.mubr.bf16.gmra.mrb[140].mxu1 %v8734_v40  ;;  %3427 = vst [vmem:[#allocation2 + $0x94] sm:$0xf] %v3229_v13  ;;  %v3254_v21 = vor.u32 %v3252_v1, %v8800_v46  ;;  %v3431_v45 = vld [vmem:[#allocation2 + $0x9c] sm:$0xf] }
 0x2b6   : > { %3430 = vst [vmem:[#allocation2 + $0x98] sm:$0x1] %v3429_v63  ;;  %3420 = vst [vmem:[#allocation2 + $0x88] sm:$0xf] %v3212_v47  ;;  %v3255_v42 = vrot.slane %v8800_v46, 4  ;;  %v2891_v9 = vadd.f32 %v8522_v32, %v2852_v36  ;;  %v2894_v12 = vadd.f32 %v8522_v32, %v2855_v35  ;;  %v2853_v43 = vmul.f32 %v8822_v3, %v2794_v15 }
 0x2b7   : > { %3423 = vst [vmem:[#allocation2 + $0x8c] sm:$0x1] %v3422_v16  ;;  %v2815_v25 = vadd.f32 %v8689_v19, %v8509_v51  ;;  %v3706_v37 = vshrl.u32 %v8790_v50, 16  ;;  %v3708_v55 = vshll.u32 %v8790_v50, 16  ;;  %v3439_v4 = vsel %vm7784_vm9, %v3254_v21, %v3438_v58  ;;  %v3442_v46 = vld [vmem:[#allocation2 + $0xb0] sm:$0x1] }
 0x2b8   : > { %v2923_v8 = vmax.f32 %v2891_v9, 0.0  ;;  %v2926_v17 = vmax.f32 %v2894_v12, 0.0  ;;  %v3713_v32 = vshll.u32 %v8804_v5, 16  ;;  %3440 = vst [vmem:[#allocation2 + $0xa8] sm:$0xf] %v3439_v4  ;;  %v2892_v24 = vadd.f32 %v8835_v14, %v2853_v43 }
 0x2b9   : > { %v2858_v51 = vmul.f32 %v8822_v3, %v2815_v25  ;;  %v3710_v19 = vrot.slane %v3708_v55, 1  ;;  %v3874_v18 = vrot.slane %v8734_v40, 1  ;;  %v3875_v2 = vrot.slane %v8749_v28, 1  ;;  %v8850_v28 = vld [vmem:[#allocation2 + $0x3c] sm:$0xff]  }
 0x2ba   : > { %v5969_v7 = vpack.c.bf16 %v2923_v8, %v2923_v8  ;;  %v5972_v49 = vpack.c.bf16 %v2926_v17, %v2926_v17  ;;  %v3715_v56 = vrot.slane %v3713_v32, 1  ;;  %v2924_v22 = vmax.f32 %v2892_v24, 0.0  ;;  %v8871_v32 = vld [vmem:[#allocation2 + $0x44] ss:$0 sps:$4 sm:$0x11]  }
 0x2bb   : > { %v2897_v27 = vadd.f32 %v8835_v14, %v2858_v51  ;;  %v3711_v6 = vor.u32 %v3710_v19, %v3706_v37  ;;  %v2807_v57 = vadd.f32 %v8697_v11, %v8503_v53  ;;  %v8848_v20 = vsel %vm1323_vm10, %v3874_v18, %v3875_v2  ;;  %v3452_v24 = vld [vmem:[#allocation2 + $0xc0] sm:$0xf] }
 0x2bc   : > { %v3232_v15 = vshrl.u32 %v5969_v7, 16  ;;  %v3235_v10 = vshll.u32 %v5969_v7, 16  ;;  %v3257_v38 = vshrl.u32 %v5972_v49, 16  ;;  %v3260_v62 = vshll.u32 %v5972_v49, 16  ;;  %4775 = vmatmul.mubr.bf16.gmra.mrb[172].mxu0 %v8848_v20 }
 0x2bd   : > { %v5970_v54 = vpack.c.bf16 %v2924_v22, %v2924_v22  ;;  %v2929_v1 = vmax.f32 %v2897_v27, 0.0  ;;  %v8845_v48 = vsel %vm1114_vm8, %v3711_v6, %v3715_v56  ;;  %v2856_v53 = vmul.f32 %v8822_v3, %v2807_v57  ;;  %4782 = vmatprep.mubr.bf16.mxu0 %v8850_v28 }
 0x2be   : > { %v3234_v34 = vrot.slane %v3232_v15, 7  ;;  %v3259_v29 = vrot.slane %v3257_v38, 7  ;;  %4621 = vmatprep.mubr.bf16.mxu1 %v8845_v48  ;;  %v2818_v11 = vadd.f32 %v8705_v30, %v8516_v0  ;;  %v2810_v63 = vadd.f32 %v8709_v23, %v8505_v60  ;;  %v3435_v23 = vld [vmem:[#allocation2 + $0xa4] sm:$0x1] }
 0x2bf   : > { %v3240_v36 = vshrl.u32 %v5970_v54, 16  ;;  %v3243_v35 = vshll.u32 %v5970_v54, 16  ;;  %v5975_v13 = vpack.c.bf16 %v2929_v1, %v2929_v1  ;;  %4622 = vmatmul.mubr.bf16.gmra.mrb[144].mxu1 %v8790_v50  ;;  %v2895_v25 = vadd.f32 %v8835_v14, %v2856_v53 }
 0x2c0   : > { %v3237_v47 = vor.u32 %v3235_v10, %v3234_v34  ;;  %v3238_v16 = vrot.slane %v3234_v34, 4  ;;  %v3262_v58 = vor.u32 %v3260_v62, %v3259_v29  ;;  %v3264_v21 = vrot.slane %v3259_v29, 4  ;;  %v8890_v62 = vld [vmem:[#allocation2 + $0x50] ss:$0 sps:$4 sm:$0x11]  }
 0x2c1   : > { %v3242_v9 = vrot.slane %v3240_v36, 7  ;;  %v3283_v12 = vshrl.u32 %v5975_v13, 16  ;;  %v3286_v43 = vshll.u32 %v5975_v13, 16  ;;  %v2859_v37 = vmul.f32 %v8822_v3, %v2818_v11  ;;  %v3445_v29 = vld [vmem:[#allocation2 + $0xb4] sm:$0xf] }
 0x2c2   : > { %v3432_v0 = vsel %vm7784_vm9, %v3237_v47, %v3431_v45  ;;  %v3263_v30 = vsel %vm7772_vm7, %v3255_v42, %v3262_v58  ;;  %v3443_v60 = vsel %vm7758_vm4, %v3264_v21, %v3442_v46  ;;  %v2927_v17 = vmax.f32 %v2895_v25, 0.0 }
 0x2c3   : > { %3433 = vst [vmem:[#allocation2 + $0x9c] sm:$0xf] %v3432_v0  ;;  %3441 = vst [vmem:[#allocation2 + $0xac] sm:$0xf] %v3263_v30  ;;  %v3245_v55 = vor.u32 %v3243_v35, %v3242_v9  ;;  %v3247_v4 = vrot.slane %v3242_v9, 4  ;;  %v8869_v8 = vrot.slane %v3283_v12, 7  ;;  %v2898_v51 = vadd.f32 %v8835_v14, %v2859_v37 }
 0x2c4   : > { %3444 = vst [vmem:[#allocation2 + $0xb0] sm:$0x1] %v3443_v60  ;;  %v2857_v42 = vmul.f32 %v8822_v3, %v2810_v63  ;;  %v3720_v19 = vshll.u32 %v8850_v28, 16  ;;  %v3718_v56 = vshrl.u32 %v8850_v28, 16  ;;  %v5973_v2 = vpack.c.bf16 %v2927_v17, %v2927_v17  ;;  %v8883_v3 = vld [vmem:[#allocation2 + $0x48] sm:$0xff]   ;;  %v8905_v9 = vld [vmem:[#allocation2 + $0x54] sm:$0xff]  }
 0x2c5   : > { %v3246_v18 = vsel %vm7772_vm7, %v3238_v16, %v3245_v55  ;;  %v3436_v7 = vsel %vm7758_vm4, %v3247_v4, %v3435_v23  ;;  %v3288_v49 = vor.u32 %v3286_v43, %v8869_v8  ;;  %v2930_v22 = vmax.f32 %v2898_v51, 0.0  ;;  %v3456_v63 = vld [vmem:[#allocation2 + $0xc8] sm:$0x1]  ;;  %v8907_v12 = vld [vmem:[#allocation2 + $0x5c] ss:$0 sps:$4 sm:$0x11]  }
 0x2c6   : > { %3434 = vst [vmem:[#allocation2 + $0xa0] sm:$0xf] %v3246_v18  ;;  %3437 = vst [vmem:[#allocation2 + $0xa4] sm:$0x1] %v3436_v7  ;;  %v2896_v27 = vadd.f32 %v8835_v14, %v2857_v42  ;;  %v3722_v6 = vrot.slane %v3720_v19, 1  ;;  %v3725_v15 = vshll.u32 %v8871_v32, 16 }
 0x2c7   : > { %v3453_v57 = vsel %vm7784_vm9, %v3288_v49, %v3452_v24  ;;  %v3877_v10 = vrot.slane %v8790_v50, 1  ;;  %v3878_v38 = vrot.slane %v8804_v5, 1  ;;  %v3289_v54 = vrot.slane %v8869_v8, 4  ;;  %v3449_v51 = vld [vmem:[#allocation2 + $0xbc] sm:$0x1]  ;;  %v8918_v49 = vld [vmem:[#allocation2 + $0x60] sm:$0xff]  }
 0x2c8   : > { %3454 = vst [vmem:[#allocation2 + $0xc0] sm:$0xf] %v3453_v57  ;;  %v3266_v1 = vshrl.u32 %v5973_v2, 16  ;;  %v5976_v34 = vpack.c.bf16 %v2930_v22, %v2930_v22  ;;  %v2928_v14 = vmax.f32 %v2896_v27, 0.0  ;;  %v3269_v45 = vshll.u32 %v5973_v2, 16 }
 0x2c9   : > { %v3723_v46 = vor.u32 %v3722_v6, %v3718_v56  ;;  %v3727_v53 = vrot.slane %v3725_v15, 1  ;;  %v8894_v11 = vsel %vm1323_vm10, %v3877_v10, %v3878_v38  ;;  %v3730_v5 = vshrl.u32 %v8883_v3, 16 }
 0x2ca   : > { %v3268_v36 = vrot.slane %v3266_v1, 7  ;;  %v3291_v35 = vshrl.u32 %v5976_v34, 16  ;;  %v5974_v13 = vpack.c.bf16 %v2928_v14, %v2928_v14  ;;  %4783 = vmatmul.mubr.bf16.gmra.mrb[176].mxu0 %v8894_v11  ;;  %v3732_v16 = vshll.u32 %v8883_v3, 16  ;;  %v7255_v1 = vld [vmem:[#allocation2 + $0x68] ss:$0 sps:$4 sm:$0x11]  }
 0x2cb   : > { %v8899_v47 = vsel %vm1114_vm8, %v3723_v46, %v3727_v53  ;;  %4790 = vmatprep.mubr.bf16.mxu0 %v8883_v3  ;;  %v3737_v58 = vshll.u32 %v8890_v62, 16  ;;  %v3880_v21 = vrot.slane %v8850_v28, 1  ;;  %v3294_v0 = vshll.u32 %v5976_v34, 16 }
 0x2cc   : > { %v3271_v43 = vor.u32 %v3269_v45, %v3268_v36  ;;  %v3293_v25 = vrot.slane %v3291_v35, 7  ;;  %v3274_v30 = vshrl.u32 %v5974_v13, 16  ;;  %4629 = vmatprep.mubr.bf16.mxu1 %v8899_v47  ;;  %v3272_v60 = vrot.slane %v3268_v36, 4 }
 0x2cd   : > { %v3277_v23 = vshll.u32 %v5974_v13, 16  ;;  %4630 = vmatmul.mubr.bf16.gmra.mrb[148].mxu1 %v8850_v28  ;;  %v3734_v37 = vrot.slane %v3732_v16, 1  ;;  %v3881_v55 = vrot.slane %v8871_v32, 1  ;;  %v3739_v19 = vrot.slane %v3737_v58, 1 }
 0x2ce   : > { %v3446_v4 = vsel %vm7784_vm9, %v3271_v43, %v3445_v29  ;;  %v3296_v8 = vor.u32 %v3294_v0, %v3293_v25  ;;  %v3298_v17 = vrot.slane %v3293_v25, 4  ;;  %v3276_v24 = vrot.slane %v3274_v30, 7  ;;  %v8943_v29 = vld [vmem:[#allocation2 + $0x6c] sm:$0xff]   ;;  %v8959_v43 = vld [vmem:[#allocation2 + $0x78] sm:$0xff]  }
 0x2cf   : > { %3447 = vst [vmem:[#allocation2 + $0xb4] sm:$0xf] %v3446_v4  ;;  %v3735_v42 = vor.u32 %v3734_v37, %v3730_v5  ;;  %v8915_v18 = vsel %vm1323_vm10, %v3880_v21, %v3881_v55  ;;  %v3744_v7 = vshll.u32 %v8905_v9, 16  ;;  %v3742_v27 = vshrl.u32 %v8905_v9, 16 }
 0x2d0   : > { %v3297_v32 = vsel %vm7772_vm7, %v3289_v54, %v3296_v8  ;;  %v3457_v61 = vsel %vm7758_vm4, %v3298_v17, %v3456_v63  ;;  %v3279_v56 = vor.u32 %v3277_v23, %v3276_v24  ;;  %v3281_v2 = vrot.slane %v3276_v24, 4  ;;  %v8974_v24 = vld [vmem:[#allocation2 + $0x84] sm:$0xff]  }
 0x2d1   : > { %3455 = vst [vmem:[#allocation2 + $0xc4] sm:$0xf] %v3297_v32  ;;  %3458 = vst [vmem:[#allocation2 + $0xc8] sm:$0x1] %v3457_v61  ;;  %v8925_v22 = vsel %vm1114_vm8, %v3735_v42, %v3739_v19  ;;  %v3746_v6 = vrot.slane %v3744_v7, 1  ;;  %v3749_v57 = vshll.u32 %v8907_v12, 16 }
 0x2d2   : > { %v3280_v15 = vsel %vm7772_vm7, %v3272_v60, %v3279_v56  ;;  %v3450_v10 = vsel %vm7758_vm4, %v3281_v2, %v3449_v51  ;;  %4637 = vmatprep.mubr.bf16.mxu1 %v8925_v22  ;;  %4791 = vmatmul.mubr.bf16.gmra.mrb[180].mxu0 %v8915_v18  ;;  %v3756_v34 = vshll.u32 %v8918_v49, 16  ;;  %v3883_v26 = vrot.slane %v8883_v3, 1  ;;  %v7268_v56 = vld [vmem:[#allocation2 + $0x8c] ss:$0 sps:$4 sm:$0x11]  }
 0x2d3   : > { %3448 = vst [vmem:[#allocation2 + $0xb8] sm:$0xf] %v3280_v15  ;;  %3451 = vst [vmem:[#allocation2 + $0xbc] sm:$0x1] %v3450_v10  ;;  %4798 = vmatprep.mubr.bf16.mxu0 %v8905_v9  ;;  %v3747_v38 = vor.u32 %v3746_v6, %v3742_v27  ;;  %v3751_v54 = vrot.slane %v3749_v57, 1  ;;  %v3884_v14 = vrot.slane %v8890_v62, 1 }
 0x2d4   : > { %v3758_v45 = vrot.slane %v3756_v34, 1  ;;  %v3754_v46 = vshrl.u32 %v8918_v49, 16  ;;  %v3761_v53 = vshll.u32 %v7255_v1, 16  ;;  %v3768_v13 = vshll.u32 %v8943_v29, 16  ;;  %v8989_v15 = vld [vmem:[#allocation2 + $0x90] sm:$0xff]  }
 0x2d5   : > { %4638 = vmatmul.mubr.bf16.gmra.mrb[152].mxu1 %v8883_v3  ;;  %v8939_v52 = vsel %vm1114_vm8, %v3747_v38, %v3751_v54  ;;  %v8948_v36 = vsel %vm1323_vm10, %v3883_v26, %v3884_v14  ;;  %v7260_v62 = vld [vmem:[#allocation2 + $0x74] ss:$0 sps:$4 sm:$0x11]   ;;  %v3886_v16 = vrot.slane %v8905_v9, 1  ;;  %v3887_v58 = vrot.slane %v8907_v12, 1 }
 0x2d6   : > { %4645 = vmatprep.mubr.bf16.mxu1 %v8939_v52  ;;  %v3759_v35 = vor.u32 %v3758_v45, %v3754_v46  ;;  %v3763_v5 = vrot.slane %v3761_v53, 1  ;;  %v3770_v21 = vrot.slane %v3768_v13, 1  ;;  %v3766_v25 = vshrl.u32 %v8943_v29, 16  ;;  %v7263_v12 = vld [vmem:[#allocation2 + $0x80] ss:$0 sps:$4 sm:$0x11]  }
 0x2d7   : > { %v3773_v0 = vshll.u32 %v7260_v62, 16  ;;  %v8964_v30 = vsel %vm1323_vm10, %v3886_v16, %v3887_v58  ;;  %v3780_v23 = vshll.u32 %v8959_v43, 16  ;;  %v3889_v4 = vrot.slane %v8918_v49, 1  ;;  %v7271_v14 = vld [vmem:[#allocation2 + $0x98] ss:$0 sps:$4 sm:$0x11]  }
 0x2d8   : > { %v8955_v63 = vsel %vm1114_vm8, %v3759_v35, %v3763_v5  ;;  %v3771_v60 = vor.u32 %v3770_v21, %v3766_v25  ;;  %v3890_v8 = vrot.slane %v7255_v1, 1  ;;  %v3778_v51 = vshrl.u32 %v8959_v43, 16  ;;  %v9004_v13 = vld [vmem:[#allocation2 + $0x9c] sm:$0xff]   ;;  %v6466_v5 = vpop.f32.mrb[128].mxu1 }
 0x2d9   : > { %v3775_v37 = vrot.slane %v3773_v0, 1  ;;  %v3782_v17 = vrot.slane %v3780_v23, 1  ;;  %v3785_v42 = vshll.u32 %v7263_v12, 16  ;;  %v3792_v32 = vshll.u32 %v8974_v24, 16  ;;  %v6467_v0 = vpop.f32.mrb[129].mxu1 }
 0x2da   : > { %4799 = vmatmul.mubr.bf16.gmra.mrb[184].mxu0 %v8948_v36  ;;  %v8979_v19 = vsel %vm1323_vm10, %v3889_v4, %v3890_v8  ;;  %v3892_v27 = vrot.slane %v8943_v29, 1  ;;  %v3893_v6 = vrot.slane %v7260_v62, 1  ;;  %v3790_v10 = vshrl.u32 %v8974_v24, 16  ;;  %v7276_v23 = vld [vmem:[#allocation2 + $0xa4] ss:$0 sps:$4 sm:$0x11]  }
 0x2db   : > { %4806 = vmatprep.mubr.bf16.mxu0 %v8918_v49  ;;  %v8971_v55 = vsel %vm1114_vm8, %v3771_v60, %v3775_v37  ;;  %v3783_v7 = vor.u32 %v3782_v17, %v3778_v51  ;;  %v3787_v61 = vrot.slane %v3785_v42, 1  ;;  %v3794_v57 = vrot.slane %v3792_v32, 1 }
 0x2dc   : > { %v3797_v38 = vshll.u32 %v7268_v56, 16  ;;  %v8994_v54 = vsel %vm1323_vm10, %v3892_v27, %v3893_v6  ;;  %v3804_v34 = vshll.u32 %v8989_v15, 16  ;;  %v3895_v46 = vrot.slane %v8959_v43, 1 }
 0x2dd   : > { %4646 = vmatmul.mubr.bf16.gmra.mrb[156].mxu1 %v8905_v9  ;;  %v8986_v2 = vsel %vm1114_vm8, %v3783_v7, %v3787_v61  ;;  %v3795_v1 = vor.u32 %v3794_v57, %v3790_v10  ;;  %v3896_v53 = vrot.slane %v7263_v12, 1  ;;  %v3802_v62 = vshrl.u32 %v8989_v15, 16  ;;  %v6469_v12 = vpop.f32.mrb[130].mxu1  ;;  %v9021_v7 = vld [vmem:[#allocation2 + $0xa8] sm:$0xff]  }
 0x2de   : > { %4653 = vmatprep.mubr.bf16.mxu1 %v8955_v63  ;;  %v3799_v26 = vrot.slane %v3797_v38, 1  ;;  %v3806_v35 = vrot.slane %v3804_v34, 1  ;;  %v3809_v16 = vshll.u32 %v7271_v14, 16  ;;  %v3816_v25 = vshll.u32 %v9004_v13, 16  ;;  %v6470_v8 = vpop.f32.mrb[131].mxu1 }
 0x2df   : > { %v9009_v58 = vsel %vm1323_vm10, %v3895_v46, %v3896_v53  ;;  %v9014_v37 = vadd.f32 %v6467_v0, %v6466_v5  ;;  %v3898_v4 = vrot.slane %v8974_v24, 1  ;;  %v3899_v51 = vrot.slane %v7268_v56, 1  ;;  %v7279_v38 = vld [vmem:[#allocation2 + $0xb0] ss:$0 sps:$4 sm:$0x11]   ;;  %v9038_v53 = vld [vmem:[#allocation2 + $0xb4] sm:$0xff]  }
 0x2e0   : > { %v9001_v45 = vsel %vm1114_vm8, %v3795_v1, %v3799_v26  ;;  %v3807_v21 = vor.u32 %v3806_v35, %v3802_v62  ;;  %v3811_v60 = vrot.slane %v3809_v16, 1  ;;  %v3818_v42 = vrot.slane %v3816_v25, 1 }
 0x2e1   : > { %v9023_v32 = vadd.f32 %v6470_v8, %v6469_v12  ;;  %v3814_v61 = vshrl.u32 %v9004_v13, 16  ;;  %v3821_v27 = vshll.u32 %v7276_v23, 16  ;;  %v9028_v6 = vsel %vm1323_vm10, %v3898_v4, %v3899_v51 }
 0x2e2   : > { %4807 = vmatmul.mubr.bf16.gmra.mrb[188].mxu0 %v8964_v30  ;;  %v9019_v17 = vsel %vm1114_vm8, %v3807_v21, %v3811_v60  ;;  %v3828_v10 = vshll.u32 %v9021_v7, 16  ;;  %v3901_v34 = vrot.slane %v8989_v15, 1  ;;  %v3902_v26 = vrot.slane %v7271_v14, 1  ;;  %v7284_v14 = vld [vmem:[#allocation2 + $0xbc] ss:$0 sps:$4 sm:$0x11]  }
 0x2e3   : > { %4814 = vmatprep.mubr.bf16.mxu0 %v8943_v29  ;;  %v3819_v57 = vor.u32 %v3818_v42, %v3814_v61  ;;  %v3823_v56 = vrot.slane %v3821_v27, 1  ;;  %v3826_v35 = vshrl.u32 %v9021_v7, 16  ;;  %v3833_v5 = vshll.u32 %v7279_v38, 16 }
 0x2e4   : > { %v3830_v46 = vrot.slane %v3828_v10, 1  ;;  %v9043_v62 = vsel %vm1323_vm10, %v3901_v34, %v3902_v26  ;;  %v3840_v21 = vshll.u32 %v9038_v53, 16  ;;  %v3904_v60 = vrot.slane %v9004_v13, 1  ;;  %v9069_v34 = vld [vmem:[#allocation2 + $0xc0] sm:$0xff]  }
 0x2e5   : > { %4654 = vmatmul.mubr.bf16.gmra.mrb[160].mxu1 %v8918_v49  ;;  %v9035_v1 = vsel %vm1114_vm8, %v3819_v57, %v3823_v56  ;;  %v3835_v25 = vrot.slane %v3833_v5, 1  ;;  %v3905_v12 = vrot.slane %v7276_v23, 1  ;;  %v3838_v8 = vshrl.u32 %v9038_v53, 16  ;;  %v7297_v5 = vld [vmem:[#allocation8 + $0x210] sm:$0xff]  }
 0x2e6   : > { %4661 = vmatprep.mubr.bf16.mxu1 %v8971_v55  ;;  %v3831_v16 = vor.u32 %v3830_v46, %v3826_v35  ;;  %v3842_v4 = vrot.slane %v3840_v21, 1  ;;  %v3845_v51 = vshll.u32 %v7284_v14, 16  ;;  %v3907_v23 = vrot.slane %v9021_v7, 1  ;;  %v7296_v35 = vld [vmem:[#allocation8 + $0x208] sm:$0xff]   ;;  %v7301_v21 = vld [vmem:[#allocation8 + $0x230] sm:$0xff]  }
 0x2e7   : > { %v9056_v42 = vsel %vm1323_vm10, %v3904_v60, %v3905_v12  ;;  %v3908_v10 = vrot.slane %v7279_v38, 1  ;;  %v3910_v26 = vrot.slane %v9038_v53, 1  ;;  %v3911_v46 = vrot.slane %v7284_v14, 1 }
 0x2e8   : > { %v9050_v0 = vsel %vm1114_vm8, %v3831_v16, %v3835_v25  ;;  %v3843_v61 = vor.u32 %v3842_v4, %v3838_v8  ;;  %v3847_v27 = vrot.slane %v3845_v51, 1  ;;  %v7317_v16 = vld [vmem:[#allocation2 + $0x18] sm:$0xff]  }
 0x2e9   : > { %v9067_v56 = vsel %vm1323_vm10, %v3907_v23, %v3908_v10  ;;  %v9077_v38 = vsel %vm1323_vm10, %v3910_v26, %v3911_v46  ;;  %v3941_v10 = vshll.u32 %v9069_v34, 16 }
 0x2ea   : > { %4815 = vmatmul.mubr.bf16.gmra.mrb[192].mxu0 %v8979_v19  ;;  %v9062_v57 = vsel %vm1114_vm8, %v3843_v61, %v3847_v27 }
 0x2eb   : > { %4822 = vmatprep.mubr.bf16.mxu0 %v8959_v43 }
 0x2ed   : > { %4662 = vmatmul.mubr.bf16.gmra.mrb[164].mxu1 %v8943_v29 }
 0x2ee   : > { %4669 = vmatprep.mubr.bf16.mxu1 %v8986_v2 }
 0x2f2   : > { %4823 = vmatmul.mubr.bf16.gmra.mrb[196].mxu0 %v8994_v54 }
 0x2f3   : > { %4830 = vmatprep.mubr.bf16.mxu0 %v8974_v24 }
 0x2f5   : > { %4670 = vmatmul.mubr.bf16.gmra.mrb[168].mxu1 %v8959_v43 }
 0x2f6   : > { %4677 = vmatprep.mubr.bf16.mxu1 %v9001_v45 }
 0x2fa   : > { %4831 = vmatmul.mubr.bf16.gmra.mrb[200].mxu0 %v9009_v58 }
 0x2fb   : > { %4838 = vmatprep.mubr.bf16.mxu0 %v8989_v15 }
 0x2fd   : > { %4678 = vmatmul.mubr.bf16.gmra.mrb[172].mxu1 %v8974_v24 }
 0x2fe   : > { %4685 = vmatprep.mubr.bf16.mxu1 %v9019_v17 }
 0x302   : > { %4839 = vmatmul.mubr.bf16.gmra.mrb[204].mxu0 %v9028_v6 }
 0x303   : > { %4846 = vmatprep.mubr.bf16.mxu0 %v9004_v13 }
 0x305   : > { %4686 = vmatmul.mubr.bf16.gmra.mrb[176].mxu1 %v8989_v15 }
 0x306   : > { %4693 = vmatprep.mubr.bf16.mxu1 %v9035_v1 }
 0x30a   : > { %4847 = vmatmul.mubr.bf16.gmra.mrb[208].mxu0 %v9043_v62 }
 0x30b   : > { %4854 = vmatprep.mubr.bf16.mxu0 %v9021_v7 }
 0x30d   : > { %4694 = vmatmul.mubr.bf16.gmra.mrb[180].mxu1 %v9004_v13 }
 0x30e   : > { %4701 = vmatprep.mubr.bf16.mxu1 %v9050_v0 }
 0x312   : > { %4855 = vmatmul.mubr.bf16.gmra.mrb[212].mxu0 %v9056_v42 }
 0x313   : > { %4862 = vmatprep.mubr.bf16.mxu0 %v9038_v53 }
 0x315   : > { %4702 = vmatmul.mubr.bf16.gmra.mrb[184].mxu1 %v9021_v7 }
 0x316   : > { %4709 = vmatprep.mubr.bf16.mxu1 %v9062_v57 }
 0x31a   : > { %4863 = vmatmul.mubr.bf16.gmra.mrb[216].mxu0 %v9067_v56 }
 0x31b   : > { %4870 = vmatprep.mubr.bf16.mxu0 %v9069_v34 }
 0x31d   : > { %4710 = vmatmul.mubr.bf16.gmra.mrb[188].mxu1 %v9038_v53 }
 0x31e   : > { %4911 = vmatprep.mubr.bf16.mxu1 %v8755_v33  ;;  %v7298_v33 = vld [vmem:[#allocation8 + $0x218] sm:$0xff]  }
 0x322   : > { %4871 = vmatmul.mubr.bf16.gmra.mrb[220].mxu0 %v9077_v38 }
 0x323   : > { %5072 = vmatprep.mubr.bf16.mxu0 %v8752_v31 }
 0x325   : > { %4912 = vmatmul.mubr.bf16.vlgmr.msra.gmra.mrb[192].mxu1 %v8732_v59  ;;  %v7299_v59 = vld [vmem:[#allocation8 + $0x220] sm:$0xff]  }
 0x326   : > { %4919 = vmatprep.mubr.bf16.mxu1 %v8786_v41  ;;  %6971 = vmatpush3.bf16.msra.mxu1 %v8765_v39  ;;  %v7300_v39 = vld [vmem:[#allocation8 + $0x228] sm:$0xff]  }
 0x327   : > { %6972 = vmatprep.subr.bf16.mxu1 %v7296_v35 }
 0x32a   : > { %5073 = vmatmul.mubr.bf16.vlgmr.msra.gmra.mrb[224].mxu0 %v7317_v16  ;;  %6973 = vmatpush3.bf16.msra.mxu1 %v7296_v35  ;;  %v7302_v35 = vld [vmem:[#allocation2 + $0xc8] ss:$0 sps:$4 sm:$0x11]   ;;  %v9144_v16 = vld [vmem:[#allocation2 + $0xcc] sm:$0xff]  }
 0x32b   : > { %5080 = vmatprep.mubr.bf16.mxu0 %v8782_v44  ;;  %6974 = vmatprep.subr.bf16.mxu1 %v7297_v5 }
 0x32d   : > { %4920 = vmatmul.mubr.bf16.gmra.mrb[196].mxu1 %v8752_v31  ;;  %v7303_v31 = vld [vmem:[#allocation8 + $0x238] sm:$0xff]  }
 0x32e   : > { %4927 = vmatprep.mubr.bf16.mxu1 %v8848_v20  ;;  %6975 = vmatpush3.bf16.msra.mxu1 %v7297_v5 }
 0x32f   : > { %6976 = vmatprep.subr.bf16.mxu1 %v7298_v33 }
 0x332   : > { %5081 = vmatmul.mubr.bf16.gmra.mrb[228].mxu0 %v8734_v40  ;;  %6977 = vmatpush3.bf16.msra.mxu1 %v7298_v33 }
 0x333   : > { %5088 = vmatprep.mubr.bf16.mxu0 %v8845_v48  ;;  %6978 = vmatprep.subr.bf16.mxu1 %v7299_v59 }
 0x335   : > { %4928 = vmatmul.mubr.bf16.gmra.mrb[200].mxu1 %v8782_v44 }
 0x336   : > { %4935 = vmatprep.mubr.bf16.mxu1 %v8894_v11  ;;  %6979 = vmatpush3.bf16.msra.mxu1 %v7299_v59 }
 0x337   : > { %6980 = vmatprep.subr.bf16.mxu1 %v7300_v39 }
 0x33a   : > { %5089 = vmatmul.mubr.bf16.gmra.mrb[232].mxu0 %v8790_v50  ;;  %6981 = vmatpush3.bf16.msra.mxu1 %v7300_v39 }
 0x33b   : > { %5096 = vmatprep.mubr.bf16.mxu0 %v8899_v47  ;;  %6982 = vmatprep.subr.bf16.mxu1 %v7301_v21 }
 0x33d   : > { %4936 = vmatmul.mubr.bf16.gmra.mrb[204].mxu1 %v8845_v48 }
 0x33e   : > { %4943 = vmatprep.mubr.bf16.mxu1 %v8915_v18  ;;  %6983 = vmatpush3.bf16.msra.mxu1 %v7301_v21 }
 0x33f   : > { %6984 = vmatprep.subr.bf16.mxu1 %v7303_v31 }
 0x342   : > { %5097 = vmatmul.mubr.bf16.gmra.mrb[236].mxu0 %v8850_v28  ;;  %6985 = vmatpush3.bf16.msra.mxu1 %v7303_v31 }
 0x343   : > { %5104 = vmatprep.mubr.bf16.mxu0 %v8925_v22 }
 0x345   : > { %4944 = vmatmul.mubr.bf16.gmra.mrb[208].mxu1 %v8899_v47 }
 0x346   : > { %4951 = vmatprep.mubr.bf16.mxu1 %v8948_v36 }
 0x34a   : > { %5105 = vmatmul.mubr.bf16.gmra.mrb[240].mxu0 %v8883_v3 }
 0x34b   : > { %5112 = vmatprep.mubr.bf16.mxu0 %v8939_v52 }
 0x34d   : > { %4952 = vmatmul.mubr.bf16.gmra.mrb[212].mxu1 %v8925_v22 }
 0x34e   : > { %4959 = vmatprep.mubr.bf16.mxu1 %v8964_v30 }
 0x351   : > { %v6578_v40 = vpop.f32.mrb[160].mxu0 }
 0x352   : > { %5113 = vmatmul.mubr.bf16.gmra.mrb[244].mxu0 %v8905_v9  ;;  %v6579_v44 = vpop.f32.mrb[161].mxu0 }
 0x353   : > { %5120 = vmatprep.mubr.bf16.mxu0 %v8955_v63  ;;  %v6580_v50 = vadd.f32 %v6579_v44, %v6578_v40  ;;  %v6581_v48 = vpop.f32.mrb[162].mxu0  ;;  %v3939_v40 = vshrl.u32 %v9069_v34, 16  ;;  %v3946_v44 = vshll.u32 %v7302_v35, 16 }
 0x354   : > { %v6582_v28 = vpop.f32.mrb[163].mxu0 }
 0x355   : > { %4960 = vmatmul.mubr.bf16.gmra.mrb[216].mxu1 %v8939_v52  ;;  %v9108_v3 = vadd.f32 %v6580_v50, %v9014_v37  ;;  %v6583_v47 = vadd.f32 %v6582_v28, %v6581_v48  ;;  %v9151_v48 = vld [vmem:[#allocation2 + $0xd4] ss:$0 sps:$4 sm:$0x11]   ;;  %v3967_v28 = vshll.u32 %v9144_v16, 16 }
 0x356   : > { %4967 = vmatprep.mubr.bf16.mxu1 %v8979_v19 }
 0x357   : > { %v9111_v22 = vadd.f32 %v6583_v47, %v9023_v32  ;;  %v3948_v47 = vrot.slane %v3946_v44, 1 }
 0x35a   : > { %5121 = vmatmul.mubr.bf16.gmra.mrb[248].mxu0 %v8918_v49 }
 0x35b   : > { %5128 = vmatprep.mubr.bf16.mxu0 %v8971_v55 }
 0x35d   : > { %4968 = vmatmul.mubr.bf16.gmra.mrb[220].mxu1 %v8955_v63 }
 0x35e   : > { %4975 = vmatprep.mubr.bf16.mxu1 %v8994_v54 }
 0x362   : > { %5129 = vmatmul.mubr.bf16.gmra.mrb[252].mxu0 %v8943_v29 }
 0x363   : > { %5136 = vmatprep.mubr.bf16.mxu0 %v8986_v2 }
 0x365   : > { %4976 = vmatmul.mubr.bf16.gmra.mrb[224].mxu1 %v8971_v55 }
 0x366   : > { %4983 = vmatprep.mubr.bf16.mxu1 %v9009_v58 }
 0x36a   : > { %5137 = vmatmul.mubr.bf16.gmra.mrb[0].mxu0 %v8959_v43 }
 0x36b   : > { %5144 = vmatprep.mubr.bf16.mxu0 %v9001_v45 }
 0x36d   : > { %4984 = vmatmul.mubr.bf16.gmra.mrb[228].mxu1 %v8986_v2 }
 0x36e   : > { %4991 = vmatprep.mubr.bf16.mxu1 %v9028_v6 }
 0x372   : > { %5145 = vmatmul.mubr.bf16.gmra.mrb[4].mxu0 %v8974_v24 }
 0x373   : > { %5152 = vmatprep.mubr.bf16.mxu0 %v9019_v17 }
 0x375   : > { %4992 = vmatmul.mubr.bf16.gmra.mrb[232].mxu1 %v9001_v45 }
 0x376   : > { %4999 = vmatprep.mubr.bf16.mxu1 %v9043_v62 }
 0x378   : > { %v6472_v9 = vpop.f32.mrb[132].mxu1 }
 0x379   : > { %v6473_v49 = vpop.f32.mrb[133].mxu1  ;;  %v6584_v29 = vpop.f32.mrb[164].mxu0 }
 0x37a   : > { %5153 = vmatmul.mubr.bf16.gmra.mrb[8].mxu0 %v8989_v15  ;;  %v6474_v52 = vadd.f32 %v6473_v49, %v6472_v9  ;;  %v6475_v63 = vpop.f32.mrb[134].mxu1  ;;  %v6585_v43 = vpop.f32.mrb[165].mxu0  ;;  %v3965_v9 = vshrl.u32 %v9144_v16, 16  ;;  %v3969_v49 = vrot.slane %v3967_v28, 1 }
 0x37b   : > { %5160 = vmatprep.mubr.bf16.mxu0 %v9035_v1  ;;  %v6476_v55 = vpop.f32.mrb[135].mxu1  ;;  %v6586_v2 = vadd.f32 %v6585_v43, %v6584_v29  ;;  %v6587_v24 = vpop.f32.mrb[166].mxu0  ;;  %v3952_v43 = vrot.slane %v7302_v35, 1 }
 0x37c   : > { %v6477_v37 = vadd.f32 %v6476_v55, %v6475_v63  ;;  %v6588_v32 = vpop.f32.mrb[167].mxu0  ;;  %v3951_v63 = vrot.slane %v9069_v34, 1 }
 0x37d   : > { %5000 = vmatmul.mubr.bf16.gmra.mrb[236].mxu1 %v9019_v17  ;;  %v9133_v45 = vadd.f32 %v6586_v2, %v6474_v52  ;;  %v6589_v25 = vadd.f32 %v6588_v32, %v6587_v24  ;;  %v3972_v52 = vshll.u32 %v9151_v48, 16 }
 0x37e   : > { %5007 = vmatprep.mubr.bf16.mxu1 %v9056_v42 }
 0x37f   : > { %v9135_v14 = vadd.f32 %v6589_v25, %v6477_v37 }
 0x380   : > { %v6478_v15 = vpop.f32.mrb[136].mxu1 }
 0x381   : > { %v6479_v60 = vpop.f32.mrb[137].mxu1 }
 0x382   : > { %5161 = vmatmul.mubr.bf16.gmra.mrb[12].mxu0 %v9004_v13  ;;  %v6480_v12 = vadd.f32 %v6479_v60, %v6478_v15  ;;  %v6481_v4 = vpop.f32.mrb[138].mxu1 }
 0x383   : > { %5168 = vmatprep.mubr.bf16.mxu0 %v9050_v0  ;;  %v6482_v8 = vpop.f32.mrb[139].mxu1 }
 0x384   : > { %v6590_v51 = vpop.f32.mrb[168].mxu0  ;;  %v6483_v61 = vadd.f32 %v6482_v8, %v6481_v4  ;;  %v3974_v4 = vrot.slane %v3972_v52, 1 }
 0x385   : > { %5008 = vmatmul.mubr.bf16.gmra.mrb[240].mxu1 %v9035_v1  ;;  %v6591_v17 = vpop.f32.mrb[169].mxu0  ;;  %v3943_v1 = vrot.slane %v3941_v10, 1 }
 0x386   : > { %5015 = vmatprep.mubr.bf16.mxu1 %v9067_v56  ;;  %v6592_v27 = vadd.f32 %v6591_v17, %v6590_v51  ;;  %v6593_v23 = vpop.f32.mrb[170].mxu0 }
 0x387   : > { %v6594_v26 = vpop.f32.mrb[171].mxu0 }
 0x388   : > { %v9142_v46 = vadd.f32 %v6592_v27, %v6480_v12  ;;  %v6595_v13 = vadd.f32 %v6594_v26, %v6593_v23  ;;  %v6484_v5 = vpop.f32.mrb[140].mxu1  ;;  %v3970_v12 = vor.u32 %v3969_v49, %v3965_v9 }
 0x389   : > { %v6485_v33 = vpop.f32.mrb[141].mxu1 }
 0x38a   : > { %5169 = vmatmul.mubr.bf16.gmra.mrb[16].mxu0 %v9021_v7  ;;  %v9147_v59 = vadd.f32 %v6595_v13, %v6483_v61  ;;  %v6486_v39 = vadd.f32 %v6485_v33, %v6484_v5  ;;  %v6487_v21 = vpop.f32.mrb[142].mxu1  ;;  %v3944_v7 = vor.u32 %v3943_v1, %v3939_v40  ;;  %v3975_v23 = vsel %vm1114_vm8, %v3970_v12, %v3974_v4 }
 0x38b   : > { %5176 = vmatprep.mubr.bf16.mxu0 %v9062_v57  ;;  %v6488_v31 = vpop.f32.mrb[143].mxu1 }
 0x38c   : > { %v6489_v50 = vadd.f32 %v6488_v31, %v6487_v21  ;;  %v3949_v55 = vsel %vm1114_vm8, %v3944_v7, %v3948_v47 }
 0x38d   : > { %5016 = vmatmul.mubr.bf16.gmra.mrb[244].mxu1 %v9050_v0 }
 0x38e   : > { %5023 = vmatprep.mubr.bf16.mxu1 %v9077_v38 }
 0x38f   : > { %v6596_v29 = vpop.f32.mrb[172].mxu0 }
 0x390   : > { %v6597_v2 = vpop.f32.mrb[173].mxu0 }
 0x391   : > { %v6598_v0 = vadd.f32 %v6597_v2, %v6596_v29  ;;  %v6599_v24 = vpop.f32.mrb[174].mxu0 }
 0x392   : > { %5177 = vmatmul.mubr.bf16.gmra.mrb[20].mxu0 %v9038_v53  ;;  %v6490_v37 = vpop.f32.mrb[144].mxu1  ;;  %v6600_v25 = vpop.f32.mrb[175].mxu0  ;;  %v9165_v53 = vsel %vm1323_vm10, %v3951_v63, %v3952_v43 }
 0x393   : > { %5184 = vmatprep.mubr.bf16.mxu0 %v3949_v55  ;;  %v6491_v32 = vpop.f32.mrb[145].mxu1  ;;  %v9161_v8 = vadd.f32 %v6598_v0, %v6486_v39  ;;  %v6601_v51 = vadd.f32 %v6600_v25, %v6599_v24 }
 0x394   : > { %v6492_v15 = vadd.f32 %v6491_v32, %v6490_v37  ;;  %v6493_v60 = vpop.f32.mrb[146].mxu1 }
 0x395   : > { %5024 = vmatmul.mubr.bf16.gmra.mrb[248].mxu1 %v9062_v57  ;;  %v6494_v61 = vpop.f32.mrb[147].mxu1  ;;  %v9168_v27 = vadd.f32 %v6601_v51, %v6489_v50 }
 0x396   : > { %5031 = vmatprep.mubr.bf16.mxu1 %v9165_v53  ;;  %v6495_v17 = vadd.f32 %v6494_v61, %v6493_v60 }
 0x39a   : > { %5185 = vmatmul.mubr.bf16.gmra.mrb[24].mxu0 %v9069_v34 }
 0x39b   : > { %5192 = vmatprep.mubr.bf16.mxu0 %v3975_v23 }
 0x39d   : > { %v6602_v10 = vpop.f32.mrb[176].mxu0  ;;  %5032 = vmatmul.mubr.bf16.gmra.mrb[252].mxu1 %v3949_v55 }
 0x39e   : > { %v6603_v26 = vpop.f32.mrb[177].mxu0  ;;  %6986 = vmatprep.mubr.bf16.mxu1 %v8786_v41 }
 0x39f   : > { %v6604_v57 = vadd.f32 %v6603_v26, %v6602_v10  ;;  %v6605_v13 = vpop.f32.mrb[178].mxu0 }
 0x3a0   : > { %v6606_v35 = vpop.f32.mrb[179].mxu0  ;;  %v6496_v5 = vpop.f32.mrb[148].mxu1 }
 0x3a1   : > { %v9173_v33 = vadd.f32 %v6604_v57, %v6492_v15  ;;  %v6607_v1 = vadd.f32 %v6606_v35, %v6605_v13  ;;  %v6497_v39 = vpop.f32.mrb[149].mxu1 }
 0x3a2   : > { %5193 = vmatmul.mubr.bf16.gmra.mrb[28].mxu0 %v9144_v16  ;;  %v6498_v21 = vadd.f32 %v6497_v39, %v6496_v5  ;;  %v6499_v31 = vpop.f32.mrb[150].mxu1 }
 0x3a3   : > { %v9176_v40 = vadd.f32 %v6607_v1, %v6495_v17  ;;  %v6500_v34 = vpop.f32.mrb[151].mxu1 }
 0x3a4   : > { %v6501_v44 = vadd.f32 %v6500_v34, %v6499_v31 }
 0x3a5   : > { %v6608_v50 = vpop.f32.mrb[180].mxu0  ;;  %6987 = vmatmul.mubr.bf16.vlgmr.msra.gmra.mrb[0].mxu1 %v8848_v20 }
 0x3a6   : > { %v6609_v41 = vpop.f32.mrb[181].mxu0  ;;  %6990 = vmatprep.mubr.bf16.mxu1 %v8894_v11 }
 0x3a7   : > { %v6610_v28 = vadd.f32 %v6609_v41, %v6608_v50  ;;  %v6611_v7 = vpop.f32.mrb[182].mxu0 }
 0x3a8   : > { %v6612_v47 = vpop.f32.mrb[183].mxu0  ;;  %v6502_v9 = vpop.f32.mrb[152].mxu1 }
 0x3a9   : > { %v9180_v49 = vadd.f32 %v6610_v28, %v6498_v21  ;;  %v6613_v52 = vadd.f32 %v6612_v47, %v6611_v7  ;;  %v6503_v29 = vpop.f32.mrb[153].mxu1 }
 0x3aa   : > { %v6504_v63 = vadd.f32 %v6503_v29, %v6502_v9  ;;  %v6505_v43 = vpop.f32.mrb[154].mxu1 }
 0x3ab   : > { %v9182_v55 = vadd.f32 %v6613_v52, %v6501_v44  ;;  %v6506_v2 = vpop.f32.mrb[155].mxu1 }
 0x3ac   : > { %v6507_v37 = vadd.f32 %v6506_v2, %v6505_v43 }
 0x3ad   : > { %v6614_v0 = vpop.f32.mrb[184].mxu0  ;;  %6991 = vmatmul.mubr.bf16.gmra.mrb[4].mxu1 %v8915_v18 }
 0x3ae   : > { %v6615_v20 = vpop.f32.mrb[185].mxu0  ;;  %6994 = vmatprep.mubr.bf16.mxu1 %v8948_v36 }
 0x3af   : > { %v6616_v11 = vadd.f32 %v6615_v20, %v6614_v0  ;;  %v6617_v24 = vpop.f32.mrb[186].mxu0 }
 0x3b0   : > { %v6618_v32 = vpop.f32.mrb[187].mxu0  ;;  %v6508_v25 = vpop.f32.mrb[156].mxu1 }
 0x3b1   : > { %v9186_v15 = vadd.f32 %v6616_v11, %v6504_v63  ;;  %v6619_v60 = vadd.f32 %v6618_v32, %v6617_v24  ;;  %v6509_v12 = vpop.f32.mrb[157].mxu1 }
 0x3b2   : > { %v6510_v4 = vadd.f32 %v6509_v12, %v6508_v25  ;;  %v6511_v51 = vpop.f32.mrb[158].mxu1 }
 0x3b3   : > { %v9188_v61 = vadd.f32 %v6619_v60, %v6507_v37  ;;  %v6512_v17 = vpop.f32.mrb[159].mxu1 }
 0x3b4   : > { %v6513_v23 = vadd.f32 %v6512_v17, %v6511_v51 }
 0x3b5   : > { %v6620_v10 = vpop.f32.mrb[188].mxu0  ;;  %6995 = vmatmul.mubr.bf16.gmra.mrb[8].mxu1 %v8964_v30 }
 0x3b6   : > { %v6621_v18 = vpop.f32.mrb[189].mxu0  ;;  %6998 = vmatprep.mubr.bf16.mxu1 %v8979_v19 }
 0x3b7   : > { %v6622_v36 = vadd.f32 %v6621_v18, %v6620_v10  ;;  %v6623_v26 = vpop.f32.mrb[190].mxu0 }
 0x3b8   : > { %v6624_v57 = vpop.f32.mrb[191].mxu0  ;;  %v6514_v13 = vpop.f32.mrb[160].mxu1 }
 0x3b9   : > { %v9192_v35 = vadd.f32 %v6622_v36, %v6510_v4  ;;  %v6625_v5 = vadd.f32 %v6624_v57, %v6623_v26  ;;  %v6515_v1 = vpop.f32.mrb[161].mxu1 }
 0x3ba   : > { %v6516_v39 = vadd.f32 %v6515_v1, %v6514_v13  ;;  %v6517_v21 = vpop.f32.mrb[162].mxu1 }
 0x3bb   : > { %v9194_v31 = vadd.f32 %v6625_v5, %v6513_v23  ;;  %v6518_v34 = vpop.f32.mrb[163].mxu1 }
 0x3bc   : > { %v6519_v44 = vadd.f32 %v6518_v34, %v6517_v21 }
 0x3bd   : > { %v6626_v50 = vpop.f32.mrb[192].mxu0  ;;  %6999 = vmatmul.mubr.bf16.gmra.mrb[12].mxu1 %v8994_v54 }
 0x3be   : > { %v6627_v30 = vpop.f32.mrb[193].mxu0  ;;  %7002 = vmatprep.mubr.bf16.mxu1 %v9009_v58 }
 0x3bf   : > { %v6628_v19 = vadd.f32 %v6627_v30, %v6626_v50  ;;  %v6629_v41 = vpop.f32.mrb[194].mxu0  ;;  %v3977_v30 = vrot.slane %v9144_v16, 1 }
 0x3c0   : > { %v6630_v28 = vpop.f32.mrb[195].mxu0  ;;  %v6520_v7 = vpop.f32.mrb[164].mxu1 }
 0x3c1   : > { %v9198_v47 = vadd.f32 %v6628_v19, %v6516_v39  ;;  %v6631_v9 = vadd.f32 %v6630_v28, %v6629_v41  ;;  %v6521_v52 = vpop.f32.mrb[165].mxu1 }
 0x3c2   : > { %v6522_v29 = vadd.f32 %v6521_v52, %v6520_v7  ;;  %v6523_v63 = vpop.f32.mrb[166].mxu1 }
 0x3c3   : > { %v9200_v43 = vadd.f32 %v6631_v9, %v6519_v44  ;;  %v6524_v2 = vpop.f32.mrb[167].mxu1 }
 0x3c4   : > { %v6525_v37 = vadd.f32 %v6524_v2, %v6523_v63 }
 0x3c5   : > { %v6632_v0 = vpop.f32.mrb[196].mxu0  ;;  %7003 = vmatmul.mubr.bf16.gmra.mrb[16].mxu1 %v9028_v6 }
 0x3c6   : > { %v6633_v54 = vpop.f32.mrb[197].mxu0  ;;  %7006 = vmatprep.mubr.bf16.mxu1 %v9043_v62 }
 0x3c7   : > { %v6634_v58 = vadd.f32 %v6633_v54, %v6632_v0  ;;  %v6635_v20 = vpop.f32.mrb[198].mxu0 }
 0x3c8   : > { %v6636_v11 = vpop.f32.mrb[199].mxu0  ;;  %v6526_v24 = vpop.f32.mrb[168].mxu1 }
 0x3c9   : > { %v9204_v32 = vadd.f32 %v6634_v58, %v6522_v29  ;;  %v6637_v25 = vadd.f32 %v6636_v11, %v6635_v20  ;;  %v6527_v60 = vpop.f32.mrb[169].mxu1 }
 0x3ca   : > { %v6528_v12 = vadd.f32 %v6527_v60, %v6526_v24  ;;  %v6529_v4 = vpop.f32.mrb[170].mxu1 }
 0x3cb   : > { %v9206_v51 = vadd.f32 %v6637_v25, %v6525_v37  ;;  %v6530_v17 = vpop.f32.mrb[171].mxu1 }
 0x3cc   : > { %v6531_v23 = vadd.f32 %v6530_v17, %v6529_v4 }
 0x3cd   : > { %v6638_v10 = vpop.f32.mrb[200].mxu0  ;;  %7007 = vmatmul.mubr.bf16.gmra.mrb[20].mxu1 %v9056_v42  ;;  %v3978_v42 = vrot.slane %v9151_v48, 1 }
 0x3ce   : > { %v6639_v6 = vpop.f32.mrb[201].mxu0  ;;  %7010 = vmatprep.mubr.bf16.mxu1 %v9067_v56 }
 0x3cf   : > { %v6640_v62 = vadd.f32 %v6639_v6, %v6638_v10  ;;  %v6641_v18 = vpop.f32.mrb[202].mxu0  ;;  %v3979_v37 = vsel %vm1323_vm10, %v3977_v30, %v3978_v42 }
 0x3d0   : > { %v6642_v36 = vpop.f32.mrb[203].mxu0  ;;  %v6532_v26 = vpop.f32.mrb[172].mxu1 }
 0x3d1   : > { %v9210_v57 = vadd.f32 %v6640_v62, %v6528_v12  ;;  %v6643_v13 = vadd.f32 %v6642_v36, %v6641_v18  ;;  %v6533_v5 = vpop.f32.mrb[173].mxu1 }
 0x3d2   : > { %v6534_v1 = vadd.f32 %v6533_v5, %v6532_v26  ;;  %v6535_v39 = vpop.f32.mrb[174].mxu1 }
 0x3d3   : > { %v9212_v21 = vadd.f32 %v6643_v13, %v6531_v23  ;;  %v6536_v34 = vpop.f32.mrb[175].mxu1 }
 0x3d4   : > { %v6537_v44 = vadd.f32 %v6536_v34, %v6535_v39 }
 0x3d5   : > { %v6644_v50 = vpop.f32.mrb[204].mxu0  ;;  %7011 = vmatmul.mubr.bf16.gmra.mrb[24].mxu1 %v9077_v38 }
 0x3d6   : > { %v6645_v56 = vpop.f32.mrb[205].mxu0  ;;  %7014 = vmatprep.mubr.bf16.mxu1 %v9165_v53 }
 0x3d7   : > { %v6646_v19 = vadd.f32 %v6645_v56, %v6644_v50  ;;  %v6647_v41 = vpop.f32.mrb[206].mxu0 }
 0x3d8   : > { %v6648_v28 = vpop.f32.mrb[207].mxu0  ;;  %v6538_v7 = vpop.f32.mrb[176].mxu1 }
 0x3d9   : > { %v9218_v9 = vadd.f32 %v6646_v19, %v6534_v1  ;;  %v6649_v52 = vadd.f32 %v6648_v28, %v6647_v41  ;;  %v6539_v29 = vpop.f32.mrb[177].mxu1 }
 0x3da   : > { %v6540_v63 = vadd.f32 %v6539_v29, %v6538_v7  ;;  %v6541_v2 = vpop.f32.mrb[178].mxu1 }
 0x3db   : > { %v9221_v38 = vadd.f32 %v6649_v52, %v6537_v44  ;;  %v6542_v48 = vpop.f32.mrb[179].mxu1 }
 0x3dc   : > { %v6543_v0 = vadd.f32 %v6542_v48, %v6541_v2 }
 0x3dd   : > { %v6650_v54 = vpop.f32.mrb[208].mxu0  ;;  %7015 = vmatmul.mubr.bf16.gmra.mrb[28].mxu1 %v3979_v37 }
 0x3de   : > { %v6651_v53 = vpop.f32.mrb[209].mxu0 }
 0x3df   : > { %v6652_v16 = vadd.f32 %v6651_v53, %v6650_v54  ;;  %v6653_v58 = vpop.f32.mrb[210].mxu0 }
 0x3e0   : > { %v6654_v20 = vpop.f32.mrb[211].mxu0  ;;  %v6544_v11 = vpop.f32.mrb[180].mxu1 }
 0x3e1   : > { %v9223_v24 = vadd.f32 %v6652_v16, %v6540_v63  ;;  %v6655_v25 = vadd.f32 %v6654_v20, %v6653_v58  ;;  %v6545_v60 = vpop.f32.mrb[181].mxu1 }
 0x3e2   : > { %v6546_v12 = vadd.f32 %v6545_v60, %v6544_v11  ;;  %v6547_v4 = vpop.f32.mrb[182].mxu1 }
 0x3e3   : > { %v9225_v17 = vadd.f32 %v6655_v25, %v6543_v0  ;;  %v6548_v23 = vpop.f32.mrb[183].mxu1 }
 0x3e4   : > { %v6549_v10 = vadd.f32 %v6548_v23, %v6547_v4 }
 0x3e5   : > { %v6656_v6 = vpop.f32.mrb[212].mxu0 }
 0x3e6   : > { %v6657_v62 = vpop.f32.mrb[213].mxu0 }
 0x3e7   : > { %v6658_v18 = vadd.f32 %v6657_v62, %v6656_v6  ;;  %v6659_v36 = vpop.f32.mrb[214].mxu0 }
 0x3e8   : > { %v6660_v26 = vpop.f32.mrb[215].mxu0  ;;  %v6550_v13 = vpop.f32.mrb[184].mxu1 }
 0x3e9   : > { %v9227_v5 = vadd.f32 %v6658_v18, %v6546_v12  ;;  %v6661_v1 = vadd.f32 %v6660_v26, %v6659_v36  ;;  %v6551_v39 = vpop.f32.mrb[185].mxu1 }
 0x3ea   : > { %v6552_v34 = vadd.f32 %v6551_v39, %v6550_v13  ;;  %v6553_v44 = vpop.f32.mrb[186].mxu1 }
 0x3eb   : > { %v9229_v50 = vadd.f32 %v6661_v1, %v6549_v10  ;;  %v6554_v42 = vpop.f32.mrb[187].mxu1 }
 0x3ec   : > { %v6555_v56 = vadd.f32 %v6554_v42, %v6553_v44 }
 0x3ed   : > { %v6662_v30 = vpop.f32.mrb[216].mxu0 }
 0x3ee   : > { %v6663_v19 = vpop.f32.mrb[217].mxu0 }
 0x3ef   : > { %v6664_v41 = vadd.f32 %v6663_v19, %v6662_v30  ;;  %v6665_v28 = vpop.f32.mrb[218].mxu0 }
 0x3f0   : > { %v6666_v7 = vpop.f32.mrb[219].mxu0  ;;  %v6556_v52 = vpop.f32.mrb[188].mxu1 }
 0x3f1   : > { %v9231_v29 = vadd.f32 %v6664_v41, %v6552_v34  ;;  %v6667_v63 = vadd.f32 %v6666_v7, %v6665_v28  ;;  %v6557_v2 = vpop.f32.mrb[189].mxu1 }
 0x3f2   : > { %v6558_v37 = vadd.f32 %v6557_v2, %v6556_v52  ;;  %v6559_v48 = vpop.f32.mrb[190].mxu1 }
 0x3f3   : > { %v9233_v0 = vadd.f32 %v6667_v63, %v6555_v56  ;;  %v6560_v54 = vpop.f32.mrb[191].mxu1 }
 0x3f4   : > { %v6561_v53 = vadd.f32 %v6560_v54, %v6559_v48 }
 0x3f5   : > { %v6668_v16 = vpop.f32.mrb[220].mxu0 }
 0x3f6   : > { %v6669_v58 = vpop.f32.mrb[221].mxu0 }
 0x3f7   : > { %v6670_v20 = vadd.f32 %v6669_v58, %v6668_v16  ;;  %v6671_v11 = vpop.f32.mrb[222].mxu0 }
 0x3f8   : > { %v6672_v25 = vpop.f32.mrb[223].mxu0  ;;  %v6690_v60 = vpop.f32.mrb[192].mxu1 }
 0x3f9   : > { %v9235_v12 = vadd.f32 %v6670_v20, %v6558_v37  ;;  %v6673_v4 = vadd.f32 %v6672_v25, %v6671_v11  ;;  %v6691_v23 = vpop.f32.mrb[193].mxu1 }
 0x3fa   : > { %v6692_v10 = vadd.f32 %v6691_v23, %v6690_v60  ;;  %v6693_v6 = vpop.f32.mrb[194].mxu1 }
 0x3fb   : > { %v9237_v62 = vadd.f32 %v6673_v4, %v6561_v53  ;;  %v6694_v18 = vpop.f32.mrb[195].mxu1 }
 0x3fc   : > { %v4914_v36 = vadd.f32 %v6692_v10, %v9108_v3  ;;  %v6695_v26 = vadd.f32 %v6694_v18, %v6693_v6 }
 0x3fd   : > { %v6802_v13 = vpop.f32.mrb[224].mxu0 }
 0x3fe   : > { %v6803_v1 = vpop.f32.mrb[225].mxu0  ;;  %v4917_v39 = vadd.f32 %v6695_v26, %v9111_v22 }
 0x3ff   : > { %v6804_v34 = vadd.f32 %v6803_v1, %v6802_v13  ;;  %v6805_v44 = vpop.f32.mrb[226].mxu0 }
 0x400   : > { %v6806_v42 = vpop.f32.mrb[227].mxu0  ;;  %v6696_v56 = vpop.f32.mrb[196].mxu1 }
 0x401   : > { %v6807_v30 = vadd.f32 %v6806_v42, %v6805_v44  ;;  %v6697_v19 = vpop.f32.mrb[197].mxu1  ;;  %v9241_v41 = vadd.f32 %v6804_v34, %v4914_v36 }
 0x402   : > { %v6698_v28 = vadd.f32 %v6697_v19, %v6696_v56  ;;  %v6699_v7 = vpop.f32.mrb[198].mxu1 }
 0x403   : > { %v6700_v52 = vpop.f32.mrb[199].mxu1  ;;  %v9243_v63 = vadd.f32 %v6807_v30, %v4917_v39 }
 0x404   : > { %v4922_v3 = vadd.f32 %v6698_v28, %v9133_v45  ;;  %v6701_v2 = vadd.f32 %v6700_v52, %v6699_v7 }
 0x405   : > { %v6808_v37 = vpop.f32.mrb[228].mxu0 }
 0x406   : > { %v6809_v48 = vpop.f32.mrb[229].mxu0  ;;  %v4925_v22 = vadd.f32 %v6701_v2, %v9135_v14 }
 0x407   : > { %v6810_v54 = vadd.f32 %v6809_v48, %v6808_v37  ;;  %v6811_v53 = vpop.f32.mrb[230].mxu0 }
 0x408   : > { %v6812_v16 = vpop.f32.mrb[231].mxu0  ;;  %v6702_v58 = vpop.f32.mrb[200].mxu1 }
 0x409   : > { %v6813_v20 = vadd.f32 %v6812_v16, %v6811_v53  ;;  %v6703_v11 = vpop.f32.mrb[201].mxu1  ;;  %v9247_v25 = vadd.f32 %v6810_v54, %v4922_v3 }
 0x40a   : > { %v6704_v60 = vadd.f32 %v6703_v11, %v6702_v58  ;;  %v6705_v4 = vpop.f32.mrb[202].mxu1 }
 0x40b   : > { %v6706_v23 = vpop.f32.mrb[203].mxu1  ;;  %v9249_v10 = vadd.f32 %v6813_v20, %v4925_v22 }
 0x40c   : > { %v4930_v45 = vadd.f32 %v6704_v60, %v9142_v46  ;;  %v6707_v6 = vadd.f32 %v6706_v23, %v6705_v4 }
 0x40d   : > { %v6814_v18 = vpop.f32.mrb[232].mxu0 }
 0x40e   : > { %v6815_v36 = vpop.f32.mrb[233].mxu0  ;;  %v4933_v14 = vadd.f32 %v6707_v6, %v9147_v59 }
 0x40f   : > { %v6816_v26 = vadd.f32 %v6815_v36, %v6814_v18  ;;  %v6817_v13 = vpop.f32.mrb[234].mxu0 }
 0x410   : > { %v6818_v1 = vpop.f32.mrb[235].mxu0  ;;  %v6708_v39 = vpop.f32.mrb[204].mxu1 }
 0x411   : > { %v6819_v34 = vadd.f32 %v6818_v1, %v6817_v13  ;;  %v6709_v44 = vpop.f32.mrb[205].mxu1  ;;  %v9253_v42 = vadd.f32 %v6816_v26, %v4930_v45 }
 0x412   : > { %v6710_v56 = vadd.f32 %v6709_v44, %v6708_v39  ;;  %v6711_v30 = vpop.f32.mrb[206].mxu1 }
 0x413   : > { %v6712_v19 = vpop.f32.mrb[207].mxu1  ;;  %v9255_v28 = vadd.f32 %v6819_v34, %v4933_v14 }
 0x414   : > { %v4938_v46 = vadd.f32 %v6710_v56, %v9161_v8  ;;  %v6713_v7 = vadd.f32 %v6712_v19, %v6711_v30 }
 0x415   : > { %v6820_v52 = vpop.f32.mrb[236].mxu0 }
 0x416   : > { %v6821_v3 = vpop.f32.mrb[237].mxu0  ;;  %v4941_v59 = vadd.f32 %v6713_v7, %v9168_v27 }
 0x417   : > { %v6822_v2 = vadd.f32 %v6821_v3, %v6820_v52  ;;  %v6823_v37 = vpop.f32.mrb[238].mxu0 }
 0x418   : > { %v6824_v48 = vpop.f32.mrb[239].mxu0  ;;  %v6714_v22 = vpop.f32.mrb[208].mxu1 }
 0x419   : > { %v6825_v54 = vadd.f32 %v6824_v48, %v6823_v37  ;;  %v6715_v53 = vpop.f32.mrb[209].mxu1  ;;  %v9259_v16 = vadd.f32 %v6822_v2, %v4938_v46 }
 0x41a   : > { %v6716_v58 = vadd.f32 %v6715_v53, %v6714_v22  ;;  %v6717_v20 = vpop.f32.mrb[210].mxu1 }
 0x41b   : > { %v6718_v11 = vpop.f32.mrb[211].mxu1  ;;  %v9261_v60 = vadd.f32 %v6825_v54, %v4941_v59 }
 0x41c   : > { %v4946_v8 = vadd.f32 %v6716_v58, %v9173_v33  ;;  %v6719_v4 = vadd.f32 %v6718_v11, %v6717_v20 }
 0x41d   : > { %v6826_v23 = vpop.f32.mrb[240].mxu0 }
 0x41e   : > { %v6827_v45 = vpop.f32.mrb[241].mxu0  ;;  %v4949_v27 = vadd.f32 %v6719_v4, %v9176_v40 }
 0x41f   : > { %v6828_v6 = vadd.f32 %v6827_v45, %v6826_v23  ;;  %v6829_v18 = vpop.f32.mrb[242].mxu0 }
 0x420   : > { %v6830_v36 = vpop.f32.mrb[243].mxu0  ;;  %v6720_v14 = vpop.f32.mrb[212].mxu1 }
 0x421   : > { %v6831_v26 = vadd.f32 %v6830_v36, %v6829_v18  ;;  %v6721_v13 = vpop.f32.mrb[213].mxu1  ;;  %v9265_v1 = vadd.f32 %v6828_v6, %v4946_v8 }
 0x422   : > { %v6722_v39 = vadd.f32 %v6721_v13, %v6720_v14  ;;  %v6723_v34 = vpop.f32.mrb[214].mxu1 }
 0x423   : > { %v6724_v44 = vpop.f32.mrb[215].mxu1  ;;  %v9267_v56 = vadd.f32 %v6831_v26, %v4949_v27 }
 0x424   : > { %v4954_v33 = vadd.f32 %v6722_v39, %v9180_v49  ;;  %v6725_v30 = vadd.f32 %v6724_v44, %v6723_v34 }
 0x425   : > { %v6832_v19 = vpop.f32.mrb[244].mxu0 }
 0x426   : > { %v6833_v46 = vpop.f32.mrb[245].mxu0  ;;  %v4957_v40 = vadd.f32 %v6725_v30, %v9182_v55 }
 0x427   : > { %v6834_v7 = vadd.f32 %v6833_v46, %v6832_v19  ;;  %v6835_v52 = vpop.f32.mrb[246].mxu0 }
 0x428   : > { %v6836_v3 = vpop.f32.mrb[247].mxu0  ;;  %v6726_v59 = vpop.f32.mrb[216].mxu1 }
 0x429   : > { %v6837_v2 = vadd.f32 %v6836_v3, %v6835_v52  ;;  %v6727_v37 = vpop.f32.mrb[217].mxu1  ;;  %v9271_v48 = vadd.f32 %v6834_v7, %v4954_v33 }
 0x42a   : > { %v6728_v22 = vadd.f32 %v6727_v37, %v6726_v59  ;;  %v6729_v54 = vpop.f32.mrb[218].mxu1 }
 0x42b   : > { %v6730_v53 = vpop.f32.mrb[219].mxu1  ;;  %v9273_v58 = vadd.f32 %v6837_v2, %v4957_v40 }
 0x42c   : > { %v4962_v49 = vadd.f32 %v6728_v22, %v9186_v15  ;;  %v6731_v20 = vadd.f32 %v6730_v53, %v6729_v54 }
 0x42d   : > { %v6838_v11 = vpop.f32.mrb[248].mxu0 }
 0x42e   : > { %v6839_v8 = vpop.f32.mrb[249].mxu0  ;;  %v4965_v55 = vadd.f32 %v6731_v20, %v9188_v61 }
 0x42f   : > { %v6840_v4 = vadd.f32 %v6839_v8, %v6838_v11  ;;  %v6841_v23 = vpop.f32.mrb[250].mxu0 }
 0x430   : > { %v6842_v45 = vpop.f32.mrb[251].mxu0  ;;  %v6732_v27 = vpop.f32.mrb[220].mxu1 }
 0x431   : > { %v6843_v6 = vadd.f32 %v6842_v45, %v6841_v23  ;;  %v6733_v18 = vpop.f32.mrb[221].mxu1  ;;  %v9277_v36 = vadd.f32 %v6840_v4, %v4962_v49 }
 0x432   : > { %v6734_v14 = vadd.f32 %v6733_v18, %v6732_v27  ;;  %v6735_v26 = vpop.f32.mrb[222].mxu1 }
 0x433   : > { %v6736_v13 = vpop.f32.mrb[223].mxu1  ;;  %v9279_v39 = vadd.f32 %v6843_v6, %v4965_v55 }
 0x434   : > { %v4970_v15 = vadd.f32 %v6734_v14, %v9192_v35  ;;  %v6737_v34 = vadd.f32 %v6736_v13, %v6735_v26 }
 0x435   : > { %v6844_v44 = vpop.f32.mrb[252].mxu0 }
 0x436   : > { %v6845_v33 = vpop.f32.mrb[253].mxu0  ;;  %v4973_v61 = vadd.f32 %v6737_v34, %v9194_v31 }
 0x437   : > { %v6846_v30 = vadd.f32 %v6845_v33, %v6844_v44  ;;  %v6847_v19 = vpop.f32.mrb[254].mxu0 }
 0x438   : > { %v6848_v46 = vpop.f32.mrb[255].mxu0  ;;  %v6738_v40 = vpop.f32.mrb[224].mxu1 }
 0x439   : > { %v6849_v7 = vadd.f32 %v6848_v46, %v6847_v19  ;;  %v6739_v52 = vpop.f32.mrb[225].mxu1  ;;  %v9283_v3 = vadd.f32 %v6846_v30, %v4970_v15 }
 0x43a   : > { %v6740_v59 = vadd.f32 %v6739_v52, %v6738_v40  ;;  %v6741_v2 = vpop.f32.mrb[226].mxu1 }
 0x43b   : > { %v6742_v37 = vpop.f32.mrb[227].mxu1  ;;  %v9285_v22 = vadd.f32 %v6849_v7, %v4973_v61 }
 0x43c   : > { %v4978_v35 = vadd.f32 %v6740_v59, %v9198_v47  ;;  %v6743_v54 = vadd.f32 %v6742_v37, %v6741_v2 }
 0x43d   : > { %v6850_v53 = vpop.f32.mrb[0].mxu0 }
 0x43e   : > { %v6851_v49 = vpop.f32.mrb[1].mxu0  ;;  %v4981_v31 = vadd.f32 %v6743_v54, %v9200_v43 }
 0x43f   : > { %v6852_v20 = vadd.f32 %v6851_v49, %v6850_v53  ;;  %v6853_v11 = vpop.f32.mrb[2].mxu0 }
 0x440   : > { %v6854_v8 = vpop.f32.mrb[3].mxu0  ;;  %v6744_v55 = vpop.f32.mrb[228].mxu1 }
 0x441   : > { %v6855_v4 = vadd.f32 %v6854_v8, %v6853_v11  ;;  %v6745_v23 = vpop.f32.mrb[229].mxu1  ;;  %v9289_v45 = vadd.f32 %v6852_v20, %v4978_v35 }
 0x442   : > { %v6746_v27 = vadd.f32 %v6745_v23, %v6744_v55  ;;  %v6747_v6 = vpop.f32.mrb[230].mxu1 }
 0x443   : > { %v6748_v18 = vpop.f32.mrb[231].mxu1  ;;  %v9291_v14 = vadd.f32 %v6855_v4, %v4981_v31 }
 0x444   : > { %v4986_v47 = vadd.f32 %v6746_v27, %v9204_v32  ;;  %v6749_v26 = vadd.f32 %v6748_v18, %v6747_v6 }
 0x445   : > { %v6856_v13 = vpop.f32.mrb[4].mxu0 }
 0x446   : > { %v6857_v15 = vpop.f32.mrb[5].mxu0  ;;  %v4989_v43 = vadd.f32 %v6749_v26, %v9206_v51 }
 0x447   : > { %v6858_v34 = vadd.f32 %v6857_v15, %v6856_v13  ;;  %v6859_v44 = vpop.f32.mrb[6].mxu0 }
 0x448   : > { %v6860_v33 = vpop.f32.mrb[7].mxu0  ;;  %v6750_v61 = vpop.f32.mrb[232].mxu1 }
 0x449   : > { %v6861_v30 = vadd.f32 %v6860_v33, %v6859_v44  ;;  %v6751_v19 = vpop.f32.mrb[233].mxu1  ;;  %v9295_v46 = vadd.f32 %v6858_v34, %v4986_v47 }
 0x44a   : > { %v6752_v40 = vadd.f32 %v6751_v19, %v6750_v61  ;;  %v6753_v7 = vpop.f32.mrb[234].mxu1 }
 0x44b   : > { %v6754_v52 = vpop.f32.mrb[235].mxu1  ;;  %v9297_v59 = vadd.f32 %v6861_v30, %v4989_v43 }
 0x44c   : > { %v4994_v32 = vadd.f32 %v6752_v40, %v9210_v57  ;;  %v6755_v2 = vadd.f32 %v6754_v52, %v6753_v7 }
 0x44d   : > { %v6862_v37 = vpop.f32.mrb[8].mxu0 }
 0x44e   : > { %v6863_v35 = vpop.f32.mrb[9].mxu0  ;;  %v4997_v51 = vadd.f32 %v6755_v2, %v9212_v21 }
 0x44f   : > { %v6864_v54 = vadd.f32 %v6863_v35, %v6862_v37  ;;  %v6865_v53 = vpop.f32.mrb[10].mxu0 }
 0x450   : > { %v6866_v49 = vpop.f32.mrb[11].mxu0  ;;  %v6756_v31 = vpop.f32.mrb[236].mxu1 }
 0x451   : > { %v6867_v20 = vadd.f32 %v6866_v49, %v6865_v53  ;;  %v6757_v11 = vpop.f32.mrb[237].mxu1  ;;  %v9301_v8 = vadd.f32 %v6864_v54, %v4994_v32 }
 0x452   : > { %v6758_v55 = vadd.f32 %v6757_v11, %v6756_v31  ;;  %v6759_v4 = vpop.f32.mrb[238].mxu1 }
 0x453   : > { %v6760_v23 = vpop.f32.mrb[239].mxu1  ;;  %v9303_v27 = vadd.f32 %v6867_v20, %v4997_v51 }
 0x454   : > { %v5002_v57 = vadd.f32 %v6758_v55, %v9218_v9  ;;  %v6761_v6 = vadd.f32 %v6760_v23, %v6759_v4 }
 0x455   : > { %v6868_v18 = vpop.f32.mrb[12].mxu0 }
 0x456   : > { %v6869_v47 = vpop.f32.mrb[13].mxu0  ;;  %v5005_v21 = vadd.f32 %v6761_v6, %v9221_v38 }
 0x457   : > { %v6870_v26 = vadd.f32 %v6869_v47, %v6868_v18  ;;  %v6871_v13 = vpop.f32.mrb[14].mxu0 }
 0x458   : > { %v6872_v15 = vpop.f32.mrb[15].mxu0  ;;  %v6762_v43 = vpop.f32.mrb[240].mxu1 }
 0x459   : > { %v6873_v34 = vadd.f32 %v6872_v15, %v6871_v13  ;;  %v6763_v44 = vpop.f32.mrb[241].mxu1  ;;  %v9307_v33 = vadd.f32 %v6870_v26, %v5002_v57 }
 0x45a   : > { %v6764_v61 = vadd.f32 %v6763_v44, %v6762_v43  ;;  %v6765_v30 = vpop.f32.mrb[242].mxu1 }
 0x45b   : > { %v6766_v19 = vpop.f32.mrb[243].mxu1  ;;  %v9309_v40 = vadd.f32 %v6873_v34, %v5005_v21 }
 0x45c   : > { %v5010_v9 = vadd.f32 %v6764_v61, %v9223_v24  ;;  %v6767_v7 = vadd.f32 %v6766_v19, %v6765_v30 }
 0x45d   : > { %v6874_v52 = vpop.f32.mrb[16].mxu0 }
 0x45e   : > { %v6875_v32 = vpop.f32.mrb[17].mxu0  ;;  %v5013_v38 = vadd.f32 %v6767_v7, %v9225_v17 }
 0x45f   : > { %v6876_v2 = vadd.f32 %v6875_v32, %v6874_v52  ;;  %v6877_v37 = vpop.f32.mrb[18].mxu0 }
 0x460   : > { %v6878_v35 = vpop.f32.mrb[19].mxu0  ;;  %v6768_v51 = vpop.f32.mrb[244].mxu1 }
 0x461   : > { %v6879_v54 = vadd.f32 %v6878_v35, %v6877_v37  ;;  %v6769_v53 = vpop.f32.mrb[245].mxu1  ;;  %v9313_v49 = vadd.f32 %v6876_v2, %v5010_v9 }
 0x462   : > { %v6770_v31 = vadd.f32 %v6769_v53, %v6768_v51  ;;  %v6771_v20 = vpop.f32.mrb[246].mxu1 }
 0x463   : > { %v6772_v11 = vpop.f32.mrb[247].mxu1  ;;  %v9315_v55 = vadd.f32 %v6879_v54, %v5013_v38 }
 0x464   : > { %v5018_v24 = vadd.f32 %v6770_v31, %v9227_v5  ;;  %v6773_v4 = vadd.f32 %v6772_v11, %v6771_v20 }
 0x465   : > { %v6880_v23 = vpop.f32.mrb[20].mxu0 }
 0x466   : > { %v6881_v57 = vpop.f32.mrb[21].mxu0  ;;  %v5021_v17 = vadd.f32 %v6773_v4, %v9229_v50 }
 0x467   : > { %v6882_v6 = vadd.f32 %v6881_v57, %v6880_v23  ;;  %v6883_v18 = vpop.f32.mrb[22].mxu0 }
 0x468   : > { %v6884_v47 = vpop.f32.mrb[23].mxu0  ;;  %v6774_v21 = vpop.f32.mrb[248].mxu1 }
 0x469   : > { %v6885_v26 = vadd.f32 %v6884_v47, %v6883_v18  ;;  %v6775_v13 = vpop.f32.mrb[249].mxu1  ;;  %v9319_v15 = vadd.f32 %v6882_v6, %v5018_v24  ;;  %v9334_v6 = vld [vmem:[%s9564_s5] ss:$0 sm:$0xff] }
 0x46a   : > { %v6776_v43 = vadd.f32 %v6775_v13, %v6774_v21  ;;  %v6777_v34 = vpop.f32.mrb[250].mxu1 }
 0x46b   : > { %v6778_v44 = vpop.f32.mrb[251].mxu1  ;;  %v9321_v61 = vadd.f32 %v6885_v26, %v5021_v17 }
 0x46c   : > { %v5026_v5 = vadd.f32 %v6776_v43, %v9231_v29  ;;  %v6779_v30 = vadd.f32 %v6778_v44, %v6777_v34  ;;  %v7318_v34 = vld [vmem:[%s7742_s19 + $0x8] sm:$0xf] }
 0x46d   : > { %v6886_v19 = vpop.f32.mrb[24].mxu0  ;;  %v5442_v44 = vunpack.c.l.bf16 %v7318_v34 }
 0x46e   : > { %v6887_v9 = vpop.f32.mrb[25].mxu0  ;;  %v5029_v50 = vadd.f32 %v6779_v30, %v9233_v0 }
 0x46f   : > { %v6888_v7 = vadd.f32 %v6887_v9, %v6886_v19  ;;  %v6889_v52 = vpop.f32.mrb[26].mxu0  ;;  %v7319_v9 = vld [vmem:[%s7742_s19] sm:$0xf] }
 0x470   : > { %v6890_v32 = vpop.f32.mrb[27].mxu0  ;;  %v6780_v38 = vpop.f32.mrb[252].mxu1 }
 0x471   : > { %v6891_v2 = vadd.f32 %v6890_v32, %v6889_v52  ;;  %v6781_v37 = vpop.f32.mrb[253].mxu1  ;;  %v9325_v35 = vadd.f32 %v6888_v7, %v5026_v5  ;;  %v7320_v32 = vld [vmem:[%s7742_s19 + $0xc] sm:$0xf] }
 0x472   : > { %v6782_v51 = vadd.f32 %v6781_v37, %v6780_v38  ;;  %v6783_v54 = vpop.f32.mrb[254].mxu1  ;;  %v5443_v38 = vunpack.c.l.bf16 %v7320_v32  ;;  %v7321_v37 = vld [vmem:[%s7742_s19 + $0x4] sm:$0xf] }
 0x473   : > { %v6784_v53 = vpop.f32.mrb[255].mxu1  ;;  %v9327_v31 = vadd.f32 %v6891_v2, %v5029_v50  ;;  %v5440_v50 = vunpack.c.l.bf16 %v7319_v9 }
 0x474   : > { %v5034_v29 = vadd.f32 %v6782_v51, %v9235_v12  ;;  %v6785_v20 = vadd.f32 %v6784_v53, %v6783_v54  ;;  %v5441_v51 = vunpack.c.l.bf16 %v7321_v37 }
 0x475   : > { %v6892_v11 = vpop.f32.mrb[28].mxu0 }
 0x476   : > { %v5037_v0 = vadd.f32 %v6785_v20, %v9237_v62  ;;  %v6893_v24 = vpop.f32.mrb[29].mxu0  ;;  %v9342_v62 = vld [vmem:[%s9565_s6] ss:$0 sm:$0xff] }
 0x477   : > { %v6894_v4 = vadd.f32 %v6893_v24, %v6892_v11  ;;  %v6895_v23 = vpop.f32.mrb[30].mxu0 }
 0x478   : > { %v6896_v57 = vpop.f32.mrb[31].mxu0  ;;  %v6988_v17 = vpop.f32.mrb[0].mxu1 }
 0x479   : > { %v6897_v18 = vadd.f32 %v6896_v57, %v6895_v23  ;;  %v5244_v47 = vadd.f32 %v6988_v17, %v9247_v25  ;;  %v5235_v12 = vpop.f32.mrb[1].mxu1  ;;  %v9337_v21 = vadd.f32 %v6894_v4, %v5034_v29 }
 0x47a   : > { %v5236_v26 = vadd.f32 %v5235_v12, %v9241_v41  ;;  %v6989_v13 = vpop.f32.mrb[2].mxu1 }
 0x47b   : > { %v5371_v43 = vmul.f32 %v9334_v6, %v5244_v47  ;;  %v5247_v25 = vadd.f32 %v6989_v13, %v9249_v10  ;;  %v5238_v5 = vpop.f32.mrb[3].mxu1  ;;  %v9348_v30 = vadd.f32 %v6897_v18, %v5037_v0 }
 0x47c   : > { %v5369_v19 = vmul.f32 %v9334_v6, %v5236_v26  ;;  %v5239_v7 = vadd.f32 %v5238_v5, %v9243_v63  ;;  %v7322_v26 = vld [vmem:[%s7742_s19 + $0x18] sm:$0xf] }
 0x47d   : > { %v5410_v41 = vadd.f32 %v9342_v62, %v5371_v43  ;;  %v5372_v52 = vmul.f32 %v9334_v6, %v5247_v25 }
 0x47e   : > { %v5408_v2 = vadd.f32 %v9342_v62, %v5369_v19  ;;  %v5370_v10 = vmul.f32 %v9334_v6, %v5239_v7 }
 0x47f   : > { %v5474_v54 = vadd.f32 %v5442_v44, %v5410_v41  ;;  %v5411_v53 = vadd.f32 %v9342_v62, %v5372_v52  ;;  %v7323_v44 = vld [vmem:[%s7742_s19 + $0x10] sm:$0xf]  ;;  %v7325_v52 = vld [vmem:[%s7742_s19 + $0x14] sm:$0xf] }
 0x480   : > { %v5472_v29 = vadd.f32 %v5440_v50, %v5408_v2  ;;  %v5409_v63 = vadd.f32 %v9342_v62, %v5370_v10  ;;  %v6992_v20 = vpop.f32.mrb[4].mxu1  ;;  %v5444_v25 = vunpack.c.l.bf16 %v7323_v44  ;;  %v7324_v50 = vld [vmem:[%s7742_s19 + $0x1c] sm:$0xf]  ;;  %v5445_v32 = vunpack.c.l.bf16 %v7325_v52  ;;  %v7329_v44 = vld [vmem:[%s7742_s19 + $0x24] sm:$0xf] }
 0x481   : > { %v5506_v11 = vmax.f32 %v5474_v54, 0.0  ;;  %v5475_v0 = vadd.f32 %v5443_v38, %v5411_v53  ;;  %v5260_v24 = vadd.f32 %v6992_v20, %v9259_v16  ;;  %v5251_v4 = vpop.f32.mrb[5].mxu1  ;;  %v5446_v16 = vunpack.c.l.bf16 %v7322_v26 }
 0x482   : > { %v5504_v23 = vmax.f32 %v5472_v29, 0.0  ;;  %v5473_v57 = vadd.f32 %v5441_v51, %v5409_v63  ;;  %v5252_v17 = vadd.f32 %v5251_v4, %v9253_v42  ;;  %v6993_v18 = vpop.f32.mrb[6].mxu1  ;;  %v5447_v7 = vunpack.c.l.bf16 %v7324_v50 }
 0x483   : > { %5538 = vst [vmem:[%s9364_s9 + $0x10] sm:$0xff] %v5506_v11  ;;  %v5507_v47 = vmax.f32 %v5475_v0, 0.0  ;;  %v5375_v12 = vmul.f32 %v9334_v6, %v5260_v24  ;;  %v5263_v13 = vadd.f32 %v6993_v18, %v9261_v60  ;;  %v5254_v43 = vpop.f32.mrb[7].mxu1 }
 0x484   : > { %5536 = vst [vmem:[%s9364_s9] sm:$0xff] %v5504_v23  ;;  %v5505_v42 = vmax.f32 %v5473_v57, 0.0  ;;  %v5373_v34 = vmul.f32 %v9334_v6, %v5252_v17  ;;  %v5255_v5 = vadd.f32 %v5254_v43, %v9255_v28  ;;  %v7326_v23 = vld [vmem:[%s7742_s19 + $0x28] sm:$0xf]  ;;  %v7328_v43 = vld [vmem:[%s7742_s19 + $0x2c] sm:$0xf] }
 0x485   : > { %5539 = vst [vmem:[%s9364_s9 + $0x18] sm:$0xff] %v5507_v47  ;;  %v5414_v19 = vadd.f32 %v9342_v62, %v5375_v12  ;;  %v5376_v9 = vmul.f32 %v9334_v6, %v5263_v13  ;;  %v5450_v57 = vunpack.c.l.bf16 %v7326_v23  ;;  %v7327_v12 = vld [vmem:[%s7742_s19 + $0x20] sm:$0xf] }
 0x486   : > { %5537 = vst [vmem:[%s9364_s9 + $0x8] sm:$0xff] %v5505_v42  ;;  %v5412_v60 = vadd.f32 %v9342_v62, %v5373_v34  ;;  %v5374_v41 = vmul.f32 %v9334_v6, %v5255_v5  ;;  %v5448_v26 = vunpack.c.l.bf16 %v7327_v12  ;;  %v5451_v42 = vunpack.c.l.bf16 %v7328_v43 }
 0x487   : > { %v5478_v38 = vadd.f32 %v5446_v16, %v5414_v19  ;;  %v5415_v2 = vadd.f32 %v9342_v62, %v5376_v9 }
 0x488   : > { %v5476_v28 = vadd.f32 %v5444_v25, %v5412_v60  ;;  %v5413_v10 = vadd.f32 %v9342_v62, %v5374_v41  ;;  %v6996_v37 = vpop.f32.mrb[8].mxu1  ;;  %v5449_v25 = vunpack.c.l.bf16 %v7329_v44 }
 0x489   : > { %v5510_v51 = vmax.f32 %v5478_v38, 0.0  ;;  %v5479_v54 = vadd.f32 %v5447_v7, %v5415_v2  ;;  %v5276_v53 = vadd.f32 %v6996_v37, %v9271_v48  ;;  %v5267_v29 = vpop.f32.mrb[9].mxu1 }
 0x48a   : > { %v5508_v63 = vmax.f32 %v5476_v28, 0.0  ;;  %v5477_v20 = vadd.f32 %v5445_v32, %v5413_v10  ;;  %v5268_v11 = vadd.f32 %v5267_v29, %v9265_v1  ;;  %v6997_v0 = vpop.f32.mrb[10].mxu1 }
 0x48b   : > { %5542 = vst [vmem:[%s9364_s9 + $0x30] sm:$0xff] %v5510_v51  ;;  %v5511_v24 = vmax.f32 %v5479_v54, 0.0  ;;  %v5379_v4 = vmul.f32 %v9334_v6, %v5276_v53  ;;  %v5279_v17 = vadd.f32 %v6997_v0, %v9273_v58  ;;  %v5270_v48 = vpop.f32.mrb[11].mxu1  ;;  %v7330_v51 = vld [vmem:[%s7742_s19 + $0x38] sm:$0xf] }
 0x48c   : > { %5540 = vst [vmem:[%s9364_s9 + $0x20] sm:$0xff] %v5508_v63  ;;  %v5509_v18 = vmax.f32 %v5477_v20, 0.0  ;;  %v5377_v47 = vmul.f32 %v9334_v6, %v5268_v11  ;;  %v5271_v1 = vadd.f32 %v5270_v48, %v9267_v56  ;;  %v5454_v54 = vunpack.c.l.bf16 %v7330_v51  ;;  %v7331_v20 = vld [vmem:[%s7742_s19 + $0x30] sm:$0xf] }
 0x48d   : > { %5543 = vst [vmem:[%s9364_s9 + $0x38] sm:$0xff] %v5511_v24  ;;  %v5418_v16 = vadd.f32 %v9342_v62, %v5379_v4  ;;  %v5380_v13 = vmul.f32 %v9334_v6, %v5279_v17  ;;  %v5452_v11 = vunpack.c.l.bf16 %v7331_v20  ;;  %v7332_v4 = vld [vmem:[%s7742_s19 + $0x3c] sm:$0xf]  ;;  %v7333_v17 = vld [vmem:[%s7742_s19 + $0x34] sm:$0xf] }
 0x48e   : > { %5541 = vst [vmem:[%s9364_s9 + $0x28] sm:$0xff] %v5509_v18  ;;  %v5416_v58 = vadd.f32 %v9342_v62, %v5377_v47  ;;  %v5378_v34 = vmul.f32 %v9334_v6, %v5271_v1  ;;  %v5455_v23 = vunpack.c.l.bf16 %v7332_v4  ;;  %v5453_v48 = vunpack.c.l.bf16 %v7333_v17 }
 0x48f   : > { %v5482_v5 = vadd.f32 %v5450_v57, %v5418_v16  ;;  %v5419_v19 = vadd.f32 %v9342_v62, %v5380_v13 }
 0x490   : > { %v5480_v56 = vadd.f32 %v5448_v26, %v5416_v58  ;;  %v5417_v9 = vadd.f32 %v9342_v62, %v5378_v34  ;;  %v7000_v50 = vpop.f32.mrb[12].mxu1 }
 0x491   : > { %v5514_v7 = vmax.f32 %v5482_v5, 0.0  ;;  %v5483_v60 = vadd.f32 %v5451_v42, %v5419_v19  ;;  %v5292_v41 = vadd.f32 %v7000_v50, %v9283_v3  ;;  %v5283_v52 = vpop.f32.mrb[13].mxu1  ;;  %v7334_v19 = vld [vmem:[%s7742_s19 + $0x48] sm:$0xf] }
 0x492   : > { %v5512_v32 = vmax.f32 %v5480_v56, 0.0  ;;  %v5481_v38 = vadd.f32 %v5449_v25, %v5417_v9  ;;  %v5284_v2 = vadd.f32 %v5283_v52, %v9277_v36  ;;  %v7001_v28 = vpop.f32.mrb[14].mxu1  ;;  %v5458_v56 = vunpack.c.l.bf16 %v7334_v19 }
 0x493   : > { %5546 = vst [vmem:[%s9364_s9 + $0x50] sm:$0xff] %v5514_v7  ;;  %v5515_v10 = vmax.f32 %v5483_v60, 0.0  ;;  %v5383_v37 = vmul.f32 %v9334_v6, %v5292_v41  ;;  %v5295_v53 = vadd.f32 %v7001_v28, %v9285_v22  ;;  %v5286_v3 = vpop.f32.mrb[15].mxu1  ;;  %v7335_v60 = vld [vmem:[%s7742_s19 + $0x40] sm:$0xf] }
 0x494   : > { %5544 = vst [vmem:[%s9364_s9 + $0x40] sm:$0xff] %v5512_v32  ;;  %v5513_v29 = vmax.f32 %v5481_v38, 0.0  ;;  %v5381_v63 = vmul.f32 %v9334_v6, %v5284_v2  ;;  %v5287_v36 = vadd.f32 %v5286_v3, %v9279_v39  ;;  %v5456_v41 = vunpack.c.l.bf16 %v7335_v60  ;;  %v7336_v38 = vld [vmem:[%s7742_s19 + $0x4c] sm:$0xf] }
 0x495   : > { %5547 = vst [vmem:[%s9364_s9 + $0x58] sm:$0xff] %v5515_v10  ;;  %v5422_v0 = vadd.f32 %v9342_v62, %v5383_v37  ;;  %v5384_v24 = vmul.f32 %v9334_v6, %v5295_v53  ;;  %v5459_v2 = vunpack.c.l.bf16 %v7336_v38  ;;  %v7337_v10 = vld [vmem:[%s7742_s19 + $0x44] sm:$0xf] }
 0x496   : > { %5545 = vst [vmem:[%s9364_s9 + $0x48] sm:$0xff] %v5513_v29  ;;  %v5420_v22 = vadd.f32 %v9342_v62, %v5381_v63  ;;  %v5382_v57 = vmul.f32 %v9334_v6, %v5287_v36  ;;  %v5457_v37 = vunpack.c.l.bf16 %v7337_v10  ;;  %v7343_v10 = vld [vmem:[%s7742_s19 + $0x60] sm:$0xf] }
 0x497   : > { %v5486_v18 = vadd.f32 %v5454_v54, %v5422_v0  ;;  %v5423_v47 = vadd.f32 %v9342_v62, %v5384_v24 }
 0x498   : > { %v5484_v39 = vadd.f32 %v5452_v11, %v5420_v22  ;;  %v5421_v12 = vadd.f32 %v9342_v62, %v5382_v57  ;;  %v7004_v26 = vpop.f32.mrb[16].mxu1  ;;  %v7338_v57 = vld [vmem:[%s7742_s19 + $0x58] sm:$0xf] }
 0x499   : > { %v5518_v1 = vmax.f32 %v5486_v18, 0.0  ;;  %v5487_v16 = vadd.f32 %v5455_v23, %v5423_v47  ;;  %v5308_v13 = vadd.f32 %v7004_v26, %v9295_v46  ;;  %v5299_v43 = vpop.f32.mrb[17].mxu1  ;;  %v5462_v17 = vunpack.c.l.bf16 %v7338_v57 }
 0x49a   : > { %v5516_v42 = vmax.f32 %v5484_v39, 0.0  ;;  %v5485_v58 = vadd.f32 %v5453_v48, %v5421_v12  ;;  %v5300_v34 = vadd.f32 %v5299_v43, %v9289_v45  ;;  %v7005_v44 = vpop.f32.mrb[18].mxu1  ;;  %v7339_v39 = vld [vmem:[%s7742_s19 + $0x50] sm:$0xf] }
 0x49b   : > { %5550 = vst [vmem:[%s9364_s9 + $0x70] sm:$0xff] %v5518_v1  ;;  %v5519_v25 = vmax.f32 %v5487_v16, 0.0  ;;  %v5387_v5 = vmul.f32 %v9334_v6, %v5308_v13  ;;  %v5311_v9 = vadd.f32 %v7005_v44, %v9297_v59  ;;  %v5302_v46 = vpop.f32.mrb[19].mxu1  ;;  %v5460_v12 = vunpack.c.l.bf16 %v7339_v39  ;;  %v7340_v16 = vld [vmem:[%s7742_s19 + $0x5c] sm:$0xf] }
 0x49c   : > { %5548 = vst [vmem:[%s9364_s9 + $0x60] sm:$0xff] %v5516_v42  ;;  %v5517_v50 = vmax.f32 %v5485_v58, 0.0  ;;  %v5385_v7 = vmul.f32 %v9334_v6, %v5300_v34  ;;  %v5303_v45 = vadd.f32 %v5302_v46, %v9291_v14  ;;  %v5463_v13 = vunpack.c.l.bf16 %v7340_v16  ;;  %v7341_v42 = vld [vmem:[%s7742_s19 + $0x54] sm:$0xf]  ;;  %v7346_v39 = vld [vmem:[%s7742_s19 + $0x78] sm:$0xf] }
 0x49d   : > { %5551 = vst [vmem:[%s9364_s9 + $0x78] sm:$0xff] %v5519_v25  ;;  %v5426_v52 = vadd.f32 %v9342_v62, %v5387_v5  ;;  %v5388_v32 = vmul.f32 %v9334_v6, %v5311_v9  ;;  %v5461_v58 = vunpack.c.l.bf16 %v7341_v42  ;;  %v7347_v16 = vld [vmem:[%s7742_s19 + $0x70] sm:$0xf]  ;;  %v7348_v42 = vld [vmem:[%s7742_s19 + $0x7c] sm:$0xf] }
 0x49e   : > { %5549 = vst [vmem:[%s9364_s9 + $0x68] sm:$0xff] %v5517_v50  ;;  %v5424_v59 = vadd.f32 %v9342_v62, %v5385_v7  ;;  %v5386_v28 = vmul.f32 %v9334_v6, %v5303_v45 }
 0x49f   : > { %v5490_v51 = vadd.f32 %v5458_v56, %v5426_v52  ;;  %v5427_v54 = vadd.f32 %v9342_v62, %v5388_v32  ;;  %v7342_v32 = vld [vmem:[%s7742_s19 + $0x68] sm:$0xf] }
 0x4a0   : > { %v5488_v14 = vadd.f32 %v5456_v41, %v5424_v59  ;;  %v5425_v53 = vadd.f32 %v9342_v62, %v5386_v28  ;;  %v7008_v3 = vpop.f32.mrb[20].mxu1  ;;  %v5466_v38 = vunpack.c.l.bf16 %v7342_v32 }
 0x4a1   : > { %v5522_v29 = vmax.f32 %v5490_v51, 0.0  ;;  %v5491_v63 = vadd.f32 %v5459_v2, %v5427_v54  ;;  %v5324_v20 = vadd.f32 %v7008_v3, %v9307_v33  ;;  %v5315_v11 = vpop.f32.mrb[21].mxu1 }
 0x4a2   : > { %v5520_v36 = vmax.f32 %v5488_v14, 0.0  ;;  %v5489_v0 = vadd.f32 %v5457_v37, %v5425_v53  ;;  %v5316_v24 = vadd.f32 %v5315_v11, %v9301_v8  ;;  %v7009_v4 = vpop.f32.mrb[22].mxu1  ;;  %v5464_v37 = vunpack.c.l.bf16 %v7343_v10  ;;  %v7344_v14 = vld [vmem:[%s7742_s19 + $0x6c] sm:$0xf] }
 0x4a3   : > { %5554 = vst [vmem:[%s9364_s9 + $0x90] sm:$0xff] %v5522_v29  ;;  %v5523_v23 = vmax.f32 %v5491_v63, 0.0  ;;  %v5391_v22 = vmul.f32 %v9334_v6, %v5324_v20  ;;  %v5327_v48 = vadd.f32 %v7009_v4, %v9309_v40  ;;  %v5318_v33 = vpop.f32.mrb[23].mxu1  ;;  %v5467_v53 = vunpack.c.l.bf16 %v7344_v14  ;;  %v7345_v29 = vld [vmem:[%s7742_s19 + $0x64] sm:$0xf] }
 0x4a4   : > { %5552 = vst [vmem:[%s9364_s9 + $0x80] sm:$0xff] %v5520_v36  ;;  %v5521_v18 = vmax.f32 %v5489_v0, 0.0  ;;  %v5389_v47 = vmul.f32 %v9334_v6, %v5316_v24  ;;  %v5319_v8 = vadd.f32 %v5318_v33, %v9303_v27  ;;  %v5465_v63 = vunpack.c.l.bf16 %v7345_v29 }
 0x4a5   : > { %5555 = vst [vmem:[%s9364_s9 + $0x98] sm:$0xff] %v5523_v23  ;;  %v5430_v26 = vadd.f32 %v9342_v62, %v5391_v22  ;;  %v5392_v1 = vmul.f32 %v9334_v6, %v5327_v48 }
 0x4a6   : > { %5553 = vst [vmem:[%s9364_s9 + $0x88] sm:$0xff] %v5521_v18  ;;  %v5428_v40 = vadd.f32 %v9342_v62, %v5389_v47  ;;  %v5390_v43 = vmul.f32 %v9334_v6, %v5319_v8 }
 0x4a7   : > { %v5494_v34 = vadd.f32 %v5462_v17, %v5430_v26  ;;  %v5431_v44 = vadd.f32 %v9342_v62, %v5392_v1 }
 0x4a8   : > { %v5492_v27 = vadd.f32 %v5460_v12, %v5428_v40  ;;  %v5429_v25 = vadd.f32 %v9342_v62, %v5390_v43  ;;  %v7012_v5 = vpop.f32.mrb[24].mxu1  ;;  %v5470_v12 = vunpack.c.l.bf16 %v7346_v39 }
 0x4a9   : > { %v5526_v19 = vmax.f32 %v5494_v34, 0.0  ;;  %v5495_v56 = vadd.f32 %v5463_v13, %v5431_v44  ;;  %v5340_v9 = vadd.f32 %v7012_v5, %v9319_v15  ;;  %v5331_v46 = vpop.f32.mrb[25].mxu1  ;;  %v5468_v13 = vunpack.c.l.bf16 %v7347_v16  ;;  %v7349_v44 = vld [vmem:[%s7742_s19 + $0x74] sm:$0xf] }
 0x4aa   : > { %v5524_v50 = vmax.f32 %v5492_v27, 0.0  ;;  %v5493_v7 = vadd.f32 %v5461_v58, %v5429_v25  ;;  %v5332_v60 = vadd.f32 %v5331_v46, %v9313_v49  ;;  %v7013_v41 = vpop.f32.mrb[26].mxu1  ;;  %v5471_v58 = vunpack.c.l.bf16 %v7348_v42 }
 0x4ab   : > { %5558 = vst [vmem:[%s9364_s9 + $0xb0] sm:$0xff] %v5526_v19  ;;  %v5527_v45 = vmax.f32 %v5495_v56, 0.0  ;;  %v5395_v52 = vmul.f32 %v9334_v6, %v5340_v9  ;;  %v5343_v2 = vadd.f32 %v7013_v41, %v9321_v61  ;;  %v5334_v15 = vpop.f32.mrb[27].mxu1  ;;  %v5469_v27 = vunpack.c.l.bf16 %v7349_v44 }
 0x4ac   : > { %5556 = vst [vmem:[%s9364_s9 + $0xa0] sm:$0xff] %v5524_v50  ;;  %v5525_v59 = vmax.f32 %v5493_v7, 0.0  ;;  %v5393_v28 = vmul.f32 %v9334_v6, %v5332_v60  ;;  %v5335_v49 = vadd.f32 %v5334_v15, %v9315_v55 }
 0x4ad   : > { %5559 = vst [vmem:[%s9364_s9 + $0xb8] sm:$0xff] %v5527_v45  ;;  %v5434_v51 = vadd.f32 %v9342_v62, %v5395_v52  ;;  %v5396_v54 = vmul.f32 %v9334_v6, %v5343_v2 }
 0x4ae   : > { %5557 = vst [vmem:[%s9364_s9 + $0xa8] sm:$0xff] %v5525_v59  ;;  %v5432_v61 = vadd.f32 %v9342_v62, %v5393_v28  ;;  %v5394_v3 = vmul.f32 %v9334_v6, %v5335_v49 }
 0x4af   : > { %v5498_v20 = vadd.f32 %v5466_v38, %v5434_v51  ;;  %v5435_v11 = vadd.f32 %v9342_v62, %v5396_v54 }
 0x4b0   : > { %v5496_v55 = vadd.f32 %v5464_v37, %v5432_v61  ;;  %v5433_v36 = vadd.f32 %v9342_v62, %v5394_v3  ;;  %v7016_v0 = vpop.f32.mrb[28].mxu1 }
 0x4b1   : > { %v5530_v24 = vmax.f32 %v5498_v20, 0.0  ;;  %v5499_v4 = vadd.f32 %v5467_v53, %v5435_v11  ;;  %v5356_v23 = vadd.f32 %v7016_v0, %v9337_v21  ;;  %v5347_v22 = vpop.f32.mrb[29].mxu1 }
 0x4b2   : > { %v5528_v57 = vmax.f32 %v5496_v55, 0.0  ;;  %v5497_v17 = vadd.f32 %v5465_v63, %v5433_v36  ;;  %v5348_v48 = vadd.f32 %v5347_v22, %v9325_v35  ;;  %v7017_v33 = vpop.f32.mrb[30].mxu1 }
 0x4b3   : > { %5562 = vst [vmem:[%s9364_s9 + $0xd0] sm:$0xff] %v5530_v24  ;;  %v5531_v18 = vmax.f32 %v5499_v4, 0.0  ;;  %v5399_v47 = vmul.f32 %v9334_v6, %v5356_v23  ;;  %v5359_v8 = vadd.f32 %v7017_v33, %v9348_v30  ;;  %v5350_v21 = vpop.f32.mrb[31].mxu1 }
 0x4b4   : > { %5560 = vst [vmem:[%s9364_s9 + $0xc0] sm:$0xff] %v5528_v57  ;;  %v5529_v26 = vmax.f32 %v5497_v17, 0.0  ;;  %v5397_v1 = vmul.f32 %v9334_v6, %v5348_v48  ;;  %v5351_v35 = vadd.f32 %v5350_v21, %v9327_v31 }
 0x4b5   : > { %5563 = vst [vmem:[%s9364_s9 + $0xd8] sm:$0xff] %v5531_v18  ;;  %v5438_v40 = vadd.f32 %v9342_v62, %v5399_v47  ;;  %v5400_v43 = vmul.f32 %v9334_v6, %v5359_v8 }
 0x4b6   : > { %5561 = vst [vmem:[%s9364_s9 + $0xc8] sm:$0xff] %v5529_v26  ;;  %v5436_v30 = vadd.f32 %v9342_v62, %v5397_v1  ;;  %v5398_v34 = vmul.f32 %v9334_v6, %v5351_v35 }
 0x4b7   : > { %v5502_v25 = vadd.f32 %v5470_v12, %v5438_v40  ;;  %v5439_v31 = vadd.f32 %v9342_v62, %v5400_v43 }
 0x4b8   : > { %v5500_v5 = vadd.f32 %v5468_v13, %v5436_v30  ;;  %v5437_v19 = vadd.f32 %v9342_v62, %v5398_v34 }
 0x4b9   : > { %v5534_v56 = vmax.f32 %v5502_v25, 0.0  ;;  %v5503_v9 = vadd.f32 %v5471_v58, %v5439_v31 }
 0x4ba   : > { %v5532_v46 = vmax.f32 %v5500_v5, 0.0  ;;  %v5501_v50 = vadd.f32 %v5469_v27, %v5437_v19 }
 0x4bb   : > { %5566 = vst [vmem:[%s9364_s9 + $0xf0] sm:$0xff] %v5534_v56  ;;  %v5535_v6 = vmax.f32 %v5503_v9, 0.0 }
 0x4bc   : > { %5564 = vst [vmem:[%s9364_s9 + $0xe0] sm:$0xff] %v5532_v46  ;;  %v5533_v62 = vmax.f32 %v5501_v50, 0.0 }
 0x4bd   : > { %5567 = vst [vmem:[%s9364_s9 + $0xf8] sm:$0xff] %v5535_v6 }
 0x4be   : > { %5565 = vst [vmem:[%s9364_s9 + $0xe8] sm:$0xff] %v5533_v62 }
 0x4bf   : > { %7449 = shalt.err (!%p7446_p1)
}
 0x4c0   : > { %s7450_s22 = scalar_lea.hbm %s9510_s13, 4096  ;;  %s7454_s9 = scalar_lea.hbm %s9566_s7, 8192 }
 0x4c1   : > { %p7451_p13 = scmp.ne.s32.totalorder %s9510_s13, %s7450_s22  ;;  %p7455_p4 = scmp.lt.u32.totalorder %s9510_s13, %s9566_s7 }
 0x4c2   : > { %p7456_p5 = scmp.lt.u32.totalorder %s7454_s9, %s7450_s22  ;;  %p7458_p11 = scmp.lt.u32.totalorder %s7450_s22, %s9510_s13 }
 0x4c3   : > { %p7452_p6 = pnand %p7451_p13, %p9590_p0 }
 0x4c4   : > { %p7457_p8 = por %p7456_p5, %p7455_p4 }
 0x4c5   : > { %p7453_p10 = pneg %p7452_p6 }
 0x4c6   : > { %p7459_p2 = por %p7458_p11, %p7457_p8 }
 0x4c8   : > { %p7460_p3 = pnand %p7459_p2, %p7453_p10 }
 0x4ca   : > { %7463 = shalt.err (!%p7460_p3)
}
 0x4cb   : > { %s7515_s10 = smov 128   ;;  %s7516_s15 = smov 8  }
 0x4cc   : > { %7028 = dma.vmem_to_hbm [thread:$0]  (%p9590_p0), %s9512_s11, 4096, %s9510_s13, %s5569_s28, %s7515_s10, %s7515_s10, %s7516_s15  }
 0x4cd PF: > { %s5597_s14 = sand.u32 1, %s7494_s24   ;;  %p9591_p7 = scmp.ne.s32.totalorder %s9572_s8, 0 }
 0x4ce   : > { %p9592_p9 = scmp.ge.s32.totalorder %s7506_s27, 2  ;;  %s5598_s21 = scalar_lea.sflag [#allocation5], %s5597_s14 }
 0x4d0   : > { %p7042_p12 = pnand %p9592_p9, %p9591_p7 }
 0x4d2   : > { %7489 = dma.done.wait (!%p7042_p12), %s5598_s21, 4096  }
 0x4d3   : > { %7491 = vsyncadd (!%p7042_p12), %s5598_s21, 4294963200  ;;  %p21_p1 = scmp.ge.s32.totalorder %s7673_s12, 4   ;;  %s9593_s24 = smov %s7498_s25 }
 0x4d4   : > { %s9594_s25 = smov %s7502_s26  ;;  %s9595_s26 = smov %s7689_s17 }
 0x4d5   : > { %s9596_s27 = smov %s7673_s12  ;;  %23 = sbr.rel (!%p21_p1) target bundleno = 6 (0x6), region = 103 }
 0x4dc   :  { %5603 = vsyncpa [#allocation4], 1 }
 0x4dd   :  { %5605 = vsyncpa [#allocation4 + $0x1], 1 }
 0x4de   :  { %5606 = vsyncpa [#allocation7], 1 }
 0x4df   :  { %5607 = vsyncpa [#allocation5], 1 }
 0x4e0   :  { %5609 = vsyncpa [#allocation5 + $0x1], 1 }

</bundles_post_ra>
